<compile_context>
chip_gen: v7x
topology: tpu7x:2x2x1
jax: 0.10.0
libtpu: 0.0.40
codegen_flags: <defaults>
</compile_context>

<pallas_src>
import numpy as np
import jax
import jax.numpy as jnp
from jax import lax
from jax.experimental import pallas as pl
from jax.experimental.pallas import tpu as pltpu


# tanh-GELU approximates nn.GELU()'s exact erf form to ~1e-3; it moves the work
# from a long VALU erf polynomial to the (otherwise idle) EUP tanh slot.
USE_TANH_GELU = True


# ---------------------------------------------------------------------------
# in-kernel helpers
# ---------------------------------------------------------------------------
def _layernorm(h, w, b, eps=1e-5):
    mu = jnp.mean(h, axis=-1, keepdims=True)
    var = jnp.mean((h - mu) ** 2, axis=-1, keepdims=True)
    return (h - mu) * lax.rsqrt(var + eps) * w + b


def _gelu_exact(x):
    # nn.GELU() default (erf form).
    return 0.5 * x * (1.0 + lax.erf(x * (1.0 / np.sqrt(2.0))))


def _gelu_tanh(x):
    c = float(np.sqrt(2.0 / np.pi))
    return 0.5 * x * (1.0 + jnp.tanh(c * (x + 0.044715 * (x * x * x))))


def make_gencoder_kernel(num_heads, dim_head, block_b, seq_len, dim):
    wd = num_heads * dim_head
    rows = block_b * seq_len
    gelu = _gelu_tanh if USE_TANH_GELU else _gelu_exact

    def kernel(hl_ref, x_ref, wqkv_ref, wout_ref, w1_ref, w2_ref,
               vec_ref, b1_ref, out_ref):
        # Flatten (block_b, T, D) -> (block_b*T, D): leading-dim reshape only.
        x = x_ref[...].reshape(rows, dim)        # f32
        hl = hl_ref[...].reshape(rows, dim)      # f32

        ln1_w, ln1_b = vec_ref[0], vec_ref[1]    # already folded: g1*w, g1*b + bt1
        ln2_w, ln2_b = vec_ref[2], vec_ref[3]    # already folded: g2*w, g2*b + bt2
        b_out, b2 = vec_ref[4], vec_ref[5]
        b1 = b1_ref[0]

        # ---- SLN #1 : g1*x*LN(hl) + bt1*x == x * LN(hl; g1*w, g1*b + bt1) ----
        h1 = x * _layernorm(hl, ln1_w, ln1_b)

        # ---- multi-head self attention ----
        # Wqkv^T columns host-permuted to [q|k|v] x [head] x [dim_head]
        # (matches einops 'b t (d k h) -> k b h t d'); q columns carry dim**-0.5.
        # Single dense bf16 cast of the whole qkv tensor.
        qkv = jnp.dot(h1.astype(jnp.bfloat16), wqkv_ref[...],
                      preferred_element_type=jnp.float32
                      ).astype(jnp.bfloat16)                      # (rows, 3*wd)

        def split_heads(base):
            # -> (H*block_b, T, dh) bf16, batch index g = h*block_b + b
            return jnp.stack(
                [qkv[:, base + h * dim_head: base + (h + 1) * dim_head]
                     .reshape(block_b, seq_len, dim_head)
                 for h in range(num_heads)], axis=0
            ).reshape(num_heads * block_b, seq_len, dim_head)

        q = split_heads(0)
        k = split_heads(wd)
        v = split_heads(2 * wd)

        # One batched einsum pair over (block_b * num_heads).
        s = jnp.einsum('gid,gjd->gij', q, k,
                       preferred_element_type=jnp.float32)         # (G, T, T) f32
        s = s - jnp.max(s, axis=-1, keepdims=True)
        p = jnp.exp(s)
        p = p * pl.reciprocal(jnp.sum(p, axis=-1, keepdims=True), approx=True)
        ctx = jnp.einsum('gij,gjd->gid', p.astype(jnp.bfloat16), v,
                         preferred_element_type=jnp.float32)        # (G, T, dh) f32
        ctx = ctx.astype(jnp.bfloat16)

        # 'b h t d -> (b t) (h d)' via lane concat, then one K=wd projection dot.
        ctx_cat = jnp.concatenate(
            [ctx[h * block_b:(h + 1) * block_b].reshape(rows, dim_head)
             for h in range(num_heads)], axis=-1)                   # (rows, wd) bf16
        proj = jnp.dot(ctx_cat, wout_ref[...],
                       preferred_element_type=jnp.float32)          # (rows, D) f32
        hl_temp = proj + b_out + hl

        # ---- SLN #2 + MLP ----
        h2 = x * _layernorm(hl_temp, ln2_w, ln2_b)
        m = jnp.dot(h2.astype(jnp.bfloat16), w1_ref[...],
                    preferred_element_type=jnp.float32) + b1        # (rows, hid)
        m = gelu(m)
        m = jnp.dot(m.astype(jnp.bfloat16), w2_ref[...],
                    preferred_element_type=jnp.float32) + b2        # (rows, D)
        out_ref[...] = (m + hl_temp).reshape(block_b, seq_len, dim).astype(out_ref.dtype)

    return kernel


# ---------------------------------------------------------------------------
# wrapper
# ---------------------------------------------------------------------------
def gencoder_block_forward(hl, x, params, *, num_heads, dim_head, block_b=None):
    B, T, D = x.shape
    wd = num_heads * dim_head
    hid = params["w1_t"].shape[1]
    if block_b is None:
        # v5e/v6e: one grid step (maximize M per MXU call); on v7x prefer
        # block_b = B // 2 so both TensorCores get a parallel grid step.
        block_b = B
    assert B % block_b == 0

    kernel = make_gencoder_kernel(num_heads, dim_head, block_b, T, D)
    hl_final = pl.pallas_call(
        kernel,
        out_shape=jax.ShapeDtypeStruct((B, T, D), jnp.float32),
        grid=(B // block_b,),
        in_specs=[
            pl.BlockSpec((block_b, T, D), lambda b: (b, 0, 0)),    # hl
            pl.BlockSpec((block_b, T, D), lambda b: (b, 0, 0)),    # x
            pl.BlockSpec((D, 3 * wd), lambda b: (0, 0)),           # Wqkv^T (perm, q-scaled), bf16
            pl.BlockSpec((wd, D), lambda b: (0, 0)),               # Wout^T, bf16
            pl.BlockSpec((D, hid), lambda b: (0, 0)),              # W1^T, bf16
            pl.BlockSpec((hid, D), lambda b: (0, 0)),              # W2^T, bf16
            pl.BlockSpec((6, D), lambda b: (0, 0)),                # folded LN params + b_out + b2
            pl.BlockSpec((1, hid), lambda b: (0, 0)),              # b1
        ],
        out_specs=pl.BlockSpec((block_b, T, D), lambda b: (b, 0, 0)),
        compiler_params=pltpu.CompilerParams(
            dimension_semantics=("parallel",)),
        # TODO(synk): for much larger dim/hid (esp. v7x's 64 MiB VMEM) set
        # vmem_limit_bytes and pipeline_mode=pl.Buffered(1) on the weight specs.
    )(hl, x, params["wqkv_t"], params["wout_t"], params["w1_t"],
      params["w2_t"], params["vec_d"], params["b1_row"])
    return x, hl_final


# ---------------------------------------------------------------------------
# deterministic parameter construction (torch-convention shapes) + packing
# ---------------------------------------------------------------------------
def init_raw_params(dim, num_heads, dim_head, mlp_ratio, seed=0):
    rng = np.random.default_rng(seed)
    wd = num_heads * dim_head
    hid = mlp_ratio * dim

    def nrm(*shape, s=0.05):
        return jnp.asarray(rng.normal(0.0, s, size=shape), jnp.float32)

    return dict(
        ln1_w=1.0 + nrm(dim, s=0.1), ln1_b=nrm(dim, s=0.1),
        ln2_w=1.0 + nrm(dim, s=0.1), ln2_b=nrm(dim, s=0.1),
        g1=float(rng.normal()), bt1=float(rng.normal()),
        g2=float(rng.normal()), bt2=float(rng.normal()),
        wqkv=nrm(3 * wd, dim),                        # nn.Linear(dim, 3*wd, bias=False)
        wout=nrm(dim, wd), bout=nrm(dim, s=0.02),     # nn.Linear(wd, dim)
        w1=nrm(hid, dim), b1=nrm(hid, s=0.02),        # MLP linear1
        w2=nrm(dim, hid), b2=nrm(dim, s=0.02),        # MLP linear2
    )


def pack_params(raw, num_heads, dim_head):
    wd = num_heads * dim_head
    dim = raw["wqkv"].shape[1]
    scale = dim ** (-0.5)   # matches Attention.scale_factor = dim ** (-0.5) in the spec

    # einops 'b t (d k h) -> k b h t d': original qkv feature index = (d*3 + k)*H + h.
    # Permute Wqkv^T columns so the kernel sees [k3-major | head | dim_head].
    c = np.arange(3 * wd).reshape(dim_head, 3, num_heads)    # c[d, k3, h] = old column
    perm = c.transpose(1, 2, 0).reshape(-1)                  # new col (k3, h, d) -> old col
    wqkv_t = np.asarray(raw["wqkv"]).T[:, perm].astype(np.float32)
    wqkv_t[:, :wd] *= scale                                  # fold softmax scale into q

    # Fold SLN scalars into the LayerNorm affine parameters:
    #   g * (norm*w + b) + bt == norm*(g*w) + (g*b + bt)
    ln1_w_eff = raw["g1"] * raw["ln1_w"]
    ln1_b_eff = raw["g1"] * raw["ln1_b"] + raw["bt1"]
    ln2_w_eff = raw["g2"] * raw["ln2_w"]
    ln2_b_eff = raw["g2"] * raw["ln2_b"] + raw["bt2"]

    vec_d = jnp.stack([ln1_w_eff, ln1_b_eff, ln2_w_eff, ln2_b_eff,
                       raw["bout"], raw["b2"]]).astype(jnp.float32)

    return dict(
        wqkv_t=jnp.asarray(wqkv_t, jnp.bfloat16),
        wout_t=jnp.asarray(np.asarray(raw["wout"]).T, jnp.bfloat16),   # (wd, dim)
        w1_t=jnp.asarray(np.asarray(raw["w1"]).T, jnp.bfloat16),
        w2_t=jnp.asarray(np.asarray(raw["w2"]).T, jnp.bfloat16),
        vec_d=vec_d,
        b1_row=raw["b1"][None, :].astype(jnp.float32),
    )


# ---------------------------------------------------------------------------
# pure-JAX reference (direct transcription of the PyTorch forward, exact erf GELU)
# ---------------------------------------------------------------------------
def gencoder_block_reference(hl, x, raw, *, num_heads, dim_head):
    B, T, D = x.shape
    wd = num_heads * dim_head
    scale = D ** (-0.5)

    def ln(h, w, b):
        mu = h.mean(-1, keepdims=True)
        var = ((h - mu) ** 2).mean(-1, keepdims=True)
        return (h - mu) / jnp.sqrt(var + 1e-5) * w + b

    h1 = raw["g1"] * x * ln(hl, raw["ln1_w"], raw["ln1_b"]) + raw["bt1"] * x
    qkv = h1 @ raw["wqkv"].T                                          # (B, T, 3*wd)
    qkvr = qkv.reshape(B, T, dim_head, 3, num_heads).transpose(3, 0, 4, 1, 2)
    q, k, v = qkvr[0], qkvr[1], qkvr[2]                               # (B, H, T, d)
    attn = jnp.einsum("bhid,bhjd->bhij", q, k) * scale
    attn = jax.nn.softmax(attn, axis=-1)
    res = jnp.einsum("bhij,bhjd->bhid", attn, v)
    res = res.transpose(0, 2, 1, 3).reshape(B, T, wd)
    res = res @ raw["wout"].T + raw["bout"]
    hl_temp = res + hl
    h2 = raw["g2"] * x * ln(hl_temp, raw["ln2_w"], raw["ln2_b"]) + raw["bt2"] * x
    m = h2 @ raw["w1"].T + raw["b1"]
    m = 0.5 * m * (1.0 + jax.scipy.special.erf(m / np.sqrt(2.0)))
    m = m @ raw["w2"].T + raw["b2"]
    hl_final = m + hl_temp
    return x, hl_final


# ---------------------------------------------------------------------------
if __name__ == "__main__":
    # Small GEncoderBlock config: dim=32, 4 heads (dim_head=None path -> 8),
    # mlp_ratio=4 (hidden=128), 64 tokens, batch 2.
    dim = 32
    num_heads = 4
    dim_head = dim // num_heads
    mlp_ratio = 4
    B, T = 2, 64

    key = jax.random.PRNGKey(0)
    k_hl, k_x = jax.random.split(key)
    hl = jax.random.normal(k_hl, (B, T, dim), jnp.float32)
    x = jax.random.normal(k_x, (B, T, dim), jnp.float32)

    raw = init_raw_params(dim, num_heads, dim_head, mlp_ratio, seed=0)
    params = pack_params(raw, num_heads, dim_head)

    x_out, hl_final = gencoder_block_forward(hl, x, params,
                                             num_heads=num_heads, dim_head=dim_head)
    hl_final = jax.block_until_ready(hl_final)
    assert x_out.shape == x.shape
    assert hl_final.shape == hl.shape and hl_final.dtype == jnp.float32

    x_ref, hl_ref = gencoder_block_reference(hl, x, raw,
                                             num_heads=num_heads, dim_head=dim_head)
    hl_ref = jax.block_until_ready(hl_ref)
    # bf16 matmuls, approx reciprocal softmax and tanh-GELU deviate slightly from
    # the f32 / exact-erf PyTorch forward; all well inside the 2e-2 tolerance.
    np.testing.assert_allclose(np.asarray(x_out), np.asarray(x_ref), rtol=0, atol=0)
    np.testing.assert_allclose(np.asarray(hl_final), np.asarray(hl_ref),
                               rtol=2e-2, atol=2e-2)
    print("KERNEL_OK")
</pallas_src>

<mosaic_0001>
module attributes {stable_mosaic.version = 11 : i64} {
  func.func @kernel(%arg0: i32, %arg1: memref<2x64x32xf32, #tpu.memory_space<vmem>>, %arg2: memref<2x64x32xf32, #tpu.memory_space<vmem>>, %arg3: memref<32x96xbf16, #tpu.memory_space<vmem>>, %arg4: memref<32x32xbf16, #tpu.memory_space<vmem>>, %arg5: memref<32x128xbf16, #tpu.memory_space<vmem>>, %arg6: memref<128x32xbf16, #tpu.memory_space<vmem>>, %arg7: memref<6x32xf32, #tpu.memory_space<vmem>>, %arg8: memref<1x128xf32, #tpu.memory_space<vmem>>, %arg9: memref<2x64x32xf32, #tpu.memory_space<vmem>>) attributes {dimension_semantics = [#tpu.dimension_semantics<parallel>], iteration_bounds = array<i64: 1>, scalar_prefetch = 0 : i64, scratch_operands = 0 : i64, tpu.core_type = #tpu.core_type<tc>, window_params = [{transform_indices = @transform_0, window_bounds = array<i64: 2, 64, 32>}, {transform_indices = @transform_1, window_bounds = array<i64: 2, 64, 32>}, {pipeline_mode = #tpu.pipeline_mode<synchronous>, transform_indices = @transform_2, window_bounds = array<i64: 32, 96>}, {pipeline_mode = #tpu.pipeline_mode<synchronous>, transform_indices = @transform_3, window_bounds = array<i64: 32, 32>}, {pipeline_mode = #tpu.pipeline_mode<synchronous>, transform_indices = @transform_4, window_bounds = array<i64: 32, 128>}, {pipeline_mode = #tpu.pipeline_mode<synchronous>, transform_indices = @transform_5, window_bounds = array<i64: 128, 32>}, {pipeline_mode = #tpu.pipeline_mode<synchronous>, transform_indices = @transform_6, window_bounds = array<i64: 6, 32>}, {pipeline_mode = #tpu.pipeline_mode<synchronous>, transform_indices = @transform_7, window_bounds = array<i64: 1, 128>}, {transform_indices = @transform_8, window_bounds = array<i64: 2, 64, 32>}]} {
    %c0 = arith.constant 0 : index
    %c0_0 = arith.constant 0 : index
    %c0_1 = arith.constant 0 : index
    %0 = vector.load %arg2[%c0, %c0_0, %c0_1] : memref<2x64x32xf32, #tpu.memory_space<vmem>>, vector<2x64x32xf32>
    %1 = vector.shape_cast %0 : vector<2x64x32xf32> to vector<128x32xf32>
    %c0_2 = arith.constant 0 : index
    %c0_3 = arith.constant 0 : index
    %c0_4 = arith.constant 0 : index
    %2 = vector.load %arg1[%c0_2, %c0_3, %c0_4] : memref<2x64x32xf32, #tpu.memory_space<vmem>>, vector<2x64x32xf32>
    %3 = vector.shape_cast %2 : vector<2x64x32xf32> to vector<128x32xf32>
    %c0_5 = arith.constant 0 : index
    %c0_6 = arith.constant 0 : index
    %4 = vector.load %arg7[%c0_5, %c0_6] : memref<6x32xf32, #tpu.memory_space<vmem>>, vector<1x32xf32>
    %5 = vector.shape_cast %4 : vector<1x32xf32> to vector<32xf32>
    %c1 = arith.constant 1 : index
    %c0_7 = arith.constant 0 : index
    %6 = vector.load %arg7[%c1, %c0_7] : memref<6x32xf32, #tpu.memory_space<vmem>>, vector<1x32xf32>
    %7 = vector.shape_cast %6 : vector<1x32xf32> to vector<32xf32>
    %c2 = arith.constant 2 : index
    %c0_8 = arith.constant 0 : index
    %8 = vector.load %arg7[%c2, %c0_8] : memref<6x32xf32, #tpu.memory_space<vmem>>, vector<1x32xf32>
    %9 = vector.shape_cast %8 : vector<1x32xf32> to vector<32xf32>
    %c3 = arith.constant 3 : index
    %c0_9 = arith.constant 0 : index
    %10 = vector.load %arg7[%c3, %c0_9] : memref<6x32xf32, #tpu.memory_space<vmem>>, vector<1x32xf32>
    %11 = vector.shape_cast %10 : vector<1x32xf32> to vector<32xf32>
    %c4 = arith.constant 4 : index
    %c0_10 = arith.constant 0 : index
    %12 = vector.load %arg7[%c4, %c0_10] : memref<6x32xf32, #tpu.memory_space<vmem>>, vector<1x32xf32>
    %13 = vector.shape_cast %12 : vector<1x32xf32> to vector<32xf32>
    %c5 = arith.constant 5 : index
    %c0_11 = arith.constant 0 : index
    %14 = vector.load %arg7[%c5, %c0_11] : memref<6x32xf32, #tpu.memory_space<vmem>>, vector<1x32xf32>
    %15 = vector.shape_cast %14 : vector<1x32xf32> to vector<32xf32>
    %c0_12 = arith.constant 0 : index
    %c0_13 = arith.constant 0 : index
    %16 = vector.load %arg8[%c0_12, %c0_13] : memref<1x128xf32, #tpu.memory_space<vmem>>, vector<1x128xf32>
    %17 = vector.shape_cast %16 : vector<1x128xf32> to vector<128xf32>
    %cst = arith.constant dense<0.000000e+00> : vector<128xf32>
    %18 = vector.multi_reduction <add>, %3, %cst [1] : vector<128x32xf32> to vector<128xf32>
    %19 = vector.shape_cast %18 : vector<128xf32> to vector<128x1xf32>
    %cst_14 = arith.constant 3.200000e+01 : f32
    %20 = vector.broadcast %cst_14 : f32 to vector<128x1xf32>
    %21 = arith.divf %19, %20 : vector<128x1xf32>
    %22 = vector.broadcast %21 : vector<128x1xf32> to vector<128x32xf32>
    %23 = arith.subf %3, %22 : vector<128x32xf32>
    %24 = arith.mulf %23, %23 : vector<128x32xf32>
    %cst_15 = arith.constant dense<0.000000e+00> : vector<128xf32>
    %25 = vector.multi_reduction <add>, %24, %cst_15 [1] : vector<128x32xf32> to vector<128xf32>
    %26 = vector.shape_cast %25 : vector<128xf32> to vector<128x1xf32>
    %cst_16 = arith.constant 3.200000e+01 : f32
    %27 = vector.broadcast %cst_16 : f32 to vector<128x1xf32>
    %28 = arith.divf %26, %27 : vector<128x1xf32>
    %29 = vector.broadcast %21 : vector<128x1xf32> to vector<128x32xf32>
    %30 = arith.subf %3, %29 : vector<128x32xf32>
    %cst_17 = arith.constant 9.99999974E-6 : f32
    %31 = vector.broadcast %cst_17 : f32 to vector<128x1xf32>
    %32 = arith.addf %28, %31 : vector<128x1xf32>
    %33 = math.rsqrt %32 : vector<128x1xf32>
    %34 = vector.broadcast %33 : vector<128x1xf32> to vector<128x32xf32>
    %35 = arith.mulf %30, %34 : vector<128x32xf32>
    %36 = vector.shape_cast %5 : vector<32xf32> to vector<1x32xf32>
    %37 = vector.broadcast %36 : vector<1x32xf32> to vector<128x32xf32>
    %38 = arith.mulf %35, %37 : vector<128x32xf32>
    %39 = vector.shape_cast %7 : vector<32xf32> to vector<1x32xf32>
    %40 = vector.broadcast %39 : vector<1x32xf32> to vector<128x32xf32>
    %41 = arith.addf %38, %40 : vector<128x32xf32>
    %42 = arith.mulf %1, %41 : vector<128x32xf32>
    %43 = arith.truncf %42 : vector<128x32xf32> to vector<128x32xbf16>
    %c0_18 = arith.constant 0 : index
    %c0_19 = arith.constant 0 : index
    %44 = vector.load %arg3[%c0_18, %c0_19] : memref<32x96xbf16, #tpu.memory_space<vmem>>, vector<32x96xbf16>
    %cst_20 = arith.constant dense<0.000000e+00> : vector<128x96xf32>
    %45 = tpu.matmul %43, %44, %cst_20 {dimension_numbers = #tpu.dot_dimension_numbers<[1], [0], [0], [1], [0, 0, 1, 1], [], []>} : vector<128x32xbf16>, vector<32x96xbf16>, vector<128x96xf32> -> vector<128x96xf32>
    %46 = arith.truncf %45 : vector<128x96xf32> to vector<128x96xbf16>
    %47 = vector.extract_strided_slice %46 {offsets = [0, 0], sizes = [128, 8], strides = [1, 1]} : vector<128x96xbf16> to vector<128x8xbf16>
    %48 = vector.shape_cast %47 : vector<128x8xbf16> to vector<2x64x8xbf16>
    %49 = vector.extract_strided_slice %46 {offsets = [0, 8], sizes = [128, 8], strides = [1, 1]} : vector<128x96xbf16> to vector<128x8xbf16>
    %50 = vector.shape_cast %49 : vector<128x8xbf16> to vector<2x64x8xbf16>
    %51 = vector.extract_strided_slice %46 {offsets = [0, 16], sizes = [128, 8], strides = [1, 1]} : vector<128x96xbf16> to vector<128x8xbf16>
    %52 = vector.shape_cast %51 : vector<128x8xbf16> to vector<2x64x8xbf16>
    %53 = vector.extract_strided_slice %46 {offsets = [0, 24], sizes = [128, 8], strides = [1, 1]} : vector<128x96xbf16> to vector<128x8xbf16>
    %54 = vector.shape_cast %53 : vector<128x8xbf16> to vector<2x64x8xbf16>
    %55 = vector.shape_cast %48 : vector<2x64x8xbf16> to vector<1x2x64x8xbf16>
    %56 = vector.shape_cast %50 : vector<2x64x8xbf16> to vector<1x2x64x8xbf16>
    %57 = vector.shape_cast %52 : vector<2x64x8xbf16> to vector<1x2x64x8xbf16>
    %58 = vector.shape_cast %54 : vector<2x64x8xbf16> to vector<1x2x64x8xbf16>
    %59 = tpu.concatenate %55, %56, %57, %58 in 0 : vector<1x2x64x8xbf16>, vector<1x2x64x8xbf16>, vector<1x2x64x8xbf16>, vector<1x2x64x8xbf16> -> vector<4x2x64x8xbf16>
    %60 = vector.shape_cast %59 : vector<4x2x64x8xbf16> to vector<8x64x8xbf16>
    %61 = vector.extract_strided_slice %46 {offsets = [0, 32], sizes = [128, 8], strides = [1, 1]} : vector<128x96xbf16> to vector<128x8xbf16>
    %62 = vector.shape_cast %61 : vector<128x8xbf16> to vector<2x64x8xbf16>
    %63 = vector.extract_strided_slice %46 {offsets = [0, 40], sizes = [128, 8], strides = [1, 1]} : vector<128x96xbf16> to vector<128x8xbf16>
    %64 = vector.shape_cast %63 : vector<128x8xbf16> to vector<2x64x8xbf16>
    %65 = vector.extract_strided_slice %46 {offsets = [0, 48], sizes = [128, 8], strides = [1, 1]} : vector<128x96xbf16> to vector<128x8xbf16>
    %66 = vector.shape_cast %65 : vector<128x8xbf16> to vector<2x64x8xbf16>
    %67 = vector.extract_strided_slice %46 {offsets = [0, 56], sizes = [128, 8], strides = [1, 1]} : vector<128x96xbf16> to vector<128x8xbf16>
    %68 = vector.shape_cast %67 : vector<128x8xbf16> to vector<2x64x8xbf16>
    %69 = vector.shape_cast %62 : vector<2x64x8xbf16> to vector<1x2x64x8xbf16>
    %70 = vector.shape_cast %64 : vector<2x64x8xbf16> to vector<1x2x64x8xbf16>
    %71 = vector.shape_cast %66 : vector<2x64x8xbf16> to vector<1x2x64x8xbf16>
    %72 = vector.shape_cast %68 : vector<2x64x8xbf16> to vector<1x2x64x8xbf16>
    %73 = tpu.concatenate %69, %70, %71, %72 in 0 : vector<1x2x64x8xbf16>, vector<1x2x64x8xbf16>, vector<1x2x64x8xbf16>, vector<1x2x64x8xbf16> -> vector<4x2x64x8xbf16>
    %74 = vector.shape_cast %73 : vector<4x2x64x8xbf16> to vector<8x64x8xbf16>
    %75 = vector.extract_strided_slice %46 {offsets = [0, 64], sizes = [128, 8], strides = [1, 1]} : vector<128x96xbf16> to vector<128x8xbf16>
    %76 = vector.shape_cast %75 : vector<128x8xbf16> to vector<2x64x8xbf16>
    %77 = vector.extract_strided_slice %46 {offsets = [0, 72], sizes = [128, 8], strides = [1, 1]} : vector<128x96xbf16> to vector<128x8xbf16>
    %78 = vector.shape_cast %77 : vector<128x8xbf16> to vector<2x64x8xbf16>
    %79 = vector.extract_strided_slice %46 {offsets = [0, 80], sizes = [128, 8], strides = [1, 1]} : vector<128x96xbf16> to vector<128x8xbf16>
    %80 = vector.shape_cast %79 : vector<128x8xbf16> to vector<2x64x8xbf16>
    %81 = vector.extract_strided_slice %46 {offsets = [0, 88], sizes = [128, 8], strides = [1, 1]} : vector<128x96xbf16> to vector<128x8xbf16>
    %82 = vector.shape_cast %81 : vector<128x8xbf16> to vector<2x64x8xbf16>
    %83 = vector.shape_cast %76 : vector<2x64x8xbf16> to vector<1x2x64x8xbf16>
    %84 = vector.shape_cast %78 : vector<2x64x8xbf16> to vector<1x2x64x8xbf16>
    %85 = vector.shape_cast %80 : vector<2x64x8xbf16> to vector<1x2x64x8xbf16>
    %86 = vector.shape_cast %82 : vector<2x64x8xbf16> to vector<1x2x64x8xbf16>
    %87 = tpu.concatenate %83, %84, %85, %86 in 0 : vector<1x2x64x8xbf16>, vector<1x2x64x8xbf16>, vector<1x2x64x8xbf16>, vector<1x2x64x8xbf16> -> vector<4x2x64x8xbf16>
    %88 = vector.shape_cast %87 : vector<4x2x64x8xbf16> to vector<8x64x8xbf16>
    "tpu.trace_start"() <{level = 10 : i32, message = "gid,gjd->gij"}> : () -> ()
    %cst_21 = arith.constant dense<0.000000e+00> : vector<8x64x64xf32>
    %89 = tpu.matmul %60, %74, %cst_21 {dimension_numbers = #tpu.dot_dimension_numbers<[2], [2], [1], [1], [0, 0, 0, 1, 1, 1], [0], [0]>} : vector<8x64x8xbf16>, vector<8x64x8xbf16>, vector<8x64x64xf32> -> vector<8x64x64xf32>
    "tpu.trace_stop"() : () -> ()
    %cst_22 = arith.constant dense<0xFF800000> : vector<8x64xf32>
    %90 = vector.multi_reduction <maximumf>, %89, %cst_22 [2] : vector<8x64x64xf32> to vector<8x64xf32>
    %91 = vector.shape_cast %90 : vector<8x64xf32> to vector<8x64x1xf32>
    %92 = vector.broadcast %91 : vector<8x64x1xf32> to vector<8x64x64xf32>
    %93 = arith.subf %89, %92 : vector<8x64x64xf32>
    %94 = math.exp %93 : vector<8x64x64xf32>
    %cst_23 = arith.constant dense<0.000000e+00> : vector<8x64xf32>
    %95 = vector.multi_reduction <add>, %94, %cst_23 [2] : vector<8x64x64xf32> to vector<8x64xf32>
    %96 = vector.shape_cast %95 : vector<8x64xf32> to vector<8x64x1xf32>
    %97 = tpu.reciprocal %96 {approx = true} : vector<8x64x1xf32> -> vector<8x64x1xf32>
    %98 = vector.broadcast %97 : vector<8x64x1xf32> to vector<8x64x64xf32>
    %99 = arith.mulf %94, %98 : vector<8x64x64xf32>
    %100 = arith.truncf %99 : vector<8x64x64xf32> to vector<8x64x64xbf16>
    "tpu.trace_start"() <{level = 10 : i32, message = "gij,gjd->gid"}> : () -> ()
    %cst_24 = arith.constant dense<0.000000e+00> : vector<8x64x8xf32>
    %101 = tpu.matmul %100, %88, %cst_24 {dimension_numbers = #tpu.dot_dimension_numbers<[2], [1], [1], [2], [0, 0, 0, 1, 1, 2], [0], [0]>} : vector<8x64x64xbf16>, vector<8x64x8xbf16>, vector<8x64x8xf32> -> vector<8x64x8xf32>
    "tpu.trace_stop"() : () -> ()
    %102 = arith.truncf %101 : vector<8x64x8xf32> to vector<8x64x8xbf16>
    %103 = vector.extract_strided_slice %102 {offsets = [0, 0, 0], sizes = [2, 64, 8], strides = [1, 1, 1]} : vector<8x64x8xbf16> to vector<2x64x8xbf16>
    %104 = vector.shape_cast %103 : vector<2x64x8xbf16> to vector<128x8xbf16>
    %105 = vector.extract_strided_slice %102 {offsets = [2, 0, 0], sizes = [2, 64, 8], strides = [1, 1, 1]} : vector<8x64x8xbf16> to vector<2x64x8xbf16>
    %106 = vector.shape_cast %105 : vector<2x64x8xbf16> to vector<128x8xbf16>
    %107 = vector.extract_strided_slice %102 {offsets = [4, 0, 0], sizes = [2, 64, 8], strides = [1, 1, 1]} : vector<8x64x8xbf16> to vector<2x64x8xbf16>
    %108 = vector.shape_cast %107 : vector<2x64x8xbf16> to vector<128x8xbf16>
    %109 = vector.extract_strided_slice %102 {offsets = [6, 0, 0], sizes = [2, 64, 8], strides = [1, 1, 1]} : vector<8x64x8xbf16> to vector<2x64x8xbf16>
    %110 = vector.shape_cast %109 : vector<2x64x8xbf16> to vector<128x8xbf16>
    %111 = tpu.concatenate %104, %106, %108, %110 in 1 : vector<128x8xbf16>, vector<128x8xbf16>, vector<128x8xbf16>, vector<128x8xbf16> -> vector<128x32xbf16>
    %c0_25 = arith.constant 0 : index
    %c0_26 = arith.constant 0 : index
    %112 = vector.load %arg4[%c0_25, %c0_26] : memref<32x32xbf16, #tpu.memory_space<vmem>>, vector<32x32xbf16>
    %cst_27 = arith.constant dense<0.000000e+00> : vector<128x32xf32>
    %113 = tpu.matmul %111, %112, %cst_27 {dimension_numbers = #tpu.dot_dimension_numbers<[1], [0], [0], [1], [0, 0, 1, 1], [], []>} : vector<128x32xbf16>, vector<32x32xbf16>, vector<128x32xf32> -> vector<128x32xf32>
    %114 = vector.shape_cast %13 : vector<32xf32> to vector<1x32xf32>
    %115 = vector.broadcast %114 : vector<1x32xf32> to vector<128x32xf32>
    %116 = arith.addf %113, %115 : vector<128x32xf32>
    %117 = arith.addf %116, %3 : vector<128x32xf32>
    %cst_28 = arith.constant dense<0.000000e+00> : vector<128xf32>
    %118 = vector.multi_reduction <add>, %117, %cst_28 [1] : vector<128x32xf32> to vector<128xf32>
    %119 = vector.shape_cast %118 : vector<128xf32> to vector<128x1xf32>
    %cst_29 = arith.constant 3.200000e+01 : f32
    %120 = vector.broadcast %cst_29 : f32 to vector<128x1xf32>
    %121 = arith.divf %119, %120 : vector<128x1xf32>
    %122 = vector.broadcast %121 : vector<128x1xf32> to vector<128x32xf32>
    %123 = arith.subf %117, %122 : vector<128x32xf32>
    %124 = arith.mulf %123, %123 : vector<128x32xf32>
    %cst_30 = arith.constant dense<0.000000e+00> : vector<128xf32>
    %125 = vector.multi_reduction <add>, %124, %cst_30 [1] : vector<128x32xf32> to vector<128xf32>
    %126 = vector.shape_cast %125 : vector<128xf32> to vector<128x1xf32>
    %cst_31 = arith.constant 3.200000e+01 : f32
    %127 = vector.broadcast %cst_31 : f32 to vector<128x1xf32>
    %128 = arith.divf %126, %127 : vector<128x1xf32>
    %129 = vector.broadcast %121 : vector<128x1xf32> to vector<128x32xf32>
    %130 = arith.subf %117, %129 : vector<128x32xf32>
    %cst_32 = arith.constant 9.99999974E-6 : f32
    %131 = vector.broadcast %cst_32 : f32 to vector<128x1xf32>
    %132 = arith.addf %128, %131 : vector<128x1xf32>
    %133 = math.rsqrt %132 : vector<128x1xf32>
    %134 = vector.broadcast %133 : vector<128x1xf32> to vector<128x32xf32>
    %135 = arith.mulf %130, %134 : vector<128x32xf32>
    %136 = vector.shape_cast %9 : vector<32xf32> to vector<1x32xf32>
    %137 = vector.broadcast %136 : vector<1x32xf32> to vector<128x32xf32>
    %138 = arith.mulf %135, %137 : vector<128x32xf32>
    %139 = vector.shape_cast %11 : vector<32xf32> to vector<1x32xf32>
    %140 = vector.broadcast %139 : vector<1x32xf32> to vector<128x32xf32>
    %141 = arith.addf %138, %140 : vector<128x32xf32>
    %142 = arith.mulf %1, %141 : vector<128x32xf32>
    %143 = arith.truncf %142 : vector<128x32xf32> to vector<128x32xbf16>
    %c0_33 = arith.constant 0 : index
    %c0_34 = arith.constant 0 : index
    %144 = vector.load %arg5[%c0_33, %c0_34] : memref<32x128xbf16, #tpu.memory_space<vmem>>, vector<32x128xbf16>
    %cst_35 = arith.constant dense<0.000000e+00> : vector<128x128xf32>
    %145 = tpu.matmul %143, %144, %cst_35 {dimension_numbers = #tpu.dot_dimension_numbers<[1], [0], [0], [1], [0, 0, 1, 1], [], []>} : vector<128x32xbf16>, vector<32x128xbf16>, vector<128x128xf32> -> vector<128x128xf32>
    %146 = vector.shape_cast %17 : vector<128xf32> to vector<1x128xf32>
    %147 = vector.broadcast %146 : vector<1x128xf32> to vector<128x128xf32>
    %148 = arith.addf %145, %147 : vector<128x128xf32>
    %cst_36 = arith.constant 5.000000e-01 : f32
    %149 = vector.broadcast %cst_36 : f32 to vector<128x128xf32>
    %150 = arith.mulf %149, %148 : vector<128x128xf32>
    %151 = arith.mulf %148, %148 : vector<128x128xf32>
    %152 = arith.mulf %151, %148 : vector<128x128xf32>
    %cst_37 = arith.constant 4.471500e-02 : f32
    %153 = vector.broadcast %cst_37 : f32 to vector<128x128xf32>
    %154 = arith.mulf %153, %152 : vector<128x128xf32>
    %155 = arith.addf %148, %154 : vector<128x128xf32>
    %cst_38 = arith.constant 0.797884583 : f32
    %156 = vector.broadcast %cst_38 : f32 to vector<128x128xf32>
    %157 = arith.mulf %156, %155 : vector<128x128xf32>
    %158 = math.tanh %157 : vector<128x128xf32>
    %cst_39 = arith.constant 1.000000e+00 : f32
    %159 = vector.broadcast %cst_39 : f32 to vector<128x128xf32>
    %160 = arith.addf %159, %158 : vector<128x128xf32>
    %161 = arith.mulf %150, %160 : vector<128x128xf32>
    %162 = arith.truncf %161 : vector<128x128xf32> to vector<128x128xbf16>
    %c0_40 = arith.constant 0 : index
    %c0_41 = arith.constant 0 : index
    %163 = vector.load %arg6[%c0_40, %c0_41] : memref<128x32xbf16, #tpu.memory_space<vmem>>, vector<128x32xbf16>
    %cst_42 = arith.constant dense<0.000000e+00> : vector<128x32xf32>
    %164 = tpu.matmul %162, %163, %cst_42 {dimension_numbers = #tpu.dot_dimension_numbers<[1], [0], [0], [1], [0, 0, 1, 1], [], []>} : vector<128x128xbf16>, vector<128x32xbf16>, vector<128x32xf32> -> vector<128x32xf32>
    %165 = vector.shape_cast %15 : vector<32xf32> to vector<1x32xf32>
    %166 = vector.broadcast %165 : vector<1x32xf32> to vector<128x32xf32>
    %167 = arith.addf %164, %166 : vector<128x32xf32>
    %168 = arith.addf %167, %117 : vector<128x32xf32>
    %169 = vector.shape_cast %168 : vector<128x32xf32> to vector<2x64x32xf32>
    %c0_43 = arith.constant 0 : index
    %c0_44 = arith.constant 0 : index
    %c0_45 = arith.constant 0 : index
    %170 = vector.load %arg9[%c0_43, %c0_44, %c0_45] : memref<2x64x32xf32, #tpu.memory_space<vmem>>, vector<2x64x32xf32>
    tpu.vector_store %arg9[%c0_43, %c0_44, %c0_45], %169 {strides = array<i32>} : memref<2x64x32xf32, #tpu.memory_space<vmem>>, vector<2x64x32xf32>,
    return
  }
  func.func @transform_0(%arg0: i32) -> (i32, i32, i32) {
    %c0_i32 = arith.constant 0 : i32
    %c0_i32_0 = arith.constant 0 : i32
    %c0_i32_1 = arith.constant 0 : i32
    return %arg0, %c0_i32, %c0_i32_0 : i32, i32, i32
  }
  func.func @transform_1(%arg0: i32) -> (i32, i32, i32) {
    %c0_i32 = arith.constant 0 : i32
    %c0_i32_0 = arith.constant 0 : i32
    %c0_i32_1 = arith.constant 0 : i32
    return %arg0, %c0_i32, %c0_i32_0 : i32, i32, i32
  }
  func.func @transform_2(%arg0: i32) -> (i32, i32) {
    %c0_i32 = arith.constant 0 : i32
    %c0_i32_0 = arith.constant 0 : i32
    %c0_i32_1 = arith.constant 0 : i32
    return %c0_i32, %c0_i32_0 : i32, i32
  }
  func.func @transform_3(%arg0: i32) -> (i32, i32) {
    %c0_i32 = arith.constant 0 : i32
    %c0_i32_0 = arith.constant 0 : i32
    %c0_i32_1 = arith.constant 0 : i32
    return %c0_i32, %c0_i32_0 : i32, i32
  }
  func.func @transform_4(%arg0: i32) -> (i32, i32) {
    %c0_i32 = arith.constant 0 : i32
    %c0_i32_0 = arith.constant 0 : i32
    %c0_i32_1 = arith.constant 0 : i32
    return %c0_i32, %c0_i32_0 : i32, i32
  }
  func.func @transform_5(%arg0: i32) -> (i32, i32) {
    %c0_i32 = arith.constant 0 : i32
    %c0_i32_0 = arith.constant 0 : i32
    %c0_i32_1 = arith.constant 0 : i32
    return %c0_i32, %c0_i32_0 : i32, i32
  }
  func.func @transform_6(%arg0: i32) -> (i32, i32) {
    %c0_i32 = arith.constant 0 : i32
    %c0_i32_0 = arith.constant 0 : i32
    %c0_i32_1 = arith.constant 0 : i32
    return %c0_i32, %c0_i32_0 : i32, i32
  }
  func.func @transform_7(%arg0: i32) -> (i32, i32) {
    %c0_i32 = arith.constant 0 : i32
    %c0_i32_0 = arith.constant 0 : i32
    %c0_i32_1 = arith.constant 0 : i32
    return %c0_i32, %c0_i32_0 : i32, i32
  }
  func.func @transform_8(%arg0: i32) -> (i32, i32, i32) {
    %c0_i32 = arith.constant 0 : i32
    %c0_i32_0 = arith.constant 0 : i32
    %c0_i32_1 = arith.constant 0 : i32
    return %arg0, %c0_i32, %c0_i32_0 : i32, i32, i32
  }
}

</mosaic_0001>

<bundles_post_ra>
// kernel: tpu_custom_call.1
= control target key start
LH: loop header
LB: loop body
LE: loop exit
PB: predicated region body
PF: predicated region fallthrough
CT: control target
= control target key end

     0   :  { %vm69_vm0 = vcmask 261120   ;;  %vm552_vm1 = vcmask 64512   ;;  %s4918_s9 = smov 120   ;;  %s4919_s10 = smov 96   ;;  %vm1321_vm2 = vcmask 523264   ;;  %vm2898_vm3 = vcmask 130048   ;;  %s7105_s0 = inlined_call_operand.vmem [shape: f32[2,64,32], index: 0, kind: input, shape index: {}]   ;;  %s7106_s2 = inlined_call_operand.vmem [shape: bf16[32,96], index: 2, kind: input, shape index: {}]   ;;  %s7107_s6 = inlined_call_operand.vmem [shape: f32[6,32], index: 6, kind: input, shape index: {}]   ;;  %s7108_s1 = inlined_call_operand.vmem [shape: f32[2,64,32], index: 1, kind: input, shape index: {}]   ;;  %s7109_s3 = inlined_call_operand.vmem [shape: bf16[32,32], index: 3, kind: input, shape index: {}]   ;;  %s7110_s4 = inlined_call_operand.vmem [shape: bf16[32,128], index: 4, kind: input, shape index: {}]   ;;  %s7111_s5 = inlined_call_operand.vmem [shape: bf16[128,32], index: 5, kind: input, shape index: {}]   ;;  %s7112_s7 = inlined_call_operand.vmem [shape: f32[1,128], index: 7, kind: input, shape index: {}]   ;;  %s7113_s8 = inlined_call_operand.vmem [shape: f32[2,64,32], index: 8, kind: output, shape index: {}]  }
   0x1   :  { %v46_v0 = vld [vmem:[%s7105_s0] sm:$0xff]  ;;  %v48_v1 = vld [vmem:[%s7105_s0 + $0x10] sm:$0xff]  ;;  %v47_v2 = vld [vmem:[%s7105_s0 + $0x8] sm:$0xff]  ;;  %s4920_s11 = smov 112   ;;  %s4921_s12 = smov 104   ;;  %vm2915_vm4 = vcmask 195584  }
   0x2   :  { %v70_v3 = vsel %vm69_vm0, %v46_v0, 0.0  ;;  %v76_v4 = vsel %vm69_vm0, %v48_v1, 0.0  ;;  %v49_v5 = vld [vmem:[%s7105_s0 + $0x18] sm:$0xff]  ;;  %v73_v6 = vsel %vm69_vm0, %v47_v2, 0.0  ;;  %v50_v8 = vld [vmem:[%s7105_s0 + $0x20] sm:$0xff]  ;;  %v51_v9 = vld [vmem:[%s7105_s0 + $0x28] sm:$0xff] }
   0x3   :  { %71 = vadd.xlane.f32.xlu0 %v70_v3  ;;  %77 = vadd.xlane.f32.xlu1 %v76_v4  ;;  %v79_v7 = vsel %vm69_vm0, %v49_v5, 0.0  ;;  %v82_v10 = vsel %vm69_vm0, %v50_v8, 0.0  ;;  %v85_v11 = vsel %vm69_vm0, %v51_v9, 0.0  ;;  %v4998_v12 = vld [vmem:[%s7105_s0 + $0x30] sm:$0xff]  ;;  %v5003_v13 = vld [vmem:[%s7105_s0 + $0x38] sm:$0xff]  ;;  %v5012_v16 = vld [vmem:[%s7105_s0 + $0x40] sm:$0xff] }
   0x4   :  { %v88_v14 = vsel %vm69_vm0, %v4998_v12, 0.0  ;;  %v91_v15 = vsel %vm69_vm0, %v5003_v13, 0.0  ;;  %v5017_v17 = vld [vmem:[%s7105_s0 + $0x48] sm:$0xff]  ;;  %v94_v18 = vsel %vm69_vm0, %v5012_v16, 0.0  ;;  %v5026_v20 = vld [vmem:[%s7105_s0 + $0x50] sm:$0xff]  ;;  %v5031_v21 = vld [vmem:[%s7105_s0 + $0x58] sm:$0xff] }
   0x5   :  { %v97_v19 = vsel %vm69_vm0, %v5017_v17, 0.0  ;;  %v100_v22 = vsel %vm69_vm0, %v5026_v20, 0.0  ;;  %v103_v23 = vsel %vm69_vm0, %v5031_v21, 0.0  ;;  %v5040_v24 = vld [vmem:[%s7105_s0 + $0x60] sm:$0xff]  ;;  %v5045_v25 = vld [vmem:[%s7105_s0 + $0x68] sm:$0xff]  ;;  %v5054_v28 = vld [vmem:[%s7105_s0 + $0x70] sm:$0xff] }
   0x6   :  { %v106_v26 = vsel %vm69_vm0, %v5040_v24, 0.0  ;;  %v109_v27 = vsel %vm69_vm0, %v5045_v25, 0.0  ;;  %v5059_v29 = vld [vmem:[%s7105_s0 + $0x78] sm:$0xff]  ;;  %v112_v30 = vsel %vm69_vm0, %v5054_v28, 0.0  ;;  %s4922_s13 = smov 64   ;;  %s4923_s14 = smov 8  }
   0x7   :  { %74 = vadd.xlane.f32.xlu0 %v73_v6  ;;  %80 = vadd.xlane.f32.xlu1 %v79_v7  ;;  %v115_v31 = vsel %vm69_vm0, %v5059_v29, 0.0 }
   0xb   :  { %83 = vadd.xlane.f32.xlu0 %v82_v10  ;;  %86 = vadd.xlane.f32.xlu1 %v85_v11 }
   0xf   :  { %89 = vadd.xlane.f32.xlu0 %v88_v14  ;;  %92 = vadd.xlane.f32.xlu1 %v91_v15 }
  0x13   :  { %95 = vadd.xlane.f32.xlu0 %v94_v18  ;;  %98 = vadd.xlane.f32.xlu1 %v97_v19 }
  0x17   :  { %101 = vadd.xlane.f32.xlu0 %v100_v22  ;;  %104 = vadd.xlane.f32.xlu1 %v103_v23 }
  0x1b   :  { %107 = vadd.xlane.f32.xlu0 %v106_v26  ;;  %110 = vadd.xlane.f32.xlu1 %v109_v27 }
  0x1f   :  { %113 = vadd.xlane.f32.xlu0 %v112_v30  ;;  %116 = vadd.xlane.f32.xlu1 %v115_v31 }
  0x90   :  { %v72_v32 = vpop.xlane.xlu0 %71  ;;  %v78_v33 = vpop.xlane.xlu1 %77 }
  0x91   :  { %v119_v34 = vmul.f32 0.03125, %v72_v32  ;;  %v121_v35 = vmul.f32 0.03125, %v78_v33 }
  0x93   :  { %v5065_v36 = vsub.f32 %v46_v0, %v119_v34  ;;  %v5067_v37 = vsub.f32 %v48_v1, %v121_v35 }
  0x94   :  { %v75_v38 = vpop.xlane.xlu0 %74  ;;  %v81_v39 = vpop.xlane.xlu1 %80 }
  0x95   :  { %v120_v40 = vmul.f32 0.03125, %v75_v38  ;;  %v122_v41 = vmul.f32 0.03125, %v81_v39  ;;  %v151_v42 = vmul.f32 %v5065_v36, %v5065_v36  ;;  %v153_v43 = vmul.f32 %v5067_v37, %v5067_v37 }
  0x97   :  { %v5073_v44 = vsub.f32 %v47_v2, %v120_v40  ;;  %v5075_v45 = vsub.f32 %v49_v5, %v122_v41  ;;  %v167_v46 = vsel %vm69_vm0, %v151_v42, 0.0  ;;  %v173_v49 = vsel %vm69_vm0, %v153_v43, 0.0 }
  0x98   :  { %168 = vadd.xlane.f32.xlu0 %v167_v46  ;;  %v84_v47 = vpop.xlane.xlu0 %83  ;;  %v87_v48 = vpop.xlane.xlu1 %86 }
  0x99   :  { %v123_v50 = vmul.f32 0.03125, %v84_v47  ;;  %v124_v51 = vmul.f32 0.03125, %v87_v48  ;;  %v152_v52 = vmul.f32 %v5073_v44, %v5073_v44  ;;  %v154_v53 = vmul.f32 %v5075_v45, %v5075_v45 }
  0x9b   :  { %v5083_v54 = vsub.f32 %v50_v8, %v123_v50  ;;  %v5085_v55 = vsub.f32 %v51_v9, %v124_v51  ;;  %v170_v56 = vsel %vm69_vm0, %v152_v52, 0.0  ;;  %v176_v59 = vsel %vm69_vm0, %v154_v53, 0.0  ;;  %v4521_v53 = vld [vmem:[%s7106_s2 + $0x8] sm:$0xff]  }
  0x9c   :  { %174 = vadd.xlane.f32.xlu0 %v173_v49  ;;  %171 = vadd.xlane.f32.xlu1 %v170_v56  ;;  %v90_v57 = vpop.xlane.xlu0 %89  ;;  %v93_v58 = vpop.xlane.xlu1 %92 }
  0x9d   :  { %v125_v60 = vmul.f32 0.03125, %v90_v57  ;;  %v126_v61 = vmul.f32 0.03125, %v93_v58  ;;  %v155_v62 = vmul.f32 %v5083_v54, %v5083_v54  ;;  %v156_v63 = vmul.f32 %v5085_v55, %v5085_v55 }
  0x9f   :  { %v5094_v0 = vsub.f32 %v4998_v12, %v125_v60  ;;  %v5097_v1 = vsub.f32 %v5003_v13, %v126_v61  ;;  %v179_v2 = vsel %vm69_vm0, %v155_v62, 0.0  ;;  %v182_v5 = vsel %vm69_vm0, %v156_v63, 0.0 }
  0xa0   :  { %177 = vadd.xlane.f32.xlu1 %v176_v59  ;;  %180 = vadd.xlane.f32.xlu0 %v179_v2  ;;  %v96_v3 = vpop.xlane.xlu0 %95  ;;  %v99_v4 = vpop.xlane.xlu1 %98 }
  0xa1   :  { %v127_v6 = vmul.f32 0.03125, %v96_v3  ;;  %v128_v7 = vmul.f32 0.03125, %v99_v4  ;;  %v157_v8 = vmul.f32 %v5094_v0, %v5094_v0  ;;  %v158_v9 = vmul.f32 %v5097_v1, %v5097_v1 }
  0xa3   :  { %v5106_v10 = vsub.f32 %v5012_v16, %v127_v6  ;;  %v5109_v11 = vsub.f32 %v5017_v17, %v128_v7  ;;  %v185_v12 = vsel %vm69_vm0, %v157_v8, 0.0  ;;  %v188_v15 = vsel %vm69_vm0, %v158_v9, 0.0 }
  0xa4   :  { %183 = vadd.xlane.f32.xlu1 %v182_v5  ;;  %186 = vadd.xlane.f32.xlu0 %v185_v12  ;;  %v102_v13 = vpop.xlane.xlu0 %101  ;;  %v105_v14 = vpop.xlane.xlu1 %104 }
  0xa5   :  { %v129_v18 = vmul.f32 0.03125, %v102_v13  ;;  %v130_v19 = vmul.f32 0.03125, %v105_v14  ;;  %v159_v22 = vmul.f32 %v5106_v10, %v5106_v10  ;;  %v160_v16 = vmul.f32 %v5109_v11, %v5109_v11 }
  0xa7   :  { %v5118_v23 = vsub.f32 %v5026_v20, %v129_v18  ;;  %v5121_v17 = vsub.f32 %v5031_v21, %v130_v19  ;;  %v191_v26 = vsel %vm69_vm0, %v159_v22, 0.0  ;;  %v194_v31 = vsel %vm69_vm0, %v160_v16, 0.0  ;;  %v5164_v22 = vld [vmem:[%s7107_s6] ss:$0 sm:$0xff] }
  0xa8   :  { %189 = vadd.xlane.f32.xlu1 %v188_v15  ;;  %192 = vadd.xlane.f32.xlu0 %v191_v26  ;;  %v108_v27 = vpop.xlane.xlu0 %107  ;;  %v111_v30 = vpop.xlane.xlu1 %110 }
  0xa9   :  { %v131_v32 = vmul.f32 0.03125, %v108_v27  ;;  %v132_v33 = vmul.f32 0.03125, %v111_v30  ;;  %v161_v34 = vmul.f32 %v5118_v23, %v5118_v23  ;;  %v162_v20 = vmul.f32 %v5121_v17, %v5121_v17 }
  0xab   :  { %v5130_v35 = vsub.f32 %v5040_v24, %v131_v32  ;;  %v5133_v21 = vsub.f32 %v5045_v25, %v132_v33  ;;  %v197_v38 = vsel %vm69_vm0, %v161_v34, 0.0  ;;  %v200_v41 = vsel %vm69_vm0, %v162_v20, 0.0  ;;  %v5170_v32 = vld [vmem:[%s7107_s6 + $0x1] ss:$0 sm:$0xff] }
  0xac   :  { %195 = vadd.xlane.f32.xlu1 %v194_v31  ;;  %198 = vadd.xlane.f32.xlu0 %v197_v38  ;;  %v114_v39 = vpop.xlane.xlu0 %113  ;;  %v117_v40 = vpop.xlane.xlu1 %116 }
  0xad   :  { %v133_v42 = vmul.f32 0.03125, %v114_v39  ;;  %v134_v43 = vmul.f32 0.03125, %v117_v40  ;;  %v163_v46 = vmul.f32 %v5130_v35, %v5130_v35  ;;  %v164_v24 = vmul.f32 %v5133_v21, %v5133_v21 }
  0xaf   :  { %v5142_v47 = vsub.f32 %v5054_v28, %v133_v42  ;;  %v5145_v25 = vsub.f32 %v5059_v29, %v134_v43  ;;  %v203_v48 = vsel %vm69_vm0, %v163_v46, 0.0  ;;  %v206_v49 = vsel %vm69_vm0, %v164_v24, 0.0  ;;  %v4520_v29 = vld [vmem:[%s7106_s2] sm:$0xff]   ;;  %s4924_s2 = smov 16  }
  0xb0   :  { %201 = vadd.xlane.f32.xlu1 %v200_v41  ;;  %204 = vadd.xlane.f32.xlu0 %v203_v48  ;;  %v30_v48 = vld [vmem:[%s7108_s1] sm:$0xff] }
  0xb1   :  { %v165_v50 = vmul.f32 %v5142_v47, %v5142_v47  ;;  %v166_v51 = vmul.f32 %v5145_v25, %v5145_v25  ;;  %4132 = vmatprep.subr.bf16.mxu0 %v4520_v29 }
  0xb2   :  { %4133 = vmatpush3.bf16.msra.mxu0 %v4520_v29 }
  0xb3   :  { %v209_v52 = vsel %vm69_vm0, %v165_v50, 0.0  ;;  %v212_v28 = vsel %vm69_vm0, %v166_v51, 0.0  ;;  %4134 = vmatprep.subr.bf16.mxu0 %v4521_v53 }
  0xb4   :  { %207 = vadd.xlane.f32.xlu1 %v206_v49  ;;  %210 = vadd.xlane.f32.xlu0 %v209_v52 }
  0xb6   :  { %4135 = vmatpush3.bf16.msra.mxu0 %v4521_v53 }
  0xb8   :  { %213 = vadd.xlane.f32.xlu1 %v212_v28 }
 0x125   :  { %v169_v56 = vpop.xlane.xlu0 %168 }
 0x126   :  { %v215_v57 = vmul.f32 0.03125, %v169_v56 }
 0x128   :  { %v231_v58 = vadd.f32 1e-05, %v215_v57 }
 0x129   :  { %v172_v59 = vpop.xlane.xlu1 %171  ;;  %v175_v60 = vpop.xlane.xlu0 %174 }
 0x12a   :  { %4534 = vrsqrt.f32 %v231_v58  ;;  %v216_v61 = vmul.f32 0.03125, %v172_v59  ;;  %v217_v62 = vmul.f32 0.03125, %v175_v60 }
 0x12c   :  { %v232_v63 = vadd.f32 1e-05, %v216_v61  ;;  %v233_v2 = vadd.f32 1e-05, %v217_v62  ;;  %v32_v62 = vld [vmem:[%s7108_s1 + $0x10] sm:$0xff] }
 0x12d   :  { %v178_v3 = vpop.xlane.xlu1 %177  ;;  %v181_v4 = vpop.xlane.xlu0 %180 }
 0x12e   :  { %4536 = vrsqrt.f32 %v232_v63  ;;  %v218_v5 = vmul.f32 0.03125, %v178_v3  ;;  %v219_v6 = vmul.f32 0.03125, %v181_v4 }
 0x12f   :  { %4538 = vrsqrt.f32 %v233_v2 }
 0x130   :  { %v234_v7 = vadd.f32 1e-05, %v218_v5  ;;  %v235_v8 = vadd.f32 1e-05, %v219_v6 }
 0x131   :  { %v184_v9 = vpop.xlane.xlu1 %183  ;;  %v187_v12 = vpop.xlane.xlu0 %186 }
 0x132   :  { %4540 = vrsqrt.f32 %v234_v7  ;;  %v220_v13 = vmul.f32 0.03125, %v184_v9  ;;  %v221_v14 = vmul.f32 0.03125, %v187_v12 }
 0x133   :  { %4542 = vrsqrt.f32 %v235_v8 }
 0x134   :  { %v4535_v15 = vpop.eup %4534  ;;  %v236_v18 = vadd.f32 1e-05, %v220_v13  ;;  %v237_v19 = vadd.f32 1e-05, %v221_v14 }
 0x135   :  { %v190_v16 = vpop.xlane.xlu1 %189  ;;  %v193_v26 = vpop.xlane.xlu0 %192  ;;  %v263_v27 = vmul.f32 %v4535_v15, %v5065_v36 }
 0x136   :  { %4544 = vrsqrt.f32 %v236_v18  ;;  %v222_v30 = vmul.f32 0.03125, %v190_v16  ;;  %v223_v31 = vmul.f32 0.03125, %v193_v26 }
 0x137   :  { %4546 = vrsqrt.f32 %v237_v19  ;;  %v283_v33 = vmul.f32 %v5164_v22, %v263_v27  ;;  %v34_v27 = vld [vmem:[%s7108_s1 + $0x20] sm:$0xff] }
 0x138   :  { %v4537_v34 = vpop.eup %4536  ;;  %v238_v20 = vadd.f32 1e-05, %v222_v30  ;;  %v239_v38 = vadd.f32 1e-05, %v223_v31 }
 0x139   :  { %v4539_v39 = vpop.eup %4538  ;;  %v196_v40 = vpop.xlane.xlu1 %195  ;;  %v264_v42 = vmul.f32 %v4537_v34, %v5073_v44  ;;  %v303_v36 = vadd.f32 %v5170_v32, %v283_v33  ;;  %v31_v44 = vld [vmem:[%s7108_s1 + $0x8] sm:$0xff] }
 0x13a   :  { %v199_v41 = vpop.xlane.xlu0 %198  ;;  %v265_v43 = vmul.f32 %v4539_v39, %v5067_v37  ;;  %4548 = vrsqrt.f32 %v238_v20  ;;  %v224_v46 = vmul.f32 0.03125, %v196_v40 }
 0x13b   :  { %v225_v24 = vmul.f32 0.03125, %v199_v41  ;;  %4550 = vrsqrt.f32 %v239_v38  ;;  %v284_v49 = vmul.f32 %v5164_v22, %v264_v42  ;;  %v319_v58 = vmul.f32 %v303_v36, %v30_v48 }
 0x13c   :  { %v4541_v50 = vpop.eup %4540  ;;  %v240_v51 = vadd.f32 1e-05, %v224_v46  ;;  %v285_v28 = vmul.f32 %v5164_v22, %v265_v43 }
 0x13d   :  { %v241_v52 = vadd.f32 1e-05, %v225_v24  ;;  %v4543_v37 = vpop.eup %4542  ;;  %v266_v29 = vmul.f32 %v4541_v50, %v5075_v45  ;;  %v202_v53 = vpop.xlane.xlu1 %201  ;;  %v304_v57 = vadd.f32 %v5170_v32, %v284_v49 }
 0x13e   :  { %v205_v56 = vpop.xlane.xlu0 %204  ;;  %v267_v59 = vmul.f32 %v4543_v37, %v5083_v54  ;;  %4552 = vrsqrt.f32 %v240_v51  ;;  %v226_v60 = vmul.f32 0.03125, %v202_v53  ;;  %v305_v45 = vadd.f32 %v5170_v32, %v285_v28  ;;  %v33_v54 = vld [vmem:[%s7108_s1 + $0x18] sm:$0xff] }
 0x13f   :  { %v227_v61 = vmul.f32 0.03125, %v205_v56  ;;  %4554 = vrsqrt.f32 %v241_v52  ;;  %v320_v63 = vmul.f32 %v304_v57, %v31_v44  ;;  %v286_v2 = vmul.f32 %v5164_v22, %v266_v29 }
 0x140   :  { %v4545_v3 = vpop.eup %4544  ;;  %v242_v4 = vadd.f32 1e-05, %v226_v60  ;;  %v287_v6 = vmul.f32 %v5164_v22, %v267_v59  ;;  %v321_v15 = vmul.f32 %v305_v45, %v32_v62 }
 0x141   :  { %v243_v5 = vadd.f32 1e-05, %v227_v61  ;;  %v4547_v7 = vpop.eup %4546  ;;  %v268_v8 = vmul.f32 %v4545_v3, %v5085_v55  ;;  %v208_v9 = vpop.xlane.xlu1 %207  ;;  %v335_v13 = vpack.c.bf16 %v320_v63, %v319_v58  ;;  %v306_v14 = vadd.f32 %v5170_v32, %v286_v2  ;;  %v38_v61 = vld [vmem:[%s7108_s1 + $0x40] sm:$0xff] }
 0x142   :  { %v211_v12 = vpop.xlane.xlu0 %210  ;;  %v269_v18 = vmul.f32 %v4547_v7, %v5094_v0  ;;  %4556 = vrsqrt.f32 %v242_v4  ;;  %v228_v19 = vmul.f32 0.03125, %v208_v9  ;;  %v307_v30 = vadd.f32 %v5170_v32, %v287_v6  ;;  %v35_v0 = vld [vmem:[%s7108_s1 + $0x28] sm:$0xff] }
 0x143   :  { %v229_v16 = vmul.f32 0.03125, %v211_v12  ;;  %4558 = vrsqrt.f32 %v243_v5  ;;  %4136 = vmatprep.mubr.msk.bf16.mxu0 %vm69_vm0, %v335_v13  ;;  %v322_v26 = vmul.f32 %v306_v14, %v33_v54  ;;  %v288_v55 = vmul.f32 %v5164_v22, %v268_v8  ;;  %v40_v8 = vld [vmem:[%s7108_s1 + $0x50] sm:$0xff] }
 0x144   :  { %v4549_v31 = vpop.eup %4548  ;;  %v244_v33 = vadd.f32 1e-05, %v228_v19  ;;  %v289_v20 = vmul.f32 %v5164_v22, %v269_v18  ;;  %v323_v46 = vmul.f32 %v307_v30, %v34_v27 }
 0x145   :  { %v245_v34 = vadd.f32 1e-05, %v229_v16  ;;  %v4551_v38 = vpop.eup %4550  ;;  %v270_v39 = vmul.f32 %v4549_v31, %v5097_v1  ;;  %v214_v40 = vpop.xlane.xlu1 %213  ;;  %v336_v41 = vpack.c.bf16 %v322_v26, %v321_v15  ;;  %v308_v42 = vadd.f32 %v5170_v32, %v288_v55  ;;  %v36_v1 = vld [vmem:[%s7108_s1 + $0x30] sm:$0xff]  ;;  %v42_v55 = vld [vmem:[%s7108_s1 + $0x60] sm:$0xff] }
 0x146   :  { %v271_v36 = vmul.f32 %v4551_v38, %v5106_v10  ;;  %4560 = vrsqrt.f32 %v244_v33  ;;  %v230_v43 = vmul.f32 0.03125, %v214_v40  ;;  %v309_v49 = vadd.f32 %v5170_v32, %v289_v20  ;;  %v37_v10 = vld [vmem:[%s7108_s1 + $0x38] sm:$0xff] }
 0x147   :  { %4562 = vrsqrt.f32 %v245_v34  ;;  %4137 = vmatmul.mubr.msk.bf16.vlgmr.msra.gmra.mrb[0].mxu0 %vm69_vm0, %v336_v41  ;;  %v324_v24 = vmul.f32 %v308_v42, %v35_v0  ;;  %v290_v48 = vmul.f32 %v5164_v22, %v270_v39  ;;  %v44_v39 = vld [vmem:[%s7108_s1 + $0x70] sm:$0xff]  ;;  %v45_v40 = vld [vmem:[%s7108_s1 + $0x78] sm:$0xff] }
 0x148   :  { %v4553_v50 = vpop.eup %4552  ;;  %v246_v51 = vadd.f32 1e-05, %v230_v43  ;;  %v291_v52 = vmul.f32 %v5164_v22, %v271_v36  ;;  %v325_v56 = vmul.f32 %v309_v49, %v36_v1 }
 0x149   :  { %v4555_v44 = vpop.eup %4554  ;;  %v272_v28 = vmul.f32 %v4553_v50, %v5109_v11  ;;  %v337_v37 = vpack.c.bf16 %v324_v24, %v323_v46  ;;  %v310_v29 = vadd.f32 %v5170_v32, %v290_v48  ;;  %v39_v11 = vld [vmem:[%s7108_s1 + $0x48] sm:$0xff] }
 0x14a   :  { %v273_v53 = vmul.f32 %v4555_v44, %v5118_v23  ;;  %4564 = vrsqrt.f32 %v246_v51  ;;  %v311_v59 = vadd.f32 %v5170_v32, %v291_v52 }
 0x14b   :  { %4140 = vmatprep.mubr.msk.bf16.mxu0 %vm69_vm0, %v337_v37  ;;  %v326_v57 = vmul.f32 %v310_v29, %v37_v10  ;;  %v292_v58 = vmul.f32 %v5164_v22, %v272_v28 }
 0x14c   :  { %v4557_v60 = vpop.eup %4556  ;;  %v293_v23 = vmul.f32 %v5164_v22, %v273_v53  ;;  %v327_v4 = vmul.f32 %v311_v59, %v38_v61 }
 0x14d   :  { %v4559_v62 = vpop.eup %4558  ;;  %v274_v63 = vmul.f32 %v4557_v60, %v5121_v17  ;;  %v338_v2 = vpack.c.bf16 %v326_v57, %v325_v56  ;;  %v312_v45 = vadd.f32 %v5170_v32, %v292_v58  ;;  %v41_v17 = vld [vmem:[%s7108_s1 + $0x58] sm:$0xff] }
 0x14e   :  { %v275_v3 = vmul.f32 %v4559_v62, %v5130_v35  ;;  %v313_v6 = vadd.f32 %v5170_v32, %v293_v23 }
 0x14f   :  { %4141 = vmatmul.mubr.msk.bf16.gmra.mrb[4].mxu0 %vm69_vm0, %v338_v2  ;;  %v328_v5 = vmul.f32 %v312_v45, %v39_v11  ;;  %v294_v54 = vmul.f32 %v5164_v22, %v274_v63 }
 0x150   :  { %v4561_v7 = vpop.eup %4560  ;;  %v295_v9 = vmul.f32 %v5164_v22, %v275_v3  ;;  %v329_v18 = vmul.f32 %v313_v6, %v40_v8 }
 0x151   :  { %v4563_v35 = vpop.eup %4562  ;;  %v276_v12 = vmul.f32 %v4561_v7, %v5133_v21  ;;  %v339_v13 = vpack.c.bf16 %v328_v5, %v327_v4  ;;  %v314_v14 = vadd.f32 %v5170_v32, %v294_v54  ;;  %v43_v21 = vld [vmem:[%s7108_s1 + $0x68] sm:$0xff] }
 0x152   :  { %v277_v15 = vmul.f32 %v4563_v35, %v5142_v47  ;;  %v315_v26 = vadd.f32 %v5170_v32, %v295_v9 }
 0x153   :  { %4144 = vmatprep.mubr.msk.bf16.mxu0 %vm69_vm0, %v339_v13  ;;  %v330_v19 = vmul.f32 %v314_v14, %v41_v17  ;;  %v296_v16 = vmul.f32 %v5164_v22, %v276_v12 }
 0x154   :  { %v4565_v27 = vpop.eup %4564  ;;  %v297_v30 = vmul.f32 %v5164_v22, %v277_v15  ;;  %v331_v34 = vmul.f32 %v315_v26, %v42_v55 }
 0x155   :  { %v278_v47 = vmul.f32 %v4565_v27, %v5145_v25  ;;  %v340_v31 = vpack.c.bf16 %v330_v19, %v329_v18  ;;  %v316_v33 = vadd.f32 %v5170_v32, %v296_v16 }
 0x156   :  { %v317_v38 = vadd.f32 %v5170_v32, %v297_v30 }
 0x157   :  { %4145 = vmatmul.mubr.msk.bf16.gmra.mrb[8].mxu0 %vm69_vm0, %v340_v31  ;;  %v332_v0 = vmul.f32 %v316_v33, %v43_v21  ;;  %v298_v20 = vmul.f32 %v5164_v22, %v278_v47 }
 0x158   :  { %v333_v42 = vmul.f32 %v317_v38, %v44_v39 }
 0x159   :  { %v341_v25 = vpack.c.bf16 %v332_v0, %v331_v34  ;;  %v318_v41 = vadd.f32 %v5170_v32, %v298_v20 }
 0x15b   :  { %4148 = vmatprep.mubr.msk.bf16.mxu0 %vm69_vm0, %v341_v25  ;;  %v334_v36 = vmul.f32 %v318_v41, %v45_v40 }
 0x15d   :  { %v342_v43 = vpack.c.bf16 %v334_v36, %v333_v42 }
 0x15f   :  { %4149 = vmatmul.mubr.msk.bf16.gmra.mrb[12].mxu0 %vm69_vm0, %v342_v43 }
 0x21a   :  { %v4138_v22 = vpop.f32.mrb[0].mxu0 }
 0x21b   :  { %v417_v46 = vpop.f32.mrb[1].mxu0 }
 0x21c   :  { %v4139_v24 = vpop.f32.mrb[2].mxu0 }
 0x21d   :  { %v5275_v48 = vpack.c.bf16 %v4139_v24, %v4138_v22  ;;  %v420_v49 = vpop.f32.mrb[3].mxu0 }
 0x21e   :  { %v5277_v50 = vpack.c.bf16 %v420_v49, %v417_v46 }
 0x21f   :  { %498 = vrot.lane.b32.xlu1 %v5275_v48, %s4918_s9 }
 0x220   :  { %496 = vrot.lane.b32.xlu0 %v5277_v50, %s4918_s9  ;;  %4160 = vmatprep.mubr.msk.bf16.mxu1 %vm552_vm1, %v5277_v50 }
 0x222   :  { %v4142_v32 = vpop.f32.mrb[4].mxu0 }
 0x223   :  { %v433_v51 = vpop.f32.mrb[5].mxu0 }
 0x224   :  { %v4143_v1 = vpop.f32.mrb[6].mxu0 }
 0x225   :  { %v5285_v10 = vpack.c.bf16 %v4143_v1, %v4142_v32  ;;  %v436_v52 = vpop.f32.mrb[7].mxu0 }
 0x226   :  { %v5287_v44 = vpack.c.bf16 %v436_v52, %v433_v51 }
 0x227   :  { %502 = vrot.lane.b32.xlu0 %v5285_v10, %s4918_s9 }
 0x228   :  { %500 = vrot.lane.b32.xlu1 %v5287_v44, %s4918_s9 }
 0x22a   :  { %v4146_v28 = vpop.f32.mrb[8].mxu0 }
 0x22b   :  { %544 = vrot.lane.b32.xlu0 %v5277_v50, %s4919_s10  ;;  %v449_v37 = vpop.f32.mrb[9].mxu0 }
 0x22c   :  { %v4147_v29 = vpop.f32.mrb[10].mxu0 }
 0x22d   :  { %v5295_v53 = vpack.c.bf16 %v4147_v29, %v4146_v28  ;;  %v452_v56 = vpop.f32.mrb[11].mxu0 }
 0x22e   :  { %v5297_v57 = vpack.c.bf16 %v452_v56, %v449_v37 }
 0x22f   :  { %512 = vrot.lane.b32.xlu0 %v5277_v50, %s4920_s11 }
 0x230   :  { %504 = vrot.lane.b32.xlu1 %v5297_v57, %s4918_s9  ;;  %4176 = vmatprep.mubr.msk.bf16.mxu0 %vm552_vm1, %v5297_v57 }
 0x232   :  { %v4150_v58 = vpop.f32.mrb[12].mxu0 }
 0x233   :  { %v465_v59 = vpop.f32.mrb[13].mxu0 }
 0x234   :  { %506 = vrot.lane.b32.xlu1 %v5295_v53, %s4918_s9  ;;  %v4151_v60 = vpop.f32.mrb[14].mxu0 }
 0x235   :  { %v5306_v61 = vpack.c.bf16 %v4151_v60, %v4150_v58  ;;  %v468_v11 = vpop.f32.mrb[15].mxu0 }
 0x236   :  { %v5308_v23 = vpack.c.bf16 %v468_v11, %v465_v59 }
 0x237   :  { %510 = vrot.lane.b32.xlu0 %v5306_v61, %s4918_s9 }
 0x238   :  { %508 = vrot.lane.b32.xlu1 %v5308_v23, %s4918_s9 }
 0x23b   :  { %548 = vrot.lane.b32.xlu0 %v5287_v44, %s4919_s10 }
 0x23c   :  { %546 = vrot.lane.b32.xlu1 %v5275_v48, %s4919_s10 }
 0x23f   :  { %516 = vrot.lane.b32.xlu0 %v5287_v44, %s4920_s11 }
 0x240   :  { %514 = vrot.lane.b32.xlu1 %v5275_v48, %s4920_s11 }
 0x243   :  { %550 = vrot.lane.b32.xlu0 %v5285_v10, %s4919_s10 }
 0x244   :  { %642 = vrot.lane.b32.xlu1 %v5297_v57, %s4919_s10 }
 0x247   :  { %518 = vrot.lane.b32.xlu0 %v5285_v10, %s4920_s11 }
 0x248   :  { %520 = vrot.lane.b32.xlu1 %v5297_v57, %s4920_s11 }
 0x24b   :  { %646 = vrot.lane.b32.xlu0 %v5308_v23, %s4919_s10 }
 0x24c   :  { %644 = vrot.lane.b32.xlu1 %v5295_v53, %s4919_s10 }
 0x24f   :  { %524 = vrot.lane.b32.xlu0 %v5308_v23, %s4920_s11 }
 0x250   :  { %522 = vrot.lane.b32.xlu1 %v5295_v53, %s4920_s11 }
 0x253   :  { %648 = vrot.lane.b32.xlu0 %v5306_v61, %s4919_s10 }
 0x257   :  { %526 = vrot.lane.b32.xlu0 %v5306_v61, %s4920_s11 }
 0x291   :  { %v5339_v63 = vpop.permute.xlu1 %498 }
 0x292   :  { %v5335_v62 = vpop.permute.xlu0 %496 }
 0x293   :  { %739 = vrot.lane.b32.xlu1 %v5335_v62, %s4919_s10 }
 0x297   :  { %528 = vrot.lane.b32.xlu1 %v5277_v50, %s4921_s12 }
 0x299   :  { %v5343_v2 = vpop.permute.xlu0 %502 }
 0x29a   :  { %v5345_v45 = vpop.permute.xlu1 %500 }
 0x29b   :  { %743 = vrot.lane.b32.xlu0 %v5345_v45, %s4919_s10  ;;  %741 = vrot.lane.b32.xlu1 %v5339_v63, %s4919_s10 }
 0x29d   :  { %v545_v3 = vpop.permute.xlu0 %544 }
 0x29e   :  { %4480 = vmatprep.subr.msk.bf16.mxu1 %vm552_vm1, %v545_v3  ;;  %v566_v4 = vsel %vm552_vm1, %v545_v3, 0 }
 0x29f   :  { %532 = vrot.lane.b32.xlu0 %v5287_v44, %s4921_s12  ;;  %530 = vrot.lane.b32.xlu1 %v5275_v48, %s4921_s12 }
 0x2a0   :  { %4153 = vmatpush3.bf16.xpose.msra.mxu1 %v566_v4 }
 0x2a1   :  { %v5363_v54 = vpop.permute.xlu0 %512 }
 0x2a2   :  { %v5357_v5 = vpop.permute.xlu1 %504 }
 0x2a3   :  { %836 = vrot.lane.b32.xlu1 %v5357_v5, %s4919_s10  ;;  %745 = vrot.lane.b32.xlu0 %v5343_v2, %s4919_s10 }
 0x2a6   :  { %v5365_v6 = vpop.permute.xlu1 %506 }
 0x2a7   :  { %536 = vrot.lane.b32.xlu1 %v5297_v57, %s4921_s12  ;;  %534 = vrot.lane.b32.xlu0 %v5285_v10, %s4921_s12 }
 0x2a9   :  { %v5371_v7 = vpop.permute.xlu0 %510 }
 0x2aa   :  { %v5373_v8 = vpop.permute.xlu1 %508 }
 0x2ab   :  { %838 = vrot.lane.b32.xlu1 %v5365_v6, %s4919_s10  ;;  %840 = vrot.lane.b32.xlu0 %v5373_v8, %s4919_s10 }
 0x2ad   :  { %v549_v17 = vpop.permute.xlu0 %548 }
 0x2ae   :  { %v547_v9 = vpop.permute.xlu1 %546  ;;  %v572_v19 = vsel %vm552_vm1, %v549_v17, 0 }
 0x2af   :  { %538 = vrot.lane.b32.xlu1 %v5295_v53, %s4921_s12  ;;  %540 = vrot.lane.b32.xlu0 %v5308_v23, %s4921_s12  ;;  %v569_v35 = vsel %vm552_vm1, %v547_v9, 0 }
 0x2b0   :  { %4481 = vmatprep.subr.msk.bf16.mxu1 %vm552_vm1, %v547_v9 }
 0x2b1   :  { %4155 = vmatpush3.bf16.xpose.msra.mxu1 %v569_v35  ;;  %v5385_v12 = vpop.permute.xlu0 %516 }
 0x2b2   :  { %4482 = vmatprep.subr.msk.bf16.mxu1 %vm552_vm1, %v549_v17  ;;  %v5388_v13 = vpop.permute.xlu1 %514 }
 0x2b3   :  { %935 = vrot.lane.b32.xlu0 %v5388_v13, %s4919_s10  ;;  %933 = vrot.lane.b32.xlu1 %v5363_v54, %s4919_s10 }
 0x2b5   :  { %v551_v14 = vpop.permute.xlu0 %550 }
 0x2b6   :  { %v643_v15 = vpop.permute.xlu1 %642  ;;  %v575_v30 = vsel %vm552_vm1, %v551_v14, 0 }
 0x2b7   :  { %4484 = vmatprep.subr.msk.bf16.mxu0 %vm552_vm1, %v643_v15  ;;  %842 = vrot.lane.b32.xlu1 %v5371_v7, %s4919_s10  ;;  %v663_v18 = vsel %vm552_vm1, %v643_v15, 0 }
 0x2b8   :  { %937 = vrot.lane.b32.xlu0 %v5385_v12, %s4919_s10  ;;  %4169 = vmatpush3.bf16.xpose.msra.mxu0 %v663_v18 }
 0x2b9   :  { %4157 = vmatpush3.bf16.xpose.msra.mxu1 %v572_v19  ;;  %v5401_v16 = vpop.permute.xlu0 %518 }
 0x2ba   :  { %4483 = vmatprep.subr.msk.bf16.mxu1 %vm552_vm1, %v551_v14  ;;  %v5404_v26 = vpop.permute.xlu1 %520 }
 0x2bb   :  { %542 = vrot.lane.b32.xlu1 %v5306_v61, %s4921_s12 }
 0x2bc   :  { %939 = vrot.lane.b32.xlu0 %v5401_v16, %s4919_s10 }
 0x2bd   :  { %v647_v27 = vpop.permute.xlu0 %646 }
 0x2be   :  { %v645_v55 = vpop.permute.xlu1 %644  ;;  %v669_v34 = vsel %vm552_vm1, %v647_v27, 0 }
 0x2bf   :  { %4485 = vmatprep.subr.msk.bf16.mxu0 %vm552_vm1, %v645_v55  ;;  %1030 = vrot.lane.b32.xlu1 %v5404_v26, %s4919_s10  ;;  %v666_v21 = vsel %vm552_vm1, %v645_v55, 0 }
 0x2c0   :  { %4171 = vmatpush3.bf16.xpose.msra.mxu0 %v666_v21 }
 0x2c1   :  { %4159 = vmatpush3.bf16.xpose.msra.mxu1 %v575_v30  ;;  %4486 = vmatprep.subr.msk.bf16.mxu0 %vm552_vm1, %v647_v27  ;;  %v5416_v47 = vpop.permute.xlu0 %524 }
 0x2c2   :  { %v5418_v31 = vpop.permute.xlu1 %522  ;;  %1034 = vrot.lane.b32.xlu0 %v5416_v47, %s4919_s10 }
 0x2c3   :  { %1032 = vrot.lane.b32.xlu1 %v5418_v31, %s4919_s10 }
 0x2c5   :  { %v649_v33 = vpop.permute.xlu0 %648 }
 0x2c6   :  { %v672_v20 = vsel %vm552_vm1, %v649_v33, 0 }
 0x2c8   :  { %4161 = vmatmul.mubr.msk.bf16.vlgmr.msra.gmra.mrb[0].mxu1 %vm552_vm1, %v5275_v48  ;;  %4173 = vmatpush3.bf16.xpose.msra.mxu0 %v669_v34 }
 0x2c9   :  { %4164 = vmatprep.mubr.msk.bf16.mxu1 %vm552_vm1, %v5287_v44  ;;  %4487 = vmatprep.subr.msk.bf16.mxu0 %vm552_vm1, %v649_v33  ;;  %v5430_v0 = vpop.permute.xlu0 %526 }
 0x2ca   :  { %1036 = vrot.lane.b32.xlu0 %v5430_v0, %s4919_s10 }
 0x2d0   :  { %4165 = vmatmul.mubr.msk.bf16.gmra.mrb[4].mxu1 %vm552_vm1, %v5285_v10  ;;  %4175 = vmatpush3.bf16.xpose.msra.mxu0 %v672_v20 }
 0x2d1   :  { %4192 = vmatprep.mubr.msk.bf16.mxu1 %vm552_vm1, %v5335_v62 }
 0x2d7   :  { %4177 = vmatmul.mubr.msk.bf16.vlgmr.msra.gmra.mrb[16].mxu0 %vm552_vm1, %v5295_v53 }
 0x2d8   :  { %4180 = vmatprep.mubr.msk.bf16.mxu0 %vm552_vm1, %v5308_v23 }
 0x2df   :  { %4181 = vmatmul.mubr.msk.bf16.gmra.mrb[20].mxu0 %vm552_vm1, %v5306_v61 }
 0x2e0   :  { %4208 = vmatprep.mubr.msk.bf16.mxu0 %vm552_vm1, %v5357_v5 }
 0x305   :  { %v740_v38 = vpop.permute.xlu1 %739 }
 0x306   :  { %4488 = vmatprep.subr.msk.bf16.mxu1 %vm552_vm1, %v740_v38  ;;  %v760_v39 = vsel %vm552_vm1, %v740_v38, 0 }
 0x307   :  { %4185 = vmatpush3.bf16.xpose.msra.mxu1 %v760_v39 }
 0x309   :  { %v5449_v40 = vpop.permute.xlu1 %528 }
 0x30a   :  { %1127 = vrot.lane.b32.xlu1 %v5449_v40, %s4919_s10 }
 0x30d   :  { %v742_v25 = vpop.permute.xlu1 %741  ;;  %v744_v41 = vpop.permute.xlu0 %743 }
 0x30e   :  { %4489 = vmatprep.subr.msk.bf16.mxu1 %vm552_vm1, %v742_v25  ;;  %v763_v42 = vsel %vm552_vm1, %v742_v25, 0  ;;  %v766_v24 = vsel %vm552_vm1, %v744_v41, 0 }
 0x30f   :  { %4187 = vmatpush3.bf16.xpose.msra.mxu1 %v763_v42 }
 0x310   :  { %4490 = vmatprep.subr.msk.bf16.mxu1 %vm552_vm1, %v744_v41 }
 0x311   :  { %v5456_v36 = vpop.permute.xlu1 %530  ;;  %v5458_v43 = vpop.permute.xlu0 %532 }
 0x312   :  { %1129 = vrot.lane.b32.xlu1 %v5456_v36, %s4919_s10  ;;  %1131 = vrot.lane.b32.xlu0 %v5458_v43, %s4919_s10 }
 0x315   :  { %v837_v22 = vpop.permute.xlu1 %836  ;;  %v746_v46 = vpop.permute.xlu0 %745 }
 0x316   :  { %4492 = vmatprep.subr.msk.bf16.mxu0 %vm552_vm1, %v837_v22  ;;  %v857_v49 = vsel %vm552_vm1, %v837_v22, 0  ;;  %v769_v28 = vsel %vm552_vm1, %v746_v46, 0 }
 0x317   :  { %4189 = vmatpush3.bf16.xpose.msra.mxu1 %v766_v24  ;;  %4201 = vmatpush3.bf16.xpose.msra.mxu0 %v857_v49 }
 0x318   :  { %4491 = vmatprep.subr.msk.bf16.mxu1 %vm552_vm1, %v746_v46 }
 0x319   :  { %v5468_v32 = vpop.permute.xlu1 %536  ;;  %v5470_v51 = vpop.permute.xlu0 %534 }
 0x31a   :  { %1224 = vrot.lane.b32.xlu1 %v5468_v32, %s4919_s10  ;;  %1133 = vrot.lane.b32.xlu0 %v5470_v51, %s4919_s10 }
 0x31d   :  { %v839_v1 = vpop.permute.xlu1 %838  ;;  %v841_v52 = vpop.permute.xlu0 %840 }
 0x31e   :  { %4493 = vmatprep.subr.msk.bf16.mxu0 %vm552_vm1, %v839_v1  ;;  %v860_v37 = vsel %vm552_vm1, %v839_v1, 0  ;;  %v863_v60 = vsel %vm552_vm1, %v841_v52, 0 }
 0x31f   :  { %4191 = vmatpush3.bf16.xpose.msra.mxu1 %v769_v28  ;;  %4203 = vmatpush3.bf16.xpose.msra.mxu0 %v860_v37 }
 0x320   :  { %4494 = vmatprep.subr.msk.bf16.mxu0 %vm552_vm1, %v841_v52 }
 0x321   :  { %v5480_v29 = vpop.permute.xlu1 %538  ;;  %v5482_v56 = vpop.permute.xlu0 %540 }
 0x322   :  { %7162 = vst [vmem:[#allocation2_spill] sm:$0xff] %v5482_v56  ;;  %1226 = vrot.lane.b32.xlu1 %v5480_v29, %s4919_s10  ;;  %1228 = vrot.lane.b32.xlu0 %v5482_v56, %s4919_s10 }
 0x325   :  { %v934_v58 = vpop.permute.xlu1 %933  ;;  %v936_v11 = vpop.permute.xlu0 %935 }
 0x326   :  { %4193 = vmatmul.mubr.msk.bf16.vlgmr.msra.gmra.mrb[8].mxu1 %vm552_vm1, %v5339_v63  ;;  %4496 = vmatprep.subr.msk.bf16.mxu1 %vm552_vm1, %v934_v58  ;;  %v954_v59 = vsel %vm552_vm1, %v934_v58, 0  ;;  %v957_v17 = vsel %vm552_vm1, %v936_v11, 0 }
 0x327   :  { %2058 = vrot.lane.b32.xlu0 %v5277_v50, %s4922_s13  ;;  %4196 = vmatprep.mubr.msk.bf16.mxu1 %vm552_vm1, %v5345_v45 }
 0x328   :  { %4205 = vmatpush3.bf16.xpose.msra.mxu0 %v863_v60  ;;  %4217 = vmatpush3.bf16.xpose.msra.mxu1 %v954_v59 }
 0x329   :  { %4497 = vmatprep.subr.msk.bf16.mxu1 %vm552_vm1, %v936_v11  ;;  %v843_v3 = vpop.permute.xlu1 %842 }
 0x32a   :  { %4495 = vmatprep.subr.msk.bf16.mxu0 %vm552_vm1, %v843_v3  ;;  %v866_v50 = vsel %vm552_vm1, %v843_v3, 0  ;;  %v938_v9 = vpop.permute.xlu0 %937 }
 0x32b   :  { %2064 = vrot.lane.b32.xlu0 %v5285_v10, %s4922_s13 }
 0x32d   :  { %v5501_v4 = vpop.permute.xlu1 %542 }
 0x32e   :  { %7163 = vst [vmem:[#allocation3_spill] sm:$0xff] %v5501_v4  ;;  %1230 = vrot.lane.b32.xlu1 %v5501_v4, %s4919_s10  ;;  %4197 = vmatmul.mubr.msk.bf16.gmra.mrb[12].mxu1 %vm552_vm1, %v5343_v2  ;;  %v940_v35 = vpop.permute.xlu0 %939 }
 0x32f   :  { %2149 = vrot.lane.b32.xlu0 %v5295_v53, %s4922_s13  ;;  %4224 = vmatprep.mubr.msk.bf16.mxu1 %vm552_vm1, %v5363_v54  ;;  %v960_v53 = vsel %vm552_vm1, %v938_v9, 0 }
 0x330   :  { %4207 = vmatpush3.bf16.xpose.msra.mxu0 %v866_v50  ;;  %4219 = vmatpush3.bf16.xpose.msra.mxu1 %v957_v17 }
 0x331   :  { %4498 = vmatprep.subr.msk.bf16.mxu1 %vm552_vm1, %v938_v9  ;;  %v1031_v10 = vpop.permute.xlu1 %1030 }
 0x332   :  { %2060 = vrot.lane.b32.xlu1 %v5275_v48, %s4922_s13  ;;  %4500 = vmatprep.subr.msk.bf16.mxu0 %vm552_vm1, %v1031_v10  ;;  %v1051_v48 = vsel %vm552_vm1, %v1031_v10, 0 }
 0x333   :  { %2153 = vrot.lane.b32.xlu0 %v5306_v61, %s4922_s13 }
 0x335   :  { %v1033_v14 = vpop.permute.xlu1 %1032 }
 0x336   :  { %2062 = vrot.lane.b32.xlu1 %v5287_v44, %s4922_s13  ;;  %v963_v44 = vsel %vm552_vm1, %v940_v35, 0  ;;  %v1054_v61 = vsel %vm552_vm1, %v1033_v14, 0 }
 0x337   :  { %4209 = vmatmul.mubr.msk.bf16.vlgmr.msra.gmra.mrb[24].mxu0 %vm552_vm1, %v5365_v6  ;;  %2327 = vrot.lane.b32.xlu0 %v5365_v6, %s4922_s13 }
 0x338   :  { %4212 = vmatprep.mubr.msk.bf16.mxu0 %vm552_vm1, %v5373_v8  ;;  %4221 = vmatpush3.bf16.xpose.msra.mxu1 %v960_v53 }
 0x339   :  { %4233 = vmatpush3.bf16.xpose.msra.mxu0 %v1051_v48  ;;  %4499 = vmatprep.subr.msk.bf16.mxu1 %vm552_vm1, %v940_v35 }
 0x33a   :  { %4501 = vmatprep.subr.msk.bf16.mxu0 %vm552_vm1, %v1033_v14  ;;  %2147 = vrot.lane.b32.xlu1 %v5297_v57, %s4922_s13  ;;  %v1035_v57 = vpop.permute.xlu0 %1034 }
 0x33b   :  { %2331 = vrot.lane.b32.xlu0 %v5371_v7, %s4922_s13 }
 0x33e   :  { %2236 = vrot.lane.b32.xlu1 %v5335_v62, %s4922_s13  ;;  %v1057_v62 = vsel %vm552_vm1, %v1035_v57, 0  ;;  %v1037_v6 = vpop.permute.xlu0 %1036 }
 0x33f   :  { %4213 = vmatmul.mubr.msk.bf16.gmra.mrb[28].mxu0 %vm552_vm1, %v5371_v7  ;;  %2505 = vrot.lane.b32.xlu0 %v5418_v31, %s4922_s13 }
 0x340   :  { %4223 = vmatpush3.bf16.xpose.msra.mxu1 %v963_v44  ;;  %4240 = vmatprep.mubr.msk.bf16.mxu0 %vm552_vm1, %v5404_v26 }
 0x341   :  { %4235 = vmatpush3.bf16.xpose.msra.mxu0 %v1054_v61 }
 0x342   :  { %4502 = vmatprep.subr.msk.bf16.mxu0 %vm552_vm1, %v1035_v57  ;;  %2238 = vrot.lane.b32.xlu1 %v5339_v63, %s4922_s13 }
 0x343   :  { %2509 = vrot.lane.b32.xlu0 %v5430_v0, %s4922_s13 }
 0x346   :  { %2151 = vrot.lane.b32.xlu1 %v5308_v23, %s4922_s13  ;;  %v1060_v23 = vsel %vm552_vm1, %v1037_v6, 0 }
 0x347   :  { %4225 = vmatmul.mubr.msk.bf16.vlgmr.msra.gmra.mrb[16].mxu1 %vm552_vm1, %v5388_v13 }
 0x348   :  { %4228 = vmatprep.mubr.msk.bf16.mxu1 %vm552_vm1, %v5385_v12 }
 0x349   :  { %4237 = vmatpush3.bf16.xpose.msra.mxu0 %v1057_v62 }
 0x34a   :  { %4503 = vmatprep.subr.msk.bf16.mxu0 %vm552_vm1, %v1037_v6  ;;  %2240 = vrot.lane.b32.xlu1 %v5345_v45, %s4922_s13 }
 0x34e   :  { %2242 = vrot.lane.b32.xlu1 %v5343_v2, %s4922_s13 }
 0x34f   :  { %4229 = vmatmul.mubr.msk.bf16.gmra.mrb[20].mxu1 %vm552_vm1, %v5401_v16 }
 0x350   :  { %4256 = vmatprep.mubr.msk.bf16.mxu1 %vm552_vm1, %v5449_v40 }
 0x351   :  { %4239 = vmatpush3.bf16.xpose.msra.mxu0 %v1060_v23 }
 0x352   :  { %2325 = vrot.lane.b32.xlu1 %v5357_v5, %s4922_s13 }
 0x356   :  { %2414 = vrot.lane.b32.xlu1 %v5363_v54, %s4922_s13 }
 0x358   :  { %4241 = vmatmul.mubr.msk.bf16.vlgmr.msra.gmra.mrb[32].mxu0 %vm552_vm1, %v5418_v31 }
 0x359   :  { %4244 = vmatprep.mubr.msk.bf16.mxu0 %vm552_vm1, %v5416_v47 }
 0x35a   :  { %2416 = vrot.lane.b32.xlu1 %v5388_v13, %s4922_s13 }
 0x35e   :  { %2418 = vrot.lane.b32.xlu1 %v5385_v12, %s4922_s13 }
 0x360   :  { %4245 = vmatmul.mubr.msk.bf16.gmra.mrb[36].mxu0 %vm552_vm1, %v5430_v0 }
 0x361   :  { %4272 = vmatprep.mubr.msk.bf16.mxu0 %vm552_vm1, %v5468_v32 }
 0x362   :  { %2420 = vrot.lane.b32.xlu1 %v5401_v16, %s4922_s13 }
 0x366   :  { %2503 = vrot.lane.b32.xlu1 %v5404_v26, %s4922_s13 }
 0x36a   :  { %2592 = vrot.lane.b32.xlu1 %v5449_v40, %s4922_s13 }
 0x36e   :  { %2594 = vrot.lane.b32.xlu1 %v5456_v36, %s4922_s13 }
 0x372   :  { %2596 = vrot.lane.b32.xlu1 %v5458_v43, %s4922_s13 }
 0x376   :  { %2598 = vrot.lane.b32.xlu1 %v5470_v51, %s4922_s13 }
 0x37a   :  { %2681 = vrot.lane.b32.xlu1 %v5468_v32, %s4922_s13 }
 0x37c   :  { %v1128_v63 = vpop.permute.xlu1 %1127 }
 0x37d   :  { %4504 = vmatprep.subr.msk.bf16.mxu1 %vm552_vm1, %v1128_v63  ;;  %v1148_v2 = vsel %vm552_vm1, %v1128_v63, 0 }
 0x37e   :  { %2329 = vrot.lane.b32.xlu1 %v5373_v8, %s4922_s13  ;;  %4249 = vmatpush3.bf16.xpose.msra.mxu1 %v1148_v2 }
 0x382   :  { %2507 = vrot.lane.b32.xlu1 %v5416_v47, %s4922_s13 }
 0x384   :  { %v1130_v45 = vpop.permute.xlu1 %1129  ;;  %v1132_v54 = vpop.permute.xlu0 %1131 }
 0x385   :  { %4505 = vmatprep.subr.msk.bf16.mxu1 %vm552_vm1, %v1130_v45  ;;  %v1151_v5 = vsel %vm552_vm1, %v1130_v45, 0  ;;  %v1154_v12 = vsel %vm552_vm1, %v1132_v54, 0 }
 0x386   :  { %4251 = vmatpush3.bf16.xpose.msra.mxu1 %v1151_v5 }
 0x387   :  { %4506 = vmatprep.subr.msk.bf16.mxu1 %vm552_vm1, %v1132_v54 }
 0x38c   :  { %v1225_v7 = vpop.permute.xlu1 %1224  ;;  %v1134_v13 = vpop.permute.xlu0 %1133 }
 0x38d   :  { %4508 = vmatprep.subr.msk.bf16.mxu0 %vm552_vm1, %v1225_v7  ;;  %v1245_v8 = vsel %vm552_vm1, %v1225_v7, 0  ;;  %v1157_v18 = vsel %vm552_vm1, %v1134_v13, 0 }
 0x38e   :  { %4253 = vmatpush3.bf16.xpose.msra.mxu1 %v1154_v12  ;;  %4265 = vmatpush3.bf16.xpose.msra.mxu0 %v1245_v8 }
 0x38f   :  { %4507 = vmatprep.subr.msk.bf16.mxu1 %vm552_vm1, %v1134_v13 }
 0x394   :  { %v1227_v15 = vpop.permute.xlu1 %1226  ;;  %v1229_v16 = vpop.permute.xlu0 %1228 }
 0x395   :  { %4509 = vmatprep.subr.msk.bf16.mxu0 %vm552_vm1, %v1227_v15  ;;  %v1248_v19 = vsel %vm552_vm1, %v1227_v15, 0  ;;  %v1251_v30 = vsel %vm552_vm1, %v1229_v16, 0 }
 0x396   :  { %4255 = vmatpush3.bf16.xpose.msra.mxu1 %v1157_v18  ;;  %4267 = vmatpush3.bf16.xpose.msra.mxu0 %v1248_v19 }
 0x397   :  { %4510 = vmatprep.subr.msk.bf16.mxu0 %vm552_vm1, %v1229_v16 }
 0x399   :  { %v2059_v41 = vpop.permute.xlu0 %2058 }
 0x39b   :  { %v5614_v26 = vpop.f32.mrb[0].mxu1 }
 0x39c   :  { %v5616_v27 = vpop.f32.mrb[1].mxu1  ;;  %v1328_v55 = vsel %vm1321_vm2, %v5614_v26, -inf }
 0x39d   :  { %v5620_v21 = vpop.f32.mrb[2].mxu1  ;;  %1329 = vmax.xlane.f32.xlu0 %v1328_v55  ;;  %4257 = vmatmul.mubr.msk.bf16.vlgmr.msra.gmra.mrb[24].mxu1 %vm552_vm1, %v5456_v36  ;;  %v1322_v33 = vsel %vm1321_vm2, %v5616_v27, -inf  ;;  %v2065_v10 = vpop.permute.xlu0 %2064 }
 0x39e   :  { %v5625_v47 = vpop.f32.mrb[3].mxu1  ;;  %4260 = vmatprep.mubr.msk.bf16.mxu1 %vm552_vm1, %v5458_v43  ;;  %4269 = vmatpush3.bf16.xpose.msra.mxu0 %v1251_v30  ;;  %v1331_v38 = vsel %vm1321_vm2, %v5620_v21, -inf }
 0x39f   :  { %v1325_v40 = vsel %vm1321_vm2, %v5625_v47, -inf }
 0x3a0   :  { %v1231_v31 = vpop.permute.xlu1 %1230 }
 0x3a1   :  { %1323 = vmax.xlane.f32.xlu0 %v1322_v33  ;;  %4511 = vmatprep.subr.msk.bf16.mxu0 %vm552_vm1, %v1231_v31  ;;  %v1254_v25 = vsel %vm552_vm1, %v1231_v31, 0 }
 0x3a3   :  { %v5632_v34 = vpop.f32.mrb[4].mxu1 }
 0x3a4   :  { %v5634_v0 = vpop.f32.mrb[5].mxu1  ;;  %v2061_v20 = vpop.permute.xlu1 %2060  ;;  %v1340_v43 = vsel %vm1321_vm2, %v5632_v34, -inf }
 0x3a5   :  { %v5638_v39 = vpop.f32.mrb[6].mxu1  ;;  %1332 = vmax.xlane.f32.xlu0 %v1331_v38  ;;  %4261 = vmatmul.mubr.msk.bf16.gmra.mrb[28].mxu1 %vm552_vm1, %v5470_v51  ;;  %v1334_v51 = vsel %vm1321_vm2, %v5634_v0, -inf  ;;  %v5741_v38 = vpop.permute.xlu0 %2149 }
 0x3a6   :  { %v5645_v42 = vpop.f32.mrb[7].mxu1  ;;  %1326 = vmax.xlane.f32.xlu1 %v1325_v40  ;;  %4271 = vmatpush3.bf16.xpose.msra.mxu0 %v1254_v25  ;;  %v1343_v22 = vsel %vm1321_vm2, %v5638_v39, -inf }
 0x3a7   :  { %4280 = vmatprep.subr.bf16.mxu0 %v2059_v41  ;;  %v1337_v52 = vsel %vm1321_vm2, %v5645_v42, -inf }
 0x3a8   :  { %v2063_v36 = vpop.permute.xlu1 %2062 }
 0x3a9   :  { %1341 = vmax.xlane.f32.xlu0 %v1340_v43 }
 0x3aa   :  { %v5651_v46 = vpop.f32.mrb[16].mxu0  ;;  %1344 = vmax.xlane.f32.xlu1 %v1343_v22 }
 0x3ab   :  { %v5653_v24 = vpop.f32.mrb[17].mxu0  ;;  %v1352_v37 = vsel %vm1321_vm2, %v5651_v46, -inf }
 0x3ac   :  { %v5655_v49 = vpop.permute.xlu1 %2147  ;;  %v5657_v32 = vpop.f32.mrb[18].mxu0  ;;  %v1346_v50 = vsel %vm1321_vm2, %v5653_v24, -inf }
 0x3ad   :  { %1335 = vmax.xlane.f32.xlu0 %v1334_v51  ;;  %v5661_v1 = vpop.f32.mrb[19].mxu0  ;;  %4273 = vmatmul.mubr.msk.bf16.vlgmr.msra.gmra.mrb[40].mxu0 %vm552_vm1, %v5480_v29  ;;  %v1355_v58 = vsel %vm1321_vm2, %v5657_v32, -inf }
 0x3ae   :  { %1338 = vmax.xlane.f32.xlu1 %v1337_v52  ;;  %4276 = vmatprep.mubr.msk.bf16.mxu0 %vm552_vm1, %v5482_v56  ;;  %v1349_v9 = vsel %vm1321_vm2, %v5661_v1, -inf }
 0x3af   :  { %4281 = vmatpush3.bf16.msra.mxu0 %v2059_v41 }
 0x3b0   :  { %4282 = vmatprep.subr.bf16.mxu0 %v2061_v20  ;;  %v2237_v28 = vpop.permute.xlu1 %2236 }
 0x3b1   :  { %1353 = vmax.xlane.f32.xlu0 %v1352_v37  ;;  %4312 = vmatprep.subr.bf16.mxu1 %v2237_v28 }
 0x3b2   :  { %v5673_v59 = vpop.f32.mrb[20].mxu0  ;;  %1356 = vmax.xlane.f32.xlu1 %v1355_v58  ;;  %4313 = vmatpush3.bf16.msra.mxu1 %v2237_v28  ;;  %v5759_v28 = vpop.permute.xlu0 %2153 }
 0x3b3   :  { %4283 = vmatpush3.bf16.msra.mxu0 %v2061_v20  ;;  %v5675_v60 = vpop.f32.mrb[21].mxu0  ;;  %v1364_v35 = vsel %vm1321_vm2, %v5673_v59, -inf }
 0x3b4   :  { %4284 = vmatprep.subr.bf16.mxu0 %v2063_v36  ;;  %v2239_v11 = vpop.permute.xlu1 %2238  ;;  %v5677_v3 = vpop.f32.mrb[22].mxu0  ;;  %v1358_v44 = vsel %vm1321_vm2, %v5675_v60, -inf }
 0x3b5   :  { %1347 = vmax.xlane.f32.xlu0 %v1346_v50  ;;  %v5681_v17 = vpop.f32.mrb[23].mxu0  ;;  %4277 = vmatmul.mubr.msk.bf16.gmra.mrb[44].mxu0 %vm552_vm1, %v5501_v4  ;;  %v1367_v48 = vsel %vm1321_vm2, %v5677_v3, -inf }
 0x3b6   :  { %4314 = vmatprep.subr.bf16.mxu1 %v2239_v11  ;;  %1350 = vmax.xlane.f32.xlu1 %v1349_v9  ;;  %v1361_v61 = vsel %vm1321_vm2, %v5681_v17, -inf }
 0x3b7   :  { %4285 = vmatpush3.bf16.msra.mxu0 %v2063_v36  ;;  %4315 = vmatpush3.bf16.msra.mxu1 %v2239_v11 }
 0x3b8   :  { %4286 = vmatprep.subr.bf16.mxu0 %v2065_v10  ;;  %v5687_v53 = vpop.permute.xlu1 %2151 }
 0x3b9   :  { %1365 = vmax.xlane.f32.xlu0 %v1364_v35  ;;  %v5773_v35 = vpop.permute.xlu0 %2327 }
 0x3ba   :  { %1368 = vmax.xlane.f32.xlu1 %v1367_v48  ;;  %7172 = vst [vmem:[#allocation12_spill] sm:$0xff] %v5773_v35 }
 0x3bb   :  { %4287 = vmatpush3.bf16.msra.mxu0 %v2065_v10 }
 0x3bc   :  { %4296 = vmatprep.subr.bf16.mxu0 %v5655_v49  ;;  %v2241_v14 = vpop.permute.xlu1 %2240 }
 0x3bd   :  { %1359 = vmax.xlane.f32.xlu0 %v1358_v44  ;;  %4316 = vmatprep.subr.bf16.mxu1 %v2241_v14 }
 0x3be   :  { %1362 = vmax.xlane.f32.xlu1 %v1361_v61  ;;  %4317 = vmatpush3.bf16.msra.mxu1 %v2241_v14 }
 0x3c0   :  { %v2243_v57 = vpop.permute.xlu1 %2242 }
 0x3c1   :  { %4318 = vmatprep.subr.bf16.mxu1 %v2243_v57 }
 0x3c2   :  { %4319 = vmatpush3.bf16.msra.mxu1 %v2243_v57 }
 0x3c4   :  { %v5698_v62 = vpop.permute.xlu1 %2325 }
 0x3c5   :  { %7164 = vst [vmem:[#allocation4_spill] sm:$0xff] %v5698_v62 }
 0x3c8   :  { %v5700_v6 = vpop.permute.xlu1 %2414 }
 0x3c9   :  { %7165 = vst [vmem:[#allocation5_spill] sm:$0xff] %v5700_v6  ;;  %4344 = vmatprep.subr.bf16.mxu1 %v5700_v6 }
 0x3cc   :  { %v5703_v23 = vpop.permute.xlu1 %2416 }
 0x3cd   :  { %7166 = vst [vmem:[#allocation6_spill] sm:$0xff] %v5703_v23 }
 0x3d0   :  { %v5705_v63 = vpop.permute.xlu1 %2418 }
 0x3d1   :  { %7167 = vst [vmem:[#allocation7_spill] sm:$0xff] %v5705_v63 }
 0x3d4   :  { %v5721_v13 = vpop.permute.xlu1 %2420 }
 0x3d5   :  { %7168 = vst [vmem:[#allocation8_spill] sm:$0xff] %v5721_v13 }
 0x3d8   :  { %v5737_v33 = vpop.permute.xlu1 %2503 }
 0x3d9   :  { %7169 = vst [vmem:[#allocation9_spill] sm:$0xff] %v5737_v33 }
 0x3dc   :  { %v5747_v41 = vpop.permute.xlu1 %2592 }
 0x3dd   :  { %7170 = vst [vmem:[#allocation10_spill] sm:$0xff] %v5747_v41 }
 0x3e0   :  { %v5763_v58 = vpop.permute.xlu1 %2594 }
 0x3e1   :  { %7171 = vst [vmem:[#allocation11_spill] sm:$0xff] %v5763_v58 }
 0x3e4   :  { %v5781_v61 = vpop.permute.xlu1 %2596 }
 0x3e5   :  { %7173 = vst [vmem:[#allocation13_spill] sm:$0xff] %v5781_v61 }
 0x3f9   :  { %v5707_v2 = vpop.f32.mrb[8].mxu1 }
 0x3fa   :  { %v5709_v45 = vpop.f32.mrb[9].mxu1  ;;  %v1376_v5 = vsel %vm1321_vm2, %v5707_v2, -inf }
 0x3fb   :  { %v5713_v54 = vpop.f32.mrb[10].mxu1  ;;  %1377 = vmax.xlane.f32.xlu0 %v1376_v5  ;;  %v1370_v8 = vsel %vm1321_vm2, %v5709_v45, -inf }
 0x3fc   :  { %v5715_v7 = vpop.f32.mrb[11].mxu1  ;;  %v1379_v12 = vsel %vm1321_vm2, %v5713_v54, -inf }
 0x3fd   :  { %1380 = vmax.xlane.f32.xlu1 %v1379_v12  ;;  %v1373_v15 = vsel %vm1321_vm2, %v5715_v7, -inf  ;;  %v5787_v12 = vpop.permute.xlu0 %2331 }
 0x3fe   :  { %7174 = vst [vmem:[#allocation14_spill] sm:$0xff] %v5787_v12 }
 0x3ff   :  { %1371 = vmax.xlane.f32.xlu0 %v1370_v8 }
 0x401   :  { %v5725_v18 = vpop.f32.mrb[12].mxu1  ;;  %1374 = vmax.xlane.f32.xlu1 %v1373_v15 }
 0x402   :  { %v5727_v19 = vpop.f32.mrb[13].mxu1  ;;  %v1388_v16 = vsel %vm1321_vm2, %v5725_v18, -inf }
 0x403   :  { %v5731_v55 = vpop.f32.mrb[14].mxu1  ;;  %1389 = vmax.xlane.f32.xlu0 %v1388_v16  ;;  %v1382_v20 = vsel %vm1321_vm2, %v5727_v19, -inf }
 0x404   :  { %v5733_v30 = vpop.f32.mrb[15].mxu1  ;;  %v1391_v31 = vsel %vm1321_vm2, %v5731_v55, -inf }
 0x405   :  { %1392 = vmax.xlane.f32.xlu1 %v1391_v31  ;;  %v1385_v40 = vsel %vm1321_vm2, %v5733_v30, -inf }
 0x407   :  { %1383 = vmax.xlane.f32.xlu0 %v1382_v20  ;;  %v5797_v20 = vpop.permute.xlu1 %2598 }
 0x408   :  { %7175 = vst [vmem:[#allocation15_spill] sm:$0xff] %v5797_v20 }
 0x409   :  { %1386 = vmax.xlane.f32.xlu1 %v1385_v40 }
 0x40a   :  { %v5745_v25 = vpop.f32.mrb[24].mxu0 }
 0x40b   :  { %v5749_v36 = vpop.f32.mrb[25].mxu0  ;;  %v1400_v43 = vsel %vm1321_vm2, %v5745_v25, -inf }
 0x40c   :  { %v5753_v22 = vpop.f32.mrb[26].mxu0  ;;  %1401 = vmax.xlane.f32.xlu0 %v1400_v43  ;;  %v1394_v37 = vsel %vm1321_vm2, %v5749_v36, -inf }
 0x40d   :  { %v5755_v51 = vpop.f32.mrb[27].mxu0  ;;  %v1403_v52 = vsel %vm1321_vm2, %v5753_v22, -inf }
 0x40e   :  { %1404 = vmax.xlane.f32.xlu1 %v1403_v52  ;;  %v1397_v11 = vsel %vm1321_vm2, %v5755_v51, -inf }
 0x410   :  { %1395 = vmax.xlane.f32.xlu0 %v1394_v37  ;;  %v5805_v37 = vpop.permute.xlu0 %2505 }
 0x411   :  { %7176 = vst [vmem:[#allocation16_spill] sm:$0xff] %v5805_v37 }
 0x412   :  { %1398 = vmax.xlane.f32.xlu1 %v1397_v11  ;;  %v5767_v50 = vpop.f32.mrb[28].mxu0 }
 0x413   :  { %v5769_v9 = vpop.f32.mrb[29].mxu0  ;;  %v1412_v10 = vsel %vm1321_vm2, %v5767_v50, -inf }
 0x414   :  { %v5775_v48 = vpop.f32.mrb[30].mxu0  ;;  %1413 = vmax.xlane.f32.xlu0 %v1412_v10  ;;  %v1406_v57 = vsel %vm1321_vm2, %v5769_v9, -inf  ;;  %v5823_v20 = vpop.permute.xlu0 %2509 }
 0x415   :  { %v5777_v14 = vpop.f32.mrb[31].mxu0  ;;  %v1415_v44 = vsel %vm1321_vm2, %v5775_v48, -inf  ;;  %7178 = vst [vmem:[#allocation18_spill] sm:$0xff] %v5823_v20 }
 0x416   :  { %1416 = vmax.xlane.f32.xlu1 %v1415_v44  ;;  %v1409_v5 = vsel %vm1321_vm2, %v5777_v14, -inf  ;;  %v5811_v44 = vpop.permute.xlu1 %2681 }
 0x417   :  { %7177 = vst [vmem:[#allocation17_spill] sm:$0xff] %v5811_v44 }
 0x418   :  { %1407 = vmax.xlane.f32.xlu0 %v1406_v57 }
 0x41a   :  { %1410 = vmax.xlane.f32.xlu1 %v1409_v5  ;;  %v5789_v8 = vpop.f32.mrb[16].mxu1  ;;  %v5827_v61 = vpop.permute.xlu1 %2329 }
 0x41b   :  { %v5791_v15 = vpop.f32.mrb[17].mxu1  ;;  %v1424_v16 = vsel %vm1321_vm2, %v5789_v8, -inf  ;;  %7179 = vst [vmem:[#allocation19_spill] sm:$0xff] %v5827_v61 }
 0x41c   :  { %1425 = vmax.xlane.f32.xlu0 %v1424_v16  ;;  %v5795_v31 = vpop.f32.mrb[18].mxu1  ;;  %v1418_v52 = vsel %vm1321_vm2, %v5791_v15, -inf }
 0x41d   :  { %v5799_v40 = vpop.f32.mrb[19].mxu1  ;;  %v1427_v43 = vsel %vm1321_vm2, %v5795_v31, -inf }
 0x41e   :  { %1428 = vmax.xlane.f32.xlu1 %v1427_v43  ;;  %v1421_v11 = vsel %vm1321_vm2, %v5799_v40, -inf }
 0x420   :  { %1419 = vmax.xlane.f32.xlu0 %v1418_v52 }
 0x422   :  { %1422 = vmax.xlane.f32.xlu1 %v1421_v11  ;;  %v5809_v10 = vpop.f32.mrb[20].mxu1 }
 0x423   :  { %v5813_v57 = vpop.f32.mrb[21].mxu1  ;;  %v1436_v5 = vsel %vm1321_vm2, %v5809_v10, -inf }
 0x424   :  { %1437 = vmax.xlane.f32.xlu0 %v1436_v5  ;;  %v5817_v16 = vpop.f32.mrb[22].mxu1  ;;  %v1430_v11 = vsel %vm1321_vm2, %v5813_v57, -inf }
 0x425   :  { %v5819_v43 = vpop.f32.mrb[23].mxu1  ;;  %v1439_v52 = vsel %vm1321_vm2, %v5817_v16, -inf }
 0x426   :  { %1440 = vmax.xlane.f32.xlu1 %v1439_v52  ;;  %v1433_v44 = vsel %vm1321_vm2, %v5819_v43, -inf }
 0x428   :  { %1431 = vmax.xlane.f32.xlu0 %v1430_v11  ;;  %v5840_v11 = vpop.permute.xlu1 %2507 }
 0x429   :  { %7180 = vst [vmem:[#allocation20_spill] sm:$0xff] %v5840_v11 }
 0x42a   :  { %1434 = vmax.xlane.f32.xlu1 %v1433_v44  ;;  %v1330_v5 = vpop.xlane.xlu0 %1329 }
 0x42b   :  { %v5831_v58 = vpop.f32.mrb[32].mxu0  ;;  %v1516_v41 = vsub.f32 %v5614_v26, %v1330_v5 }
 0x42c   :  { %v5834_v37 = vpop.f32.mrb[33].mxu0 }
 0x42d   :  { %v1582_v13 = vmul.f32 1.442695, %v1516_v41  ;;  %v5836_v20 = vpop.f32.mrb[34].mxu0 }
 0x42e   :  { %v5838_v52 = vpop.f32.mrb[35].mxu0  ;;  %v1324_v63 = vpop.xlane.xlu0 %1323 }
 0x42f   :  { %4566 = vpow2.f32 %v1582_v13  ;;  %v1514_v23 = vsub.f32 %v5616_v27, %v1324_v63 }
 0x431   :  { %v1578_v6 = vmul.f32 1.442695, %v1514_v23 }
 0x432   :  { %v1333_v44 = vpop.xlane.xlu0 %1332 }
 0x433   :  { %4568 = vpow2.f32 %v1578_v6  ;;  %v5843_v56 = vpop.f32.mrb[36].mxu0  ;;  %v1517_v26 = vsub.f32 %v5620_v21, %v1333_v44  ;;  %v1327_v5 = vpop.xlane.xlu1 %1326 }
 0x434   :  { %v5846_v4 = vpop.f32.mrb[37].mxu0  ;;  %v1515_v41 = vsub.f32 %v5625_v47, %v1327_v5 }
 0x435   :  { %v1584_v33 = vmul.f32 1.442695, %v1517_v26  ;;  %v5849_v12 = vpop.f32.mrb[38].mxu0 }
 0x436   :  { %v1580_v61 = vmul.f32 1.442695, %v1515_v41  ;;  %v5851_v11 = vpop.f32.mrb[39].mxu0  ;;  %v1342_v13 = vpop.xlane.xlu0 %1341 }
 0x437   :  { %4570 = vpow2.f32 %v1584_v33  ;;  %v1520_v27 = vsub.f32 %v5632_v34, %v1342_v13  ;;  %v1345_v6 = vpop.xlane.xlu1 %1344 }
 0x438   :  { %4572 = vpow2.f32 %v1580_v61  ;;  %v1521_v5 = vsub.f32 %v5638_v39, %v1345_v6  ;;  %v1442_v6 = vsel %vm1321_vm2, %v5834_v37, -inf }
 0x439   :  { %v5854_v23 = vpop.eup %4566  ;;  %v1590_v21 = vmul.f32 1.442695, %v1520_v27 }
 0x43a   :  { %v1336_v63 = vpop.xlane.xlu0 %1335  ;;  %v1712_v44 = vsel %vm1321_vm2, %v5854_v23, 0.0  ;;  %v1592_v13 = vmul.f32 1.442695, %v1521_v5  ;;  %v1451_v5 = vsel %vm1321_vm2, %v5836_v20, -inf }
 0x43b   :  { %v1518_v47 = vsub.f32 %v5634_v0, %v1336_v63  ;;  %1713 = vadd.xlane.f32.xlu0 %v1712_v44  ;;  %4574 = vpow2.f32 %v1590_v21  ;;  %v1339_v41 = vpop.xlane.xlu1 %1338  ;;  %v1448_v0 = vsel %vm1321_vm2, %v5831_v58, -inf }
 0x43c   :  { %v1519_v27 = vsub.f32 %v5645_v42, %v1339_v41 }
 0x43d   :  { %v5859_v26 = vpop.eup %4568  ;;  %v1586_v33 = vmul.f32 1.442695, %v1518_v47 }
 0x43e   :  { %v1706_v34 = vsel %vm1321_vm2, %v5859_v26, 0.0  ;;  %v1588_v39 = vmul.f32 1.442695, %v1519_v27  ;;  %v1354_v42 = vpop.xlane.xlu0 %1353  ;;  %v1445_v27 = vsel %vm1321_vm2, %v5838_v52, -inf }
 0x43f   :  { %1707 = vadd.xlane.f32.xlu0 %v1706_v34  ;;  %4576 = vpow2.f32 %v1586_v33  ;;  %v1524_v34 = vsub.f32 %v5651_v46, %v1354_v42  ;;  %v1460_v46 = vsel %vm1321_vm2, %v5843_v56, -inf }
 0x440   :  { %4578 = vpow2.f32 %v1592_v13 }
 0x441   :  { %v5864_v61 = vpop.eup %4570  ;;  %4580 = vpow2.f32 %v1588_v39  ;;  %v1357_v39 = vpop.xlane.xlu1 %1356 }
 0x442   :  { %v1715_v21 = vsel %vm1321_vm2, %v5864_v61, 0.0  ;;  %v5871_v63 = vpop.eup %4572  ;;  %v1348_v13 = vpop.xlane.xlu0 %1347 }
 0x443   :  { %1449 = vmax.xlane.f32.xlu0 %v1448_v0  ;;  %1716 = vadd.xlane.f32.xlu1 %v1715_v21  ;;  %v1709_v44 = vsel %vm1321_vm2, %v5871_v63, 0.0 }
 0x445   :  { %v5877_v47 = vpop.eup %4574 }
 0x446   :  { %v1724_v33 = vsel %vm1321_vm2, %v5877_v47, 0.0 }
 0x447   :  { %1443 = vmax.xlane.f32.xlu0 %v1442_v6  ;;  %1710 = vadd.xlane.f32.xlu1 %v1709_v44  ;;  %v1598_v6 = vmul.f32 1.442695, %v1524_v34  ;;  %v1522_v44 = vsub.f32 %v5653_v24, %v1348_v13  ;;  %v1454_v24 = vsel %vm1321_vm2, %v5846_v4, -inf }
 0x449   :  { %v5883_v41 = vpop.eup %4576  ;;  %4582 = vpow2.f32 %v1598_v6  ;;  %v1594_v35 = vmul.f32 1.442695, %v1522_v44  ;;  %v1457_v6 = vsel %vm1321_vm2, %v5851_v11, -inf }
 0x44a   :  { %v1718_v0 = vsel %vm1321_vm2, %v5883_v41, 0.0  ;;  %v5890_v21 = vpop.eup %4578 }
 0x44b   :  { %1452 = vmax.xlane.f32.xlu1 %v1451_v5  ;;  %1725 = vadd.xlane.f32.xlu0 %v1724_v33  ;;  %v1727_v5 = vsel %vm1321_vm2, %v5890_v21, 0.0  ;;  %v5897_v42 = vpop.eup %4580  ;;  %v1525_v33 = vsub.f32 %v5657_v32, %v1357_v39  ;;  %4584 = vpow2.f32 %v1594_v35  ;;  %v1366_v39 = vpop.xlane.xlu0 %1365 }
 0x44c   :  { %v1721_v34 = vsel %vm1321_vm2, %v5897_v42, 0.0 }
 0x44d   :  { %v1600_v13 = vmul.f32 1.442695, %v1525_v33 }
 0x44f   :  { %1446 = vmax.xlane.f32.xlu1 %v1445_v27  ;;  %1719 = vadd.xlane.f32.xlu0 %v1718_v0  ;;  %v1351_v27 = vpop.xlane.xlu1 %1350  ;;  %4586 = vpow2.f32 %v1600_v13  ;;  %v1360_v33 = vpop.xlane.xlu0 %1359 }
 0x450   :  { %v1523_v0 = vsub.f32 %v5661_v1, %v1351_v27  ;;  %v1528_v27 = vsub.f32 %v5673_v59, %v1366_v39 }
 0x452   :  { %v1596_v32 = vmul.f32 1.442695, %v1523_v0  ;;  %v1606_v0 = vmul.f32 1.442695, %v1528_v27 }
 0x453   :  { %1728 = vadd.xlane.f32.xlu1 %v1727_v5  ;;  %1461 = vmax.xlane.f32.xlu0 %v1460_v46  ;;  %v1463_v5 = vsel %vm1321_vm2, %v5849_v12, -inf  ;;  %v5909_v44 = vpop.eup %4582  ;;  %v1369_v1 = vpop.xlane.xlu1 %1368 }
 0x454   :  { %7181 = vst [vmem:[#allocation21_spill] sm:$0xff] %v5909_v44  ;;  %4588 = vpow2.f32 %v1596_v32  ;;  %v1736_v46 = vsel %vm1321_vm2, %v5909_v44, 0.0 }
 0x455   :  { %v5913_v35 = vpop.eup %4584  ;;  %4590 = vpow2.f32 %v1606_v0 }
 0x456   :  { %7182 = vst [vmem:[#allocation22_spill] sm:$0xff] %v5913_v35 }
 0x457   :  { %1722 = vadd.xlane.f32.xlu1 %v1721_v34  ;;  %1455 = vmax.xlane.f32.xlu0 %v1454_v24  ;;  %v1526_v34 = vsub.f32 %v5675_v60, %v1360_v33  ;;  %v1730_v24 = vsel %vm1321_vm2, %v5913_v35, 0.0  ;;  %v1363_v32 = vpop.xlane.xlu1 %1362 }
 0x458   :  { %v1527_v60 = vsub.f32 %v5681_v17, %v1363_v32 }
 0x459   :  { %v5919_v13 = vpop.eup %4586 }
 0x45a   :  { %7183 = vst [vmem:[#allocation23_spill] sm:$0xff] %v5919_v13  ;;  %v1739_v44 = vsel %vm1321_vm2, %v5919_v13, 0.0 }
 0x45b   :  { %1464 = vmax.xlane.f32.xlu1 %v1463_v5  ;;  %v1529_v5 = vsub.f32 %v5677_v3, %v1369_v1 }
 0x45d   :  { %v1608_v59 = vmul.f32 1.442695, %v1529_v5 }
 0x45e   :  { %v5924_v62 = vpop.eup %4588 }
 0x45f   :  { %1458 = vmax.xlane.f32.xlu1 %v1457_v6  ;;  %v1602_v6 = vmul.f32 1.442695, %v1526_v34  ;;  %7184 = vst [vmem:[#allocation24_spill] sm:$0xff] %v5924_v62  ;;  %v1733_v39 = vsel %vm1321_vm2, %v5924_v62, 0.0 }
 0x461   :  { %4592 = vpow2.f32 %v1602_v6 }
 0x462   :  { %4594 = vpow2.f32 %v1608_v59 }
 0x463   :  { %1737 = vadd.xlane.f32.xlu1 %v1736_v46  ;;  %v1604_v46 = vmul.f32 1.442695, %v1527_v60 }
 0x465   :  { %4596 = vpow2.f32 %v1604_v46 }
 0x467   :  { %1731 = vadd.xlane.f32.xlu1 %v1730_v24  ;;  %v5943_v24 = vpop.eup %4590 }
 0x468   :  { %7187 = vst [vmem:[#allocation27_spill] sm:$0xff] %v5943_v24  ;;  %v1748_v59 = vsel %vm1321_vm2, %v5943_v24, 0.0 }
 0x46b   :  { %1740 = vadd.xlane.f32.xlu1 %v1739_v44  ;;  %v5947_v5 = vpop.eup %4592 }
 0x46c   :  { %7188 = vst [vmem:[#allocation28_spill] sm:$0xff] %v5947_v5  ;;  %v5955_v60 = vpop.eup %4594 }
 0x46d   :  { %7191 = vst [vmem:[#allocation31_spill] sm:$0xff] %v5955_v60 }
 0x46f   :  { %1734 = vadd.xlane.f32.xlu1 %v1733_v39 }
 0x470   :  { %v5929_v3 = vpop.f32.mrb[24].mxu1 }
 0x471   :  { %v5931_v1 = vpop.f32.mrb[25].mxu1  ;;  %v1472_v33 = vsel %vm1321_vm2, %v5929_v3, -inf }
 0x472   :  { %7185 = vst [vmem:[#allocation25_spill] sm:$0xff] %v5931_v1  ;;  %v5935_v27 = vpop.f32.mrb[26].mxu1  ;;  %1473 = vmax.xlane.f32.xlu0 %v1472_v33  ;;  %v1466_v34 = vsel %vm1321_vm2, %v5931_v1, -inf  ;;  %v1742_v33 = vsel %vm1321_vm2, %v5947_v5, 0.0 }
 0x473   :  { %v5937_v44 = vpop.f32.mrb[27].mxu1  ;;  %v1475_v17 = vsel %vm1321_vm2, %v5935_v27, -inf }
 0x474   :  { %7186 = vst [vmem:[#allocation26_spill] sm:$0xff] %v5937_v44  ;;  %1476 = vmax.xlane.f32.xlu1 %v1475_v17  ;;  %v1469_v0 = vsel %vm1321_vm2, %v5937_v44, -inf  ;;  %v1751_v17 = vsel %vm1321_vm2, %v5955_v60, 0.0 }
 0x476   :  { %1467 = vmax.xlane.f32.xlu0 %v1466_v34  ;;  %v5965_v34 = vpop.eup %4596 }
 0x477   :  { %7194 = vst [vmem:[#allocation34_spill] sm:$0xff] %v5965_v34 }
 0x478   :  { %v5949_v32 = vpop.f32.mrb[28].mxu1  ;;  %1470 = vmax.xlane.f32.xlu1 %v1469_v0 }
 0x479   :  { %7189 = vst [vmem:[#allocation29_spill] sm:$0xff] %v5949_v32  ;;  %v5951_v6 = vpop.f32.mrb[29].mxu1 }
 0x47a   :  { %7190 = vst [vmem:[#allocation30_spill] sm:$0xff] %v5951_v6  ;;  %v5957_v39 = vpop.f32.mrb[30].mxu1  ;;  %1749 = vadd.xlane.f32.xlu0 %v1748_v59  ;;  %v1745_v59 = vsel %vm1321_vm2, %v5965_v34, 0.0  ;;  %v1478_v13 = vsel %vm1321_vm2, %v5951_v6, -inf }
 0x47b   :  { %7192 = vst [vmem:[#allocation32_spill] sm:$0xff] %v5957_v39  ;;  %v5959_v46 = vpop.f32.mrb[31].mxu1  ;;  %v1487_v0 = vsel %vm1321_vm2, %v5957_v39, -inf }
 0x47c   :  { %7193 = vst [vmem:[#allocation33_spill] sm:$0xff] %v5959_v46  ;;  %1743 = vadd.xlane.f32.xlu1 %v1742_v33  ;;  %v1481_v5 = vsel %vm1321_vm2, %v5959_v46, -inf }
 0x47e   :  { %1752 = vadd.xlane.f32.xlu0 %v1751_v17  ;;  %v1484_v17 = vsel %vm1321_vm2, %v5949_v32, -inf }
 0x480   :  { %v5969_v24 = vpop.f32.mrb[40].mxu0  ;;  %1488 = vmax.xlane.f32.xlu1 %v1487_v0 }
 0x481   :  { %7195 = vst [vmem:[#allocation35_spill] sm:$0xff] %v5969_v24  ;;  %v5971_v62 = vpop.f32.mrb[41].mxu0 }
 0x482   :  { %v5975_v35 = vpop.f32.mrb[42].mxu0  ;;  %1746 = vadd.xlane.f32.xlu0 %v1745_v59 }
 0x483   :  { %7196 = vst [vmem:[#allocation36_spill] sm:$0xff] %v5975_v35  ;;  %v5977_v33 = vpop.f32.mrb[43].mxu0  ;;  %v1499_v0 = vsel %vm1321_vm2, %v5975_v35, -inf }
 0x484   :  { %7197 = vst [vmem:[#allocation37_spill] sm:$0xff] %v5977_v33  ;;  %1482 = vmax.xlane.f32.xlu1 %v1481_v5  ;;  %v1493_v35 = vsel %vm1321_vm2, %v5977_v33, -inf }
 0x486   :  { %1485 = vmax.xlane.f32.xlu0 %v1484_v17 }
 0x488   :  { %v5985_v60 = vpop.f32.mrb[44].mxu0  ;;  %1500 = vmax.xlane.f32.xlu1 %v1499_v0  ;;  %v1378_v34 = vpop.xlane.xlu0 %1377 }
 0x489   :  { %v1532_v39 = vsub.f32 %v5707_v2, %v1378_v34  ;;  %v5988_v59 = vpop.f32.mrb[45].mxu0  ;;  %v1496_v2 = vsel %vm1321_vm2, %v5969_v24, -inf }
 0x48a   :  { %v5992_v46 = vpop.xlane.xlu1 %1380  ;;  %v5994_v5 = vpop.f32.mrb[46].mxu0  ;;  %1479 = vmax.xlane.f32.xlu0 %v1478_v13 }
 0x48b   :  { %7198 = vst [vmem:[#allocation38_spill] sm:$0xff] %v5994_v5  ;;  %v5996_v17 = vpop.f32.mrb[47].mxu0  ;;  %v1614_v32 = vmul.f32 1.442695, %v1532_v39  ;;  %v1511_v6 = vsel %vm1321_vm2, %v5994_v5, -inf  ;;  %v1490_v39 = vsel %vm1321_vm2, %v5971_v62, -inf }
 0x48c   :  { %7199 = vst [vmem:[#allocation39_spill] sm:$0xff] %v5996_v17  ;;  %1494 = vmax.xlane.f32.xlu1 %v1493_v35  ;;  %v6000_v0 = vpop.xlane.xlu0 %1371  ;;  %v1505_v24 = vsel %vm1321_vm2, %v5996_v17, -inf  ;;  %v1502_v17 = vsel %vm1321_vm2, %v5988_v59, -inf }
 0x48d   :  { %4598 = vpow2.f32 %v1614_v32 }
 0x48e   :  { %v6004_v34 = vpop.xlane.xlu1 %1374  ;;  %1497 = vmax.xlane.f32.xlu0 %v1496_v2 }
 0x490   :  { %1512 = vmax.xlane.f32.xlu1 %v1511_v6  ;;  %v1390_v13 = vpop.xlane.xlu0 %1389  ;;  %v1508_v6 = vsel %vm1321_vm2, %v5985_v60, -inf }
 0x491   :  { %v1536_v44 = vsub.f32 %v5725_v18, %v1390_v13 }
 0x492   :  { %v1393_v35 = vpop.xlane.xlu1 %1392  ;;  %1491 = vmax.xlane.f32.xlu0 %v1490_v39 }
 0x493   :  { %v1622_v33 = vmul.f32 1.442695, %v1536_v44  ;;  %v1537_v1 = vsub.f32 %v5731_v55, %v1393_v35 }
 0x494   :  { %1506 = vmax.xlane.f32.xlu1 %v1505_v24  ;;  %v1384_v2 = vpop.xlane.xlu0 %1383 }
 0x495   :  { %4600 = vpow2.f32 %v1622_v33  ;;  %v1534_v32 = vsub.f32 %v5727_v19, %v1384_v2  ;;  %v1624_v5 = vmul.f32 1.442695, %v1537_v1 }
 0x496   :  { %v1387_v18 = vpop.xlane.xlu1 %1386  ;;  %1509 = vmax.xlane.f32.xlu0 %v1508_v6 }
 0x497   :  { %v1618_v13 = vmul.f32 1.442695, %v1534_v32  ;;  %v1535_v39 = vsub.f32 %v5733_v30, %v1387_v18  ;;  %v6020_v55 = vpop.eup %4598 }
 0x498   :  { %v1760_v1 = vsel %vm1321_vm2, %v6020_v55, 0.0 }
 0x499   :  { %4602 = vpow2.f32 %v1618_v13  ;;  %v1402_v44 = vpop.xlane.xlu0 %1401  ;;  %v1620_v19 = vmul.f32 1.442695, %v1535_v39 }
 0x49a   :  { %1503 = vmax.xlane.f32.xlu0 %v1502_v17  ;;  %4604 = vpow2.f32 %v1624_v5  ;;  %v1540_v33 = vsub.f32 %v5745_v25, %v1402_v44 }
 0x49b   :  { %v6022_v24 = vpop.xlane.xlu1 %1404  ;;  %4606 = vpow2.f32 %v1620_v19 }
 0x49c   :  { %v1630_v32 = vmul.f32 1.442695, %v1540_v33 }
 0x49d   :  { %v1396_v35 = vpop.xlane.xlu0 %1395 }
 0x49e   :  { %1761 = vadd.xlane.f32.xlu0 %v1760_v1  ;;  %v1538_v6 = vsub.f32 %v5749_v36, %v1396_v35  ;;  %4608 = vpow2.f32 %v1630_v32 }
 0x49f   :  { %v6027_v30 = vpop.eup %4600  ;;  %v6029_v2 = vpop.xlane.xlu1 %1398 }
 0x4a0   :  { %7200 = vst [vmem:[#allocation40_spill] sm:$0xff] %v6027_v30  ;;  %v1772_v17 = vsel %vm1321_vm2, %v6027_v30, 0.0  ;;  %v1626_v13 = vmul.f32 1.442695, %v1538_v6 }
 0x4a1   :  { %v1414_v5 = vpop.xlane.xlu0 %1413 }
 0x4a2   :  { %1773 = vadd.xlane.f32.xlu0 %v1772_v17  ;;  %v1544_v39 = vsub.f32 %v5767_v50, %v1414_v5  ;;  %4610 = vpow2.f32 %v1626_v13 }
 0x4a3   :  { %v6034_v18 = vpop.eup %4602  ;;  %v6036_v25 = vpop.xlane.xlu1 %1416 }
 0x4a4   :  { %v1766_v44 = vsel %vm1321_vm2, %v6034_v18, 0.0  ;;  %v6043_v36 = vpop.eup %4604  ;;  %v1638_v35 = vmul.f32 1.442695, %v1544_v39 }
 0x4a5   :  { %v1408_v19 = vpop.xlane.xlu0 %1407  ;;  %2683 = vrot.lane.b32.xlu1 %v5480_v29, %s4922_s13  ;;  %7201 = vst [vmem:[#allocation41_spill] sm:$0xff] %v6043_v36  ;;  %v1775_v50 = vsel %vm1321_vm2, %v6043_v36, 0.0  ;;  %v6050_v6 = vpop.eup %4606 }
 0x4a6   :  { %1767 = vadd.xlane.f32.xlu0 %v1766_v44  ;;  %v1542_v1 = vsub.f32 %v5769_v9, %v1408_v19  ;;  %4612 = vpow2.f32 %v1638_v35  ;;  %v1769_v13 = vsel %vm1321_vm2, %v6050_v6, 0.0 }
 0x4a7   :  { %v6045_v33 = vpop.xlane.xlu1 %1410 }
 0x4a8   :  { %v1634_v29 = vmul.f32 1.442695, %v1542_v1  ;;  %v6057_v39 = vpop.eup %4608 }
 0x4a9   :  { %v1426_v32 = vpop.xlane.xlu0 %1425 }
 0x4aa   :  { %1776 = vadd.xlane.f32.xlu0 %v1775_v50  ;;  %v1548_v5 = vsub.f32 %v5789_v8, %v1426_v32  ;;  %4614 = vpow2.f32 %v1634_v29  ;;  %v1784_v50 = vsel %vm1321_vm2, %v6057_v39, 0.0  ;;  %v1530_v8 = vsub.f32 %v5709_v45, %v6000_v0 }
 0x4ab   :  { %v6052_v17 = vpop.xlane.xlu1 %1428 }
 0x4ac   :  { %v1646_v9 = vmul.f32 1.442695, %v1548_v5  ;;  %v6062_v36 = vpop.eup %4610 }
 0x4ad   :  { %v1420_v44 = vpop.xlane.xlu0 %1419  ;;  %v1778_v29 = vsel %vm1321_vm2, %v6062_v36, 0.0 }
 0x4ae   :  { %1770 = vadd.xlane.f32.xlu0 %v1769_v13  ;;  %v1546_v19 = vsub.f32 %v5791_v15, %v1420_v44  ;;  %4616 = vpow2.f32 %v1646_v9  ;;  %v1533_v15 = vsub.f32 %v5713_v54, %v5992_v46  ;;  %v1610_v44 = vmul.f32 1.442695, %v1530_v8 }
 0x4af   :  { %v1423_v30 = vpop.xlane.xlu1 %1422 }
 0x4b0   :  { %v1642_v1 = vmul.f32 1.442695, %v1546_v19  ;;  %v1547_v32 = vsub.f32 %v5799_v40, %v1423_v30  ;;  %v6069_v5 = vpop.eup %4612  ;;  %v1616_v9 = vmul.f32 1.442695, %v1533_v15  ;;  %v1531_v19 = vsub.f32 %v5715_v7, %v6004_v34 }
 0x4b1   :  { %v1438_v35 = vpop.xlane.xlu0 %1437  ;;  %v1796_v40 = vsel %vm1321_vm2, %v6069_v5, 0.0 }
 0x4b2   :  { %1785 = vadd.xlane.f32.xlu0 %v1784_v50  ;;  %4618 = vpow2.f32 %v1642_v1  ;;  %v1644_v50 = vmul.f32 1.442695, %v1547_v32  ;;  %v1552_v45 = vsub.f32 %v5809_v10, %v1438_v35  ;;  %v1612_v1 = vmul.f32 1.442695, %v1531_v19 }
 0x4b3   :  { %v6073_v13 = vpop.xlane.xlu1 %1440  ;;  %4620 = vpow2.f32 %v1610_v44  ;;  %v1541_v32 = vsub.f32 %v5753_v22, %v6022_v24  ;;  %v1539_v44 = vsub.f32 %v5755_v51, %v6029_v2 }
 0x4b4   :  { %v6078_v30 = vpop.eup %4614  ;;  %4622 = vpow2.f32 %v1644_v50  ;;  %v1654_v54 = vmul.f32 1.442695, %v1552_v45 }
 0x4b5   :  { %v1432_v0 = vpop.xlane.xlu0 %1431  ;;  %v1790_v10 = vsel %vm1321_vm2, %v6078_v30, 0.0  ;;  %4624 = vpow2.f32 %v1616_v9  ;;  %v1632_v15 = vmul.f32 1.442695, %v1541_v32  ;;  %v1543_v9 = vsub.f32 %v5777_v14, %v6045_v33 }
 0x4b6   :  { %1779 = vadd.xlane.f32.xlu0 %v1778_v29  ;;  %v1550_v46 = vsub.f32 %v5813_v57, %v1432_v0  ;;  %4626 = vpow2.f32 %v1654_v54  ;;  %v1545_v0 = vsub.f32 %v5775_v48, %v6036_v25 }
 0x4b7   :  { %v1435_v8 = vpop.xlane.xlu1 %1434  ;;  %4628 = vpow2.f32 %v1612_v1  ;;  %v1549_v1 = vsub.f32 %v5795_v31, %v6052_v17 }
 0x4b8   :  { %v6085_v35 = vpop.eup %4616  ;;  %v1650_v29 = vmul.f32 1.442695, %v1550_v46  ;;  %v1551_v7 = vsub.f32 %v5819_v43, %v1435_v8  ;;  %v1628_v43 = vmul.f32 1.442695, %v1539_v44  ;;  %v1640_v46 = vmul.f32 1.442695, %v1545_v0 }
 0x4b9   :  { %v1808_v34 = vsel %vm1321_vm2, %v6085_v35, 0.0  ;;  %v1648_v17 = vmul.f32 1.442695, %v1549_v1 }
 0x4ba   :  { %1797 = vadd.xlane.f32.xlu0 %v1796_v40  ;;  %4630 = vpow2.f32 %v1650_v29  ;;  %v1652_v50 = vmul.f32 1.442695, %v1551_v7 }
 0x4bb   :  { %4632 = vpow2.f32 %v1632_v15 }
 0x4bc   :  { %v6092_v57 = vpop.eup %4618  ;;  %4634 = vpow2.f32 %v1652_v50 }
 0x4bd   :  { %v6096_v45 = vpop.eup %4620  ;;  %v1802_v22 = vsel %vm1321_vm2, %v6092_v57, 0.0  ;;  %4636 = vpow2.f32 %v1628_v43 }
 0x4be   :  { %1791 = vadd.xlane.f32.xlu0 %v1790_v10  ;;  %v6100_v24 = vpop.eup %4622  ;;  %v1754_v51 = vsel %vm1321_vm2, %v6096_v45, 0.0  ;;  %v1636_v10 = vmul.f32 1.442695, %v1543_v9  ;;  %4638 = vpow2.f32 %v1640_v46 }
 0x4bf   :  { %v6106_v2 = vpop.eup %4624  ;;  %v1805_v19 = vsel %vm1321_vm2, %v6100_v24, 0.0 }
 0x4c0   :  { %v6112_v54 = vpop.eup %4626  ;;  %v1763_v25 = vsel %vm1321_vm2, %v6106_v2, 0.0  ;;  %4640 = vpow2.f32 %v1636_v10 }
 0x4c1   :  { %v6116_v8 = vpop.eup %4628  ;;  %v1820_v14 = vsel %vm1321_vm2, %v6112_v54, 0.0 }
 0x4c2   :  { %1809 = vadd.xlane.f32.xlu0 %v1808_v34  ;;  %v1757_v7 = vsel %vm1321_vm2, %v6116_v8, 0.0 }
 0x4c4   :  { %v6120_v33 = vpop.eup %4630 }
 0x4c5   :  { %v6126_v34 = vpop.eup %4632  ;;  %v1814_v44 = vsel %vm1321_vm2, %v6120_v33, 0.0 }
 0x4c6   :  { %1803 = vadd.xlane.f32.xlu0 %v1802_v22  ;;  %v6131_v50 = vpop.eup %4634  ;;  %v1553_v22 = vsub.f32 %v5817_v16, %v6073_v13 }
 0x4c8   :  { %v1714_v40 = vpop.xlane.xlu0 %1713  ;;  %v1656_v16 = vmul.f32 1.442695, %v1553_v22 }
 0x4c9   :  { %1755 = vadd.xlane.f32.xlu1 %v1754_v51  ;;  %4642 = vrcp.f32 %v1714_v40  ;;  %v6137_v51 = vpop.eup %4636  ;;  %v1817_v40 = vsel %vm1321_vm2, %v6131_v50, 0.0 }
 0x4ca   :  { %1806 = vadd.xlane.f32.xlu0 %v1805_v19 }
 0x4cc   :  { %v1708_v48 = vpop.xlane.xlu0 %1707 }
 0x4cd   :  { %1764 = vadd.xlane.f32.xlu1 %v1763_v25  ;;  %v6144_v25 = vpop.eup %4638 }
 0x4ce   :  { %1821 = vadd.xlane.f32.xlu0 %v1820_v14 }
 0x4d0   :  { %v1717_v32 = vpop.xlane.xlu1 %1716  ;;  %v1450_v29 = vpop.xlane.xlu0 %1449 }
 0x4d1   :  { %v1556_v15 = vsub.f32 %v5831_v58, %v1450_v29  ;;  %1758 = vadd.xlane.f32.xlu1 %v1757_v7  ;;  %4644 = vrcp.f32 %v1717_v32  ;;  %v1787_v58 = vsel %vm1321_vm2, %v6126_v34, 0.0  ;;  %v1799_v7 = vsel %vm1321_vm2, %v6144_v25, 0.0 }
 0x4d2   :  { %1815 = vadd.xlane.f32.xlu0 %v1814_v44  ;;  %4646 = vrcp.f32 %v1708_v48  ;;  %v1781_v48 = vsel %vm1321_vm2, %v6137_v51, 0.0 }
 0x4d3   :  { %v1662_v31 = vmul.f32 1.442695, %v1556_v15 }
 0x4d4   :  { %v1711_v43 = vpop.xlane.xlu1 %1710  ;;  %v1444_v0 = vpop.xlane.xlu0 %1443 }
 0x4d5   :  { %4648 = vpow2.f32 %v1662_v31  ;;  %v1554_v9 = vsub.f32 %v5834_v37, %v1444_v0  ;;  %1788 = vadd.xlane.f32.xlu1 %v1787_v58  ;;  %v6147_v37 = vpop.eup %4640 }
 0x4d6   :  { %4650 = vrcp.f32 %v1711_v43  ;;  %1818 = vadd.xlane.f32.xlu0 %v1817_v40  ;;  %v4643_v14 = vpop.eup %4642 }
 0x4d7   :  { %v1658_v19 = vmul.f32 1.442695, %v1554_v9  ;;  %4652 = vpow2.f32 %v1648_v17 }
 0x4d8   :  { %v1453_v13 = vpop.xlane.xlu1 %1452  ;;  %v1726_v46 = vpop.xlane.xlu0 %1725 }
 0x4d9   :  { %4654 = vpow2.f32 %v1658_v19  ;;  %v1557_v10 = vsub.f32 %v5836_v20, %v1453_v13  ;;  %1782 = vadd.xlane.f32.xlu1 %v1781_v48  ;;  %v1793_v20 = vsel %vm1321_vm2, %v6147_v37, 0.0 }
 0x4da   :  { %4656 = vpow2.f32 %v1656_v16 }
 0x4db   :  { %v1664_v1 = vmul.f32 1.442695, %v1557_v10  ;;  %v4645_v15 = vpop.eup %4644 }
 0x4dc   :  { %v1447_v32 = vpop.xlane.xlu1 %1446  ;;  %v1720_v29 = vpop.xlane.xlu0 %1719  ;;  %v1965_v43 = vmul.f32 %v4645_v15, %v5864_v61  ;;  %v1964_v61 = vmul.f32 %v4643_v14, %v5854_v23 }
 0x4dd   :  { %v1555_v44 = vsub.f32 %v5838_v52, %v1447_v32  ;;  %1800 = vadd.xlane.f32.xlu1 %v1799_v7  ;;  %v4647_v31 = vpop.eup %4646  ;;  %4658 = vpow2.f32 %v1664_v1 }
 0x4de   :  { %4660 = vrcp.f32 %v1726_v46  ;;  %v1962_v19 = vmul.f32 %v4647_v31, %v5859_v26  ;;  %v2027_v32 = vpack.c.bf16 %v1965_v43, %v1964_v61 }
 0x4df   :  { %v6152_v17 = vpop.eup %4648  ;;  %v1660_v0 = vmul.f32 1.442695, %v1555_v44  ;;  %4662 = vrcp.f32 %v1720_v29 }
 0x4e0   :  { %v4651_v22 = vpop.eup %4650  ;;  %v1729_v58 = vpop.xlane.xlu1 %1728  ;;  %v1832_v40 = vsel %vm1321_vm2, %v6152_v17, 0.0 }
 0x4e1   :  { %v1462_v9 = vpop.xlane.xlu0 %1461  ;;  %1833 = vadd.xlane.f32.xlu0 %v1832_v40  ;;  %1794 = vadd.xlane.f32.xlu1 %v1793_v20  ;;  %v1963_v16 = vmul.f32 %v4651_v22, %v5871_v63  ;;  %v6162_v13 = vpop.eup %4652  ;;  %4664 = vrcp.f32 %v1729_v58 }
 0x4e2   :  { %v1560_v52 = vsub.f32 %v5843_v56, %v1462_v9  ;;  %4666 = vpow2.f32 %v1660_v0  ;;  %v1811_v23 = vsel %vm1321_vm2, %v6162_v13, 0.0 }
 0x4e3   :  { %v6165_v48 = vpop.eup %4654  ;;  %v2026_v1 = vpack.c.bf16 %v1963_v16, %v1962_v19 }
 0x4e4   :  { %v1670_v10 = vmul.f32 1.442695, %v1560_v52  ;;  %v1723_v46 = vpop.xlane.xlu1 %1722  ;;  %v1826_v7 = vsel %vm1321_vm2, %v6165_v48, 0.0  ;;  %v6173_v63 = vpop.eup %4656 }
 0x4e5   :  { %v1456_v56 = vpop.xlane.xlu0 %1455  ;;  %4288 = vmatprep.mubr.msk.bf16.mxu0 %vm1321_vm2, %v2026_v1  ;;  %1827 = vadd.xlane.f32.xlu0 %v1826_v7 }
 0x4e6   :  { %4668 = vpow2.f32 %v1670_v10  ;;  %v1558_v26 = vsub.f32 %v5846_v4, %v1456_v56  ;;  %4289 = vmatmul.mubr.msk.bf16.vlgmr.msra.gmra.mrb[48].mxu0 %vm1321_vm2, %v2027_v32  ;;  %1812 = vadd.xlane.f32.xlu1 %v1811_v23  ;;  %v1823_v4 = vsel %vm1321_vm2, %v6173_v63, 0.0 }
 0x4e7   :  { %4670 = vrcp.f32 %v1723_v46  ;;  %4297 = vmatpush3.bf16.msra.mxu0 %v5655_v49  ;;  %v6181_v44 = vpop.eup %4658  ;;  %v7202_v46 = vld [vmem:[#allocation4_spill] sm:$0xff] }
 0x4e8   :  { %v1666_v14 = vmul.f32 1.442695, %v1558_v26  ;;  %4298 = vmatprep.subr.bf16.mxu0 %v5741_v38  ;;  %v1465_v29 = vpop.xlane.xlu1 %1464  ;;  %v4661_v31 = vpop.eup %4660 }
 0x4e9   :  { %v1561_v15 = vsub.f32 %v5849_v12, %v1465_v29  ;;  %v4663_v22 = vpop.eup %4662  ;;  %v1835_v12 = vsel %vm1321_vm2, %v6181_v44, 0.0 }
 0x4ea   :  { %4672 = vpow2.f32 %v1666_v14  ;;  %1824 = vadd.xlane.f32.xlu1 %v1823_v4  ;;  %v1966_v61 = vmul.f32 %v4663_v22, %v5883_v41 }
 0x4eb   :  { %v1672_v20 = vmul.f32 1.442695, %v1561_v15  ;;  %4299 = vmatpush3.bf16.msra.mxu0 %v5741_v38  ;;  %v4665_v43 = vpop.eup %4664 }
 0x4ec   :  { %4300 = vmatprep.subr.bf16.mxu0 %v5687_v53  ;;  %v1459_v49 = vpop.xlane.xlu1 %1458  ;;  %v6188_v58 = vpop.eup %4666 }
 0x4ed   :  { %4674 = vpow2.f32 %v1672_v20  ;;  %v1559_v0 = vsub.f32 %v5851_v11, %v1459_v49  ;;  %v1969_v11 = vmul.f32 %v4665_v43, %v5890_v21  ;;  %v1829_v16 = vsel %vm1321_vm2, %v6188_v58, 0.0  ;;  %v7203_v43 = vld [vmem:[#allocation25_spill] sm:$0xff] }
 0x4ee   :  { %1836 = vadd.xlane.f32.xlu1 %v1835_v12 }
 0x4ef   :  { %v1668_v40 = vmul.f32 1.442695, %v1559_v0  ;;  %4301 = vmatpush3.bf16.msra.mxu0 %v5687_v53  ;;  %v1968_v53 = vmul.f32 %v4661_v31, %v5877_v47 }
 0x4f0   :  { %v6190_v9 = vpop.eup %4668  ;;  %4302 = vmatprep.subr.bf16.mxu0 %v5759_v28  ;;  %v1738_v52 = vpop.xlane.xlu1 %1737 }
 0x4f1   :  { %v4671_v38 = vpop.eup %4670  ;;  %v1844_v19 = vsel %vm1321_vm2, %v6190_v9, 0.0  ;;  %4676 = vpow2.f32 %v1668_v40  ;;  %v2029_v56 = vpack.c.bf16 %v1969_v11, %v1968_v53 }
 0x4f2   :  { %1845 = vadd.xlane.f32.xlu0 %v1844_v19  ;;  %v1967_v10 = vmul.f32 %v4671_v38, %v5897_v42  ;;  %1830 = vadd.xlane.f32.xlu1 %v1829_v16  ;;  %v7204_v19 = vld [vmem:[#allocation26_spill] sm:$0xff] }
 0x4f3   :  { %4303 = vmatpush3.bf16.msra.mxu0 %v5759_v28 }
 0x4f4   :  { %v6202_v1 = vpop.eup %4672  ;;  %v2028_v32 = vpack.c.bf16 %v1967_v10, %v1966_v61  ;;  %4328 = vmatprep.subr.bf16.mxu0 %v7202_v46  ;;  %v1732_v21 = vpop.xlane.xlu1 %1731  ;;  %v7205_v61 = vld [vmem:[#allocation23_spill] sm:$0xff] }
 0x4f5   :  { %v1838_v7 = vsel %vm1321_vm2, %v6202_v1, 0.0 }
 0x4f6   :  { %4292 = vmatprep.mubr.msk.bf16.mxu0 %vm1321_vm2, %v2028_v32  ;;  %1839 = vadd.xlane.f32.xlu0 %v1838_v7  ;;  %v7208_v7 = vld [vmem:[#allocation21_spill] sm:$0xff] }
 0x4f7   :  { %4293 = vmatmul.mubr.msk.bf16.gmra.mrb[52].mxu0 %vm1321_vm2, %v2029_v56  ;;  %v6210_v41 = vpop.eup %4674 }
 0x4f8   :  { %v1741_v47 = vpop.xlane.xlu1 %1740  ;;  %v1847_v42 = vsel %vm1321_vm2, %v6210_v41, 0.0 }
 0x4f9   :  { %1848 = vadd.xlane.f32.xlu1 %v1847_v42  ;;  %4678 = vrcp.f32 %v1741_v47 }
 0x4fa   :  { %4680 = vrcp.f32 %v1732_v21  ;;  %v7207_v21 = vld [vmem:[#allocation24_spill] sm:$0xff] }
 0x4fb   :  { %v6214_v28 = vpop.eup %4676  ;;  %4682 = vrcp.f32 %v1738_v52 }
 0x4fc   :  { %v1735_v26 = vpop.xlane.xlu1 %1734  ;;  %v1841_v23 = vsel %vm1321_vm2, %v6214_v28, 0.0 }
 0x4fd   :  { %4684 = vrcp.f32 %v1735_v26  ;;  %1842 = vadd.xlane.f32.xlu1 %v1841_v23 }
 0x4ff   :  { %v1474_v14 = vpop.xlane.xlu0 %1473 }
 0x500   :  { %v1564_v29 = vsub.f32 %v5929_v3, %v1474_v14 }
 0x501   :  { %v1477_v15 = vpop.xlane.xlu1 %1476 }
 0x502   :  { %v1678_v4 = vmul.f32 1.442695, %v1564_v29  ;;  %v1565_v31 = vsub.f32 %v5935_v27, %v1477_v15  ;;  %v7206_v27 = vld [vmem:[#allocation22_spill] sm:$0xff] }
 0x503   :  { %v1468_v20 = vpop.xlane.xlu0 %1467  ;;  %v4679_v22 = vpop.eup %4678 }
 0x504   :  { %4686 = vpow2.f32 %v1678_v4  ;;  %v1680_v49 = vmul.f32 1.442695, %v1565_v31  ;;  %v1562_v0 = vsub.f32 %v7203_v43, %v1468_v20  ;;  %v4681_v12 = vpop.eup %4680  ;;  %v1973_v3 = vmul.f32 %v4679_v22, %v7205_v61  ;;  %v7209_v4 = vld [vmem:[#allocation32_spill] sm:$0xff] }
 0x505   :  { %v1471_v40 = vpop.xlane.xlu1 %1470  ;;  %v4683_v38 = vpop.eup %4682  ;;  %v1970_v32 = vmul.f32 %v4681_v12, %v7206_v27  ;;  %v7210_v20 = vld [vmem:[#allocation12_spill] sm:$0xff] }
 0x506   :  { %4688 = vpow2.f32 %v1680_v49  ;;  %v1674_v52 = vmul.f32 1.442695, %v1562_v0  ;;  %v1563_v11 = vsub.f32 %v7204_v19, %v1471_v40  ;;  %v1972_v47 = vmul.f32 %v4683_v38, %v7208_v7 }
 0x507   :  { %v4685_v16 = vpop.eup %4684  ;;  %v1750_v10 = vpop.xlane.xlu0 %1749 }
 0x508   :  { %4690 = vpow2.f32 %v1674_v52  ;;  %v1676_v53 = vmul.f32 1.442695, %v1563_v11  ;;  %v1971_v56 = vmul.f32 %v4685_v16, %v7207_v21  ;;  %v2031_v23 = vpack.c.bf16 %v1973_v3, %v1972_v47  ;;  %v7212_v16 = vld [vmem:[#allocation29_spill] sm:$0xff]  ;;  %v7214_v21 = vld [vmem:[#allocation14_spill] sm:$0xff] }
 0x509   :  { %v1744_v42 = vpop.xlane.xlu1 %1743  ;;  %v7213_v3 = vld [vmem:[#allocation33_spill] sm:$0xff] }
 0x50a   :  { %4692 = vpow2.f32 %v1676_v53  ;;  %v2030_v26 = vpack.c.bf16 %v1971_v56, %v1970_v32 }
 0x50b   :  { %v1753_v14 = vpop.xlane.xlu0 %1752 }
 0x50c   :  { %4304 = vmatprep.mubr.msk.bf16.mxu0 %vm1321_vm2, %v2030_v26  ;;  %4694 = vrcp.f32 %v1753_v14 }
 0x50d   :  { %4305 = vmatmul.mubr.msk.bf16.vlgmr.msra.gmra.mrb[56].mxu0 %vm1321_vm2, %v2031_v23  ;;  %v1489_v29 = vpop.xlane.xlu1 %1488  ;;  %4696 = vrcp.f32 %v1744_v42  ;;  %v7215_v42 = vld [vmem:[#allocation30_spill] sm:$0xff] }
 0x50e   :  { %v6228_v15 = vpop.eup %4686  ;;  %4329 = vmatpush3.bf16.msra.mxu0 %v7202_v46  ;;  %v1569_v31 = vsub.f32 %v7209_v4, %v1489_v29  ;;  %4698 = vrcp.f32 %v1750_v10  ;;  %v7211_v46 = vld [vmem:[#allocation19_spill] sm:$0xff] }
 0x50f   :  { %4330 = vmatprep.subr.bf16.mxu0 %v7210_v20  ;;  %v1747_v22 = vpop.xlane.xlu0 %1746  ;;  %v1856_v49 = vsel %vm1321_vm2, %v6228_v15, 0.0 }
 0x510   :  { %v6235_v43 = vpop.eup %4688  ;;  %v1688_v0 = vmul.f32 1.442695, %v1569_v31  ;;  %4700 = vrcp.f32 %v1747_v22  ;;  %1857 = vadd.xlane.f32.xlu0 %v1856_v49  ;;  %v7217_v49 = vld [vmem:[#allocation31_spill] sm:$0xff] }
 0x511   :  { %v1483_v12 = vpop.xlane.xlu1 %1482  ;;  %v1859_v40 = vsel %vm1321_vm2, %v6235_v43, 0.0 }
 0x512   :  { %v6239_v38 = vpop.eup %4690  ;;  %4702 = vpow2.f32 %v1688_v0  ;;  %4331 = vmatpush3.bf16.msra.mxu0 %v7210_v20  ;;  %1860 = vadd.xlane.f32.xlu1 %v1859_v40  ;;  %v1567_v10 = vsub.f32 %v7213_v3, %v1483_v12  ;;  %v7216_v20 = vld [vmem:[#allocation37_spill] sm:$0xff] }
 0x513   :  { %4332 = vmatprep.subr.bf16.mxu0 %v7211_v46  ;;  %v1486_v52 = vpop.xlane.xlu0 %1485  ;;  %v1850_v19 = vsel %vm1321_vm2, %v6239_v38, 0.0  ;;  %v7218_v12 = vld [vmem:[#allocation9_spill] sm:$0xff] }
 0x514   :  { %v6245_v11 = vpop.eup %4692  ;;  %v1568_v61 = vsub.f32 %v7212_v16, %v1486_v52  ;;  %1851 = vadd.xlane.f32.xlu0 %v1850_v19  ;;  %v1684_v14 = vmul.f32 1.442695, %v1567_v10  ;;  %v7220_v19 = vld [vmem:[#allocation34_spill] sm:$0xff]  ;;  %v7221_v10 = vld [vmem:[#allocation35_spill] sm:$0xff] }
 0x515   :  { %v1501_v53 = vpop.xlane.xlu1 %1500  ;;  %v1853_v7 = vsel %vm1321_vm2, %v6245_v11, 0.0 }
 0x516   :  { %v1686_v27 = vmul.f32 1.442695, %v1568_v61  ;;  %4333 = vmatpush3.bf16.msra.mxu0 %v7211_v46  ;;  %v4695_v32 = vpop.eup %4694  ;;  %v7219_v46 = vld [vmem:[#allocation28_spill] sm:$0xff] }
 0x517   :  { %4334 = vmatprep.subr.bf16.mxu0 %v7214_v21  ;;  %v1480_v56 = vpop.xlane.xlu0 %1479  ;;  %v4697_v47 = vpop.eup %4696  ;;  %v1977_v0 = vmul.f32 %v4695_v32, %v7217_v49  ;;  %v7224_v49 = vld [vmem:[#allocation39_spill] sm:$0xff] }
 0x518   :  { %4704 = vpow2.f32 %v1686_v27  ;;  %v1566_v26 = vsub.f32 %v7215_v42, %v1480_v56  ;;  %1854 = vadd.xlane.f32.xlu0 %v1853_v7  ;;  %v4699_v23 = vpop.eup %4698  ;;  %v1974_v52 = vmul.f32 %v4697_v47, %v7219_v46  ;;  %v7222_v56 = vld [vmem:[#allocation27_spill] sm:$0xff] }
 0x519   :  { %v1495_v29 = vpop.xlane.xlu1 %1494  ;;  %v1976_v7 = vmul.f32 %v4699_v23, %v7222_v56  ;;  %v7223_v23 = vld [vmem:[#allocation36_spill] sm:$0xff] }
 0x51a   :  { %v4701_v4 = vpop.eup %4700  ;;  %v1682_v31 = vmul.f32 1.442695, %v1566_v26  ;;  %4335 = vmatpush3.bf16.msra.mxu0 %v7214_v21  ;;  %v1571_v22 = vsub.f32 %v7216_v20, %v1495_v29 }
 0x51b   :  { %4360 = vmatprep.subr.bf16.mxu0 %v7218_v12  ;;  %v1498_v40 = vpop.xlane.xlu0 %1497  ;;  %v1975_v16 = vmul.f32 %v4701_v4, %v7220_v19  ;;  %v2033_v47 = vpack.c.bf16 %v1977_v0, %v1976_v7 }
 0x51c   :  { %v6260_v61 = vpop.eup %4702  ;;  %4706 = vpow2.f32 %v1682_v31  ;;  %v1692_v3 = vmul.f32 1.442695, %v1571_v22  ;;  %v1572_v27 = vsub.f32 %v7221_v10, %v1498_v40 }
 0x51d   :  { %4708 = vpow2.f32 %v1684_v14  ;;  %v1513_v21 = vpop.xlane.xlu1 %1512  ;;  %v1871_v32 = vsel %vm1321_vm2, %v6260_v61, 0.0  ;;  %v2032_v42 = vpack.c.bf16 %v1975_v16, %v1974_v52  ;;  %v1573_v14 = vsub.f32 %v7223_v23, %v1501_v53 }
 0x51e   :  { %4710 = vpow2.f32 %v1692_v3  ;;  %v1694_v26 = vmul.f32 1.442695, %v1572_v27  ;;  %1872 = vadd.xlane.f32.xlu1 %v1871_v32 }
 0x51f   :  { %4308 = vmatprep.mubr.msk.bf16.mxu0 %vm1321_vm2, %v2032_v42  ;;  %v1492_v29 = vpop.xlane.xlu0 %1491 }
 0x520   :  { %v1570_v4 = vsub.f32 %v5971_v62, %v1492_v29  ;;  %4309 = vmatmul.mubr.msk.bf16.gmra.mrb[60].mxu0 %vm1321_vm2, %v2033_v47  ;;  %4712 = vpow2.f32 %v1694_v26  ;;  %v1696_v62 = vmul.f32 1.442695, %v1573_v14  ;;  %v7227_v47 = vld [vmem:[#allocation38_spill] sm:$0xff] }
 0x521   :  { %v1507_v31 = vpop.xlane.xlu1 %1506  ;;  %v1577_v29 = vsub.f32 %v7227_v47, %v1513_v21 }
 0x522   :  { %v6269_v20 = vpop.eup %4704  ;;  %v1690_v22 = vmul.f32 1.442695, %v1570_v4  ;;  %v1575_v40 = vsub.f32 %v7224_v49, %v1507_v31 }
 0x523   :  { %v1510_v46 = vpop.xlane.xlu0 %1509  ;;  %v1868_v0 = vsel %vm1321_vm2, %v6269_v20, 0.0  ;;  %v1704_v49 = vmul.f32 1.442695, %v1577_v29 }
 0x524   :  { %v1700_v52 = vmul.f32 1.442695, %v1575_v40  ;;  %1869 = vadd.xlane.f32.xlu0 %v1868_v0  ;;  %4714 = vpow2.f32 %v1690_v22  ;;  %v1576_v16 = vsub.f32 %v5985_v60, %v1510_v46 }
 0x526   :  { %v6275_v19 = vpop.eup %4706  ;;  %4716 = vpow2.f32 %v1700_v52  ;;  %v1702_v7 = vmul.f32 1.442695, %v1576_v16 }
 0x527   :  { %v6278_v3 = vpop.eup %4708  ;;  %v1504_v53 = vpop.xlane.xlu0 %1503  ;;  %v1862_v10 = vsel %vm1321_vm2, %v6275_v19, 0.0  ;;  %4718 = vpow2.f32 %v1696_v62 }
 0x528   :  { %v6282_v27 = vpop.eup %4710  ;;  %1863 = vadd.xlane.f32.xlu0 %v1862_v10  ;;  %v1574_v32 = vsub.f32 %v5988_v59, %v1504_v53  ;;  %v1865_v60 = vsel %vm1321_vm2, %v6278_v3, 0.0  ;;  %4720 = vpow2.f32 %v1702_v7 }
 0x529   :  { %7225 = vst [vmem:[#allocation4_spill] sm:$0xff] %v6282_v27  ;;  %v1877_v56 = vsel %vm1321_vm2, %v6282_v27, 0.0 }
 0x52a   :  { %1878 = vadd.xlane.f32.xlu1 %v1877_v56  ;;  %v6289_v26 = vpop.eup %4712  ;;  %v1698_v4 = vmul.f32 1.442695, %v1574_v32 }
 0x52b   :  { %v1762_v42 = vpop.xlane.xlu0 %1761  ;;  %7226 = vst [vmem:[#allocation25_spill] sm:$0xff] %v6289_v26  ;;  %v1880_v14 = vsel %vm1321_vm2, %v6289_v26, 0.0 }
 0x52c   :  { %1866 = vadd.xlane.f32.xlu0 %v1865_v60  ;;  %4722 = vpow2.f32 %v1698_v4  ;;  %v7234_v60 = vld [vmem:[#allocation3_spill] sm:$0xff] }
 0x52d   :  { %4724 = vpow2.f32 %v1704_v49  ;;  %v6322_v49 = vpop.permute.xlu1 %2683 }
 0x52e   :  { %v6292_v31 = vpop.eup %4714  ;;  %4726 = vrcp.f32 %v1762_v42 }
 0x52f   :  { %7228 = vst [vmem:[#allocation26_spill] sm:$0xff] %v6292_v31  ;;  %v1774_v23 = vpop.xlane.xlu0 %1773  ;;  %v1874_v21 = vsel %vm1321_vm2, %v6292_v31, 0.0 }
 0x530   :  { %v6296_v22 = vpop.eup %4716  ;;  %1881 = vadd.xlane.f32.xlu0 %v1880_v14 }
 0x531   :  { %7229 = vst [vmem:[#allocation23_spill] sm:$0xff] %v6296_v22  ;;  %v1889_v59 = vsel %vm1321_vm2, %v6296_v22, 0.0  ;;  %v6302_v46 = vpop.eup %4718 }
 0x532   :  { %1890 = vadd.xlane.f32.xlu1 %v1889_v59  ;;  %7230 = vst [vmem:[#allocation22_spill] sm:$0xff] %v6302_v46  ;;  %v1883_v52 = vsel %vm1321_vm2, %v6302_v46, 0.0  ;;  %v6306_v62 = vpop.eup %4720 }
 0x533   :  { %v1768_v40 = vpop.xlane.xlu0 %1767  ;;  %7231 = vst [vmem:[#allocation24_spill] sm:$0xff] %v6306_v62  ;;  %v1892_v53 = vsel %vm1321_vm2, %v6306_v62, 0.0 }
 0x534   :  { %1875 = vadd.xlane.f32.xlu0 %v1874_v21 }
 0x536   :  { %v6310_v10 = vpop.eup %4722 }
 0x537   :  { %v1777_v0 = vpop.xlane.xlu0 %1776  ;;  %7232 = vst [vmem:[#allocation21_spill] sm:$0xff] %v6310_v10  ;;  %v1886_v7 = vsel %vm1321_vm2, %v6310_v10, 0.0  ;;  %v6314_v32 = vpop.eup %4724 }
 0x538   :  { %1884 = vadd.xlane.f32.xlu0 %v1883_v52  ;;  %7233 = vst [vmem:[#allocation32_spill] sm:$0xff] %v6314_v32  ;;  %v1895_v29 = vsel %vm1321_vm2, %v6314_v32, 0.0  ;;  %v4727_v22 = vpop.eup %4726 }
 0x53b   :  { %v1771_v16 = vpop.xlane.xlu0 %1770 }
 0x53c   :  { %1893 = vadd.xlane.f32.xlu0 %v1892_v53  ;;  %4728 = vrcp.f32 %v1771_v16 }
 0x53f   :  { %v1786_v56 = vpop.xlane.xlu0 %1785 }
 0x540   :  { %1887 = vadd.xlane.f32.xlu0 %v1886_v7  ;;  %v7235_v7 = vld [vmem:[#allocation2_spill] sm:$0xff] }
 0x543   :  { %2687 = vrot.lane.b32.xlu1 %v7234_v60, %s4922_s13  ;;  %v1780_v47 = vpop.xlane.xlu0 %1779 }
 0x544   :  { %1896 = vadd.xlane.f32.xlu0 %v1895_v29 }
 0x546   :  { %v4729_v42 = vpop.eup %4728 }
 0x547   :  { %v1798_v4 = vpop.xlane.xlu0 %1797 }
 0x54b   :  { %v1792_v14 = vpop.xlane.xlu0 %1791 }
 0x54f   :  { %v6320_v59 = vpop.xlane.xlu0 %1809 }
 0x553   :  { %v1804_v21 = vpop.xlane.xlu0 %1803 }
 0x556   :  { %v1756_v52 = vpop.xlane.xlu1 %1755 }
 0x557   :  { %v1807_v60 = vpop.xlane.xlu0 %1806 }
 0x55a   :  { %v1765_v53 = vpop.xlane.xlu1 %1764  ;;  %2685 = vrot.lane.b32.xlu0 %v7235_v7, %s4922_s13 }
 0x55b   :  { %4730 = vrcp.f32 %v1765_v53  ;;  %v6326_v29 = vpop.xlane.xlu0 %1821 }
 0x55c   :  { %4732 = vrcp.f32 %v1756_v52 }
 0x55d   :  { %4734 = vrcp.f32 %v1768_v40 }
 0x55e   :  { %v1759_v62 = vpop.xlane.xlu1 %1758 }
 0x55f   :  { %4736 = vrcp.f32 %v1759_v62  ;;  %v1816_v40 = vpop.xlane.xlu0 %1815 }
 0x560   :  { %4738 = vrcp.f32 %v1774_v23 }
 0x561   :  { %4740 = vrcp.f32 %v1777_v0 }
 0x562   :  { %v1789_v32 = vpop.xlane.xlu1 %1788  ;;  %4742 = vrcp.f32 %v1786_v56 }
 0x563   :  { %4744 = vrcp.f32 %v1789_v32  ;;  %v1983_v32 = vmul.f32 %v4729_v42, %v6050_v6  ;;  %v7238_v42 = vld [vmem:[#allocation41_spill] sm:$0xff] }
 0x564   :  { %4746 = vrcp.f32 %v1780_v47  ;;  %v1980_v47 = vmul.f32 %v4727_v22, %v6020_v55  ;;  %v7236_v55 = vld [vmem:[#allocation5_spill] sm:$0xff] }
 0x565   :  { %v4731_v26 = vpop.eup %4730  ;;  %4748 = vrcp.f32 %v1807_v60 }
 0x566   :  { %v1783_v7 = vpop.xlane.xlu1 %1782  ;;  %v4733_v16 = vpop.eup %4732  ;;  %v1981_v23 = vmul.f32 %v4731_v26, %v6106_v2 }
 0x567   :  { %4750 = vrcp.f32 %v1783_v7  ;;  %v4735_v53 = vpop.eup %4734  ;;  %v1978_v62 = vmul.f32 %v4733_v16, %v6096_v45  ;;  %v1819_v2 = vpop.xlane.xlu0 %1818 }
 0x568   :  { %4752 = vrcp.f32 %v1804_v21  ;;  %v1982_v7 = vmul.f32 %v4735_v53, %v6034_v18  ;;  %v2035_v21 = vpack.c.bf16 %v1981_v23, %v1980_v47  ;;  %v7240_v47 = vld [vmem:[#allocation7_spill] sm:$0xff] }
 0x569   :  { %v4737_v52 = vpop.eup %4736 }
 0x56a   :  { %v1801_v0 = vpop.xlane.xlu1 %1800  ;;  %v1979_v56 = vmul.f32 %v4737_v52, %v6116_v8  ;;  %v4739_v10 = vpop.eup %4738  ;;  %v2036_v26 = vpack.c.bf16 %v1983_v32, %v1982_v7 }
 0x56b   :  { %v4741_v60 = vpop.eup %4740  ;;  %4754 = vrcp.f32 %v1801_v0  ;;  %v7239_v0 = vld [vmem:[#allocation40_spill] sm:$0xff] }
 0x56c   :  { %v2034_v46 = vpack.c.bf16 %v1979_v56, %v1978_v62  ;;  %v4743_v27 = vpop.eup %4742  ;;  %4756 = vrcp.f32 %v1792_v14  ;;  %v7237_v14 = vld [vmem:[#allocation6_spill] sm:$0xff]  ;;  %v1984_v62 = vmul.f32 %v4739_v10, %v7239_v0  ;;  %v7247_v0 = vld [vmem:[#allocation17_spill] sm:$0xff] }
 0x56d   :  { %v4745_v31 = vpop.eup %4744  ;;  %4758 = vrcp.f32 %v1798_v4  ;;  %v1988_v52 = vmul.f32 %v4743_v27, %v6057_v39 }
 0x56e   :  { %4320 = vmatprep.mubr.msk.bf16.mxu1 %vm1321_vm2, %v2034_v46  ;;  %v1795_v45 = vpop.xlane.xlu1 %1794  ;;  %v4747_v8 = vpop.eup %4746  ;;  %v1989_v22 = vmul.f32 %v4745_v31, %v6126_v34  ;;  %v1985_v46 = vmul.f32 %v4741_v60, %v7238_v42  ;;  %v7242_v60 = vld [vmem:[#allocation16_spill] sm:$0xff] }
 0x56f   :  { %4321 = vmatmul.mubr.msk.bf16.vlgmr.msra.gmra.mrb[32].mxu1 %vm1321_vm2, %v2035_v21  ;;  %v4749_v6 = vpop.eup %4748  ;;  %4760 = vrcp.f32 %v1795_v45  ;;  %v1986_v4 = vmul.f32 %v4747_v8, %v6062_v36  ;;  %v1834_v32 = vpop.xlane.xlu0 %1833 }
 0x570   :  { %4345 = vmatpush3.bf16.msra.mxu1 %v7236_v55  ;;  %4324 = vmatprep.mubr.msk.bf16.mxu1 %vm1321_vm2, %v2036_v26  ;;  %4762 = vrcp.f32 %v1819_v2  ;;  %v1995_v34 = vmul.f32 %v4749_v6, %v6100_v24  ;;  %v2039_v56 = vpack.c.bf16 %v1989_v22, %v1988_v52  ;;  %v7245_v52 = vld [vmem:[#allocation18_spill] sm:$0xff] }
 0x571   :  { %v4751_v18 = vpop.eup %4750  ;;  %4346 = vmatprep.subr.bf16.mxu1 %v7237_v14  ;;  %4764 = vrcp.f32 %v6320_v59  ;;  %v2037_v59 = vpack.c.bf16 %v1985_v46, %v1984_v62 }
 0x572   :  { %v4753_v16 = vpop.eup %4752  ;;  %v1987_v53 = vmul.f32 %v4751_v18, %v6137_v51  ;;  %4766 = vrcp.f32 %v1816_v40  ;;  %v7241_v40 = vld [vmem:[#allocation8_spill] sm:$0xff]  ;;  %v7244_v18 = vld [vmem:[#allocation10_spill] sm:$0xff] }
 0x573   :  { %v1813_v23 = vpop.xlane.xlu1 %1812  ;;  %v1994_v36 = vmul.f32 %v4753_v16, %v6092_v57  ;;  %v1828_v2 = vpop.xlane.xlu0 %1827 }
 0x574   :  { %4768 = vrcp.f32 %v1813_v23  ;;  %4347 = vmatpush3.bf16.msra.mxu1 %v7237_v14  ;;  %v2038_v31 = vpack.c.bf16 %v1987_v53, %v1986_v4 }
 0x575   :  { %4348 = vmatprep.subr.bf16.mxu1 %v7240_v47  ;;  %v4755_v39 = vpop.eup %4754  ;;  %v2042_v24 = vpack.c.bf16 %v1995_v34, %v1994_v36 }
 0x576   :  { %4336 = vmatprep.mubr.msk.bf16.mxu0 %vm1321_vm2, %v2038_v31  ;;  %v4757_v27 = vpop.eup %4756  ;;  %v1993_v7 = vmul.f32 %v4755_v39, %v6144_v25 }
 0x577   :  { %v1825_v51 = vpop.xlane.xlu1 %1824  ;;  %4325 = vmatmul.mubr.msk.bf16.gmra.mrb[36].mxu1 %vm1321_vm2, %v2037_v59  ;;  %4337 = vmatmul.mubr.msk.bf16.vlgmr.msra.gmra.mrb[64].mxu0 %vm1321_vm2, %v2039_v56  ;;  %v4759_v10 = vpop.eup %4758  ;;  %v1990_v26 = vmul.f32 %v4757_v27, %v6078_v30  ;;  %v7249_v27 = vld [vmem:[#allocation15_spill] sm:$0xff] }
 0x578   :  { %4770 = vrcp.f32 %v1825_v51  ;;  %4349 = vmatpush3.bf16.msra.mxu1 %v7240_v47  ;;  %4361 = vmatpush3.bf16.msra.mxu0 %v7218_v12  ;;  %v1992_v6 = vmul.f32 %v4759_v10, %v6069_v5  ;;  %v7248_v47 = vld [vmem:[#allocation13_spill] sm:$0xff] }
 0x579   :  { %4350 = vmatprep.subr.bf16.mxu1 %v7241_v40  ;;  %4352 = vmatprep.mubr.msk.bf16.mxu1 %vm1321_vm2, %v2042_v24  ;;  %v4761_v57 = vpop.eup %4760  ;;  %4772 = vrcp.f32 %v6326_v29  ;;  %v7243_v29 = vld [vmem:[#allocation20_spill] sm:$0xff] }
 0x57a   :  { %4362 = vmatprep.subr.bf16.mxu0 %v7242_v60  ;;  %v4763_v21 = vpop.eup %4762  ;;  %v1991_v8 = vmul.f32 %v4761_v57, %v6147_v37  ;;  %v2041_v14 = vpack.c.bf16 %v1993_v7, %v1992_v6 }
 0x57b   :  { %v1837_v45 = vpop.xlane.xlu1 %1836  ;;  %v4765_v12 = vpop.eup %4764  ;;  %v1999_v30 = vmul.f32 %v4763_v21, %v6131_v50 }
 0x57c   :  { %4351 = vmatpush3.bf16.msra.mxu1 %v7241_v40  ;;  %4363 = vmatpush3.bf16.msra.mxu0 %v7242_v60  ;;  %v4767_v55 = vpop.eup %4766  ;;  %4774 = vrcp.f32 %v1837_v45  ;;  %v2040_v25 = vpack.c.bf16 %v1991_v8, %v1990_v26  ;;  %v1996_v37 = vmul.f32 %v4765_v12, %v6085_v35 }
 0x57d   :  { %4364 = vmatprep.subr.bf16.mxu0 %v7243_v29  ;;  %4376 = vmatprep.subr.bf16.mxu1 %v7244_v18  ;;  %4776 = vrcp.f32 %v1828_v2  ;;  %v1998_v16 = vmul.f32 %v4767_v55, %v6120_v33 }
 0x57e   :  { %v4769_v22 = vpop.eup %4768  ;;  %4778 = vrcp.f32 %v1834_v32  ;;  %4340 = vmatprep.mubr.msk.bf16.mxu0 %vm1321_vm2, %v2040_v25 }
 0x57f   :  { %v1997_v42 = vmul.f32 %v4769_v22, %v6162_v13  ;;  %v1831_v46 = vpop.xlane.xlu1 %1830  ;;  %v1846_v5 = vpop.xlane.xlu0 %1845  ;;  %4341 = vmatmul.mubr.msk.bf16.gmra.mrb[68].mxu0 %vm1321_vm2, %v2041_v14  ;;  %v2044_v50 = vpack.c.bf16 %v1999_v30, %v1998_v16  ;;  %v7246_v13 = vld [vmem:[#allocation11_spill] sm:$0xff] }
 0x580   :  { %4780 = vrcp.f32 %v1831_v46  ;;  %4365 = vmatpush3.bf16.msra.mxu0 %v7243_v29 }
 0x581   :  { %v2043_v4 = vpack.c.bf16 %v1997_v42, %v1996_v37  ;;  %4366 = vmatprep.subr.bf16.mxu0 %v7245_v52 }
 0x582   :  { %v4771_v53 = vpop.eup %4770 }
 0x583   :  { %4353 = vmatmul.mubr.msk.bf16.vlgmr.msra.gmra.mrb[40].mxu1 %vm1321_vm2, %v2043_v4  ;;  %v4773_v35 = vpop.eup %4772  ;;  %v2001_v33 = vmul.f32 %v4771_v53, %v6173_v63  ;;  %v1840_v23 = vpop.xlane.xlu0 %1839 }
 0x584   :  { %4377 = vmatpush3.bf16.msra.mxu1 %v7244_v18  ;;  %4356 = vmatprep.mubr.msk.bf16.mxu1 %vm1321_vm2, %v2044_v50  ;;  %v2000_v31 = vmul.f32 %v4773_v35, %v6112_v54 }
 0x585   :  { %4367 = vmatpush3.bf16.msra.mxu0 %v7245_v52  ;;  %4378 = vmatprep.subr.bf16.mxu1 %v7246_v13 }
 0x586   :  { %4392 = vmatprep.subr.bf16.mxu0 %v7247_v0  ;;  %v1849_v62 = vpop.xlane.xlu1 %1848  ;;  %v4775_v34 = vpop.eup %4774  ;;  %v2045_v59 = vpack.c.bf16 %v2001_v33, %v2000_v31 }
 0x587   :  { %v4777_v56 = vpop.eup %4776  ;;  %4782 = vrcp.f32 %v1849_v62  ;;  %v2005_v39 = vmul.f32 %v4775_v34, %v6181_v44 }
 0x588   :  { %4379 = vmatpush3.bf16.msra.mxu1 %v7246_v13  ;;  %v4779_v32 = vpop.eup %4778  ;;  %4784 = vrcp.f32 %v1840_v23  ;;  %v2002_v51 = vmul.f32 %v4777_v56, %v6165_v48 }
 0x589   :  { %4380 = vmatprep.subr.bf16.mxu1 %v7248_v47  ;;  %4786 = vrcp.f32 %v1846_v5  ;;  %v2004_v24 = vmul.f32 %v4779_v32, %v6152_v17 }
 0x58a   :  { %v4781_v36 = vpop.eup %4780  ;;  %v1843_v63 = vpop.xlane.xlu1 %1842 }
 0x58b   :  { %4788 = vrcp.f32 %v1843_v63  ;;  %4357 = vmatmul.mubr.msk.bf16.gmra.mrb[44].mxu1 %vm1321_vm2, %v2045_v59  ;;  %v2003_v54 = vmul.f32 %v4781_v36, %v6188_v58  ;;  %v2047_v40 = vpack.c.bf16 %v2005_v39, %v2004_v24 }
 0x58c   :  { %4381 = vmatpush3.bf16.msra.mxu1 %v7248_v47 }
 0x58d   :  { %4382 = vmatprep.subr.bf16.mxu1 %v7249_v27  ;;  %v2046_v10 = vpack.c.bf16 %v2003_v54, %v2002_v51  ;;  %v7250_v54 = vld [vmem:[#allocation26_spill] sm:$0xff] }
 0x58f   :  { %4368 = vmatprep.mubr.msk.bf16.mxu0 %vm1321_vm2, %v2046_v10 }
 0x590   :  { %4383 = vmatpush3.bf16.msra.mxu1 %v7249_v27  ;;  %4369 = vmatmul.mubr.msk.bf16.vlgmr.msra.gmra.mrb[72].mxu0 %vm1321_vm2, %v2047_v40  ;;  %v7251_v27 = vld [vmem:[#allocation4_spill] sm:$0xff] }
 0x591   :  { %4393 = vmatpush3.bf16.msra.mxu0 %v7247_v0  ;;  %v4783_v44 = vpop.eup %4782 }
 0x592   :  { %4394 = vmatprep.subr.bf16.mxu0 %v6322_v49  ;;  %v4785_v48 = vpop.eup %4784  ;;  %v2009_v57 = vmul.f32 %v4783_v44, %v6210_v41 }
 0x593   :  { %v4787_v58 = vpop.eup %4786  ;;  %v2006_v60 = vmul.f32 %v4785_v48, %v6202_v1 }
 0x594   :  { %v2008_v21 = vmul.f32 %v4787_v58, %v6190_v9 }
 0x595   :  { %v4789_v17 = vpop.eup %4788  ;;  %4395 = vmatpush3.bf16.msra.mxu0 %v6322_v49 }
 0x596   :  { %v2007_v7 = vmul.f32 %v4789_v17, %v6214_v28  ;;  %v2049_v45 = vpack.c.bf16 %v2009_v57, %v2008_v21  ;;  %v7252_v21 = vld [vmem:[#allocation22_spill] sm:$0xff] }
 0x598   :  { %v2048_v2 = vpack.c.bf16 %v2007_v7, %v2006_v60 }
 0x59a   :  { %4372 = vmatprep.mubr.msk.bf16.mxu0 %vm1321_vm2, %v2048_v2 }
 0x59b   :  { %4373 = vmatmul.mubr.msk.bf16.gmra.mrb[76].mxu0 %vm1321_vm2, %v2049_v45  ;;  %v7253_v45 = vld [vmem:[#allocation21_spill] sm:$0xff] }
 0x59d   :  { %v1858_v26 = vpop.xlane.xlu0 %1857 }
 0x59f   :  { %v1861_v8 = vpop.xlane.xlu1 %1860 }
 0x5a0   :  { %4790 = vrcp.f32 %v1861_v8  ;;  %v7254_v8 = vld [vmem:[#allocation25_spill] sm:$0xff] }
 0x5a1   :  { %v1852_v12 = vpop.xlane.xlu0 %1851 }
 0x5a2   :  { %4792 = vrcp.f32 %v1852_v12 }
 0x5a3   :  { %4794 = vrcp.f32 %v1858_v26 }
 0x5a5   :  { %v1855_v49 = vpop.xlane.xlu0 %1854 }
 0x5a6   :  { %4796 = vrcp.f32 %v1855_v49  ;;  %v7255_v49 = vld [vmem:[#allocation23_spill] sm:$0xff] }
 0x5aa   :  { %v4791_v41 = vpop.eup %4790 }
 0x5ab   :  { %v2013_v9 = vmul.f32 %v4791_v41, %v6235_v43  ;;  %v1873_v37 = vpop.xlane.xlu1 %1872 }
 0x5ac   :  { %v4793_v1 = vpop.eup %4792 }
 0x5ad   :  { %v4795_v6 = vpop.eup %4794  ;;  %v2010_v29 = vmul.f32 %v4793_v1, %v6239_v38 }
 0x5ae   :  { %v2012_v25 = vmul.f32 %v4795_v6, %v6228_v15 }
 0x5b0   :  { %v4797_v28 = vpop.eup %4796  ;;  %v2051_v14 = vpack.c.bf16 %v2013_v9, %v2012_v25 }
 0x5b1   :  { %v1870_v55 = vpop.xlane.xlu0 %1869  ;;  %v2011_v18 = vmul.f32 %v4797_v28, %v6245_v11 }
 0x5b2   :  { %4798 = vrcp.f32 %v1870_v55 }
 0x5b3   :  { %v2050_v22 = vpack.c.bf16 %v2011_v18, %v2010_v29  ;;  %v7256_v29 = vld [vmem:[#allocation32_spill] sm:$0xff] }
 0x5b5   :  { %4384 = vmatprep.mubr.msk.bf16.mxu1 %vm1321_vm2, %v2050_v22  ;;  %v1864_v30 = vpop.xlane.xlu0 %1863 }
 0x5b6   :  { %4385 = vmatmul.mubr.msk.bf16.vlgmr.msra.gmra.mrb[48].mxu1 %vm1321_vm2, %v2051_v14  ;;  %4800 = vrcp.f32 %v1864_v30  ;;  %v7257_v14 = vld [vmem:[#allocation24_spill] sm:$0xff] }
 0x5b7   :  { %4802 = vrcp.f32 %v1873_v37  ;;  %v1879_v5 = vpop.xlane.xlu1 %1878 }
 0x5b9   :  { %v6410_v42 = vpop.f32.mrb[48].mxu0  ;;  %v1867_v43 = vpop.xlane.xlu0 %1866 }
 0x5ba   :  { %v6412_v46 = vpop.f32.mrb[49].mxu0  ;;  %4804 = vrcp.f32 %v1867_v43 }
 0x5bb   :  { %v6414_v38 = vpop.f32.mrb[50].mxu0  ;;  %4806 = vrcp.f32 %v1879_v5 }
 0x5bc   :  { %v2771_v15 = vpack.c.bf16 %v6414_v38, %v6410_v42  ;;  %v6418_v11 = vpop.f32.mrb[51].mxu0  ;;  %v4799_v53 = vpop.eup %4798 }
 0x5bd   :  { %v2770_v16 = vpack.c.bf16 %v6418_v11, %v6412_v46  ;;  %v1882_v4 = vpop.xlane.xlu0 %1881  ;;  %v2016_v33 = vmul.f32 %v4799_v53, %v6269_v20 }
 0x5bf   :  { %v1891_v36 = vpop.xlane.xlu1 %1890 }
 0x5c0   :  { %v4801_v50 = vpop.eup %4800 }
 0x5c1   :  { %v1876_v52 = vpop.xlane.xlu0 %1875  ;;  %v4803_v35 = vpop.eup %4802  ;;  %v2014_v0 = vmul.f32 %v4801_v50, %v6275_v19 }
 0x5c2   :  { %4808 = vrcp.f32 %v1876_v52  ;;  %v2017_v34 = vmul.f32 %v4803_v35, %v6260_v61 }
 0x5c3   :  { %v2688_v60 = vpop.permute.xlu1 %2687 }
 0x5c4   :  { %v4805_v13 = vpop.eup %4804  ;;  %v2053_v56 = vpack.c.bf16 %v2017_v34, %v2016_v33 }
 0x5c5   :  { %v1885_v23 = vpop.xlane.xlu0 %1884  ;;  %v2015_v62 = vmul.f32 %v4805_v13, %v6278_v3  ;;  %v4807_v59 = vpop.eup %4806 }
 0x5c6   :  { %4810 = vrcp.f32 %v1885_v23  ;;  %v2019_v10 = vmul.f32 %v4807_v59, %v7251_v27 }
 0x5c7   :  { %v2052_v31 = vpack.c.bf16 %v2015_v62, %v2014_v0  ;;  %4812 = vrcp.f32 %v1882_v4 }
 0x5c8   :  { %4814 = vrcp.f32 %v1891_v36 }
 0x5c9   :  { %4388 = vmatprep.mubr.msk.bf16.mxu1 %vm1321_vm2, %v2052_v31  ;;  %v1894_v47 = vpop.xlane.xlu0 %1893 }
 0x5ca   :  { %v6426_v32 = vpop.f32.mrb[52].mxu0  ;;  %4389 = vmatmul.mubr.msk.bf16.gmra.mrb[52].mxu1 %vm1321_vm2, %v2053_v56 }
 0x5cb   :  { %v6429_v39 = vpop.f32.mrb[53].mxu0 }
 0x5cc   :  { %v6432_v20 = vpop.f32.mrb[54].mxu0  ;;  %v4809_v19 = vpop.eup %4808 }
 0x5cd   :  { %v2773_v61 = vpack.c.bf16 %v6432_v20, %v6426_v32  ;;  %v6436_v3 = vpop.f32.mrb[55].mxu0  ;;  %v1888_v51 = vpop.xlane.xlu0 %1887  ;;  %v2018_v24 = vmul.f32 %v4809_v19, %v7250_v54 }
 0x5ce   :  { %v2772_v63 = vpack.c.bf16 %v6436_v3, %v6429_v39  ;;  %4816 = vrcp.f32 %v1888_v51 }
 0x5cf   :  { %v2054_v40 = vpack.c.bf16 %v2019_v10, %v2018_v24 }
 0x5d0   :  { %v4811_v48 = vpop.eup %4810 }
 0x5d1   :  { %4400 = vmatprep.mubr.msk.bf16.mxu0 %vm1321_vm2, %v2054_v40  ;;  %v1897_v44 = vpop.xlane.xlu0 %1896  ;;  %v4813_v17 = vpop.eup %4812  ;;  %v2021_v2 = vmul.f32 %v4811_v48, %v7252_v21 }
 0x5d2   :  { %4818 = vrcp.f32 %v1897_v44  ;;  %v4815_v57 = vpop.eup %4814  ;;  %v2020_v12 = vmul.f32 %v4813_v17, %v7254_v8  ;;  %v4522_v8 = vld [vmem:[%s7109_s3] sm:$0xff]  }
 0x5d3   :  { %4820 = vrcp.f32 %v1894_v47  ;;  %v2023_v41 = vmul.f32 %v4815_v57, %v7255_v49  ;;  %4408 = vmatprep.subr.bf16.mxu1 %v4522_v8 }
 0x5d4   :  { %v2055_v1 = vpack.c.bf16 %v2021_v2, %v2020_v12  ;;  %4409 = vmatpush3.bf16.msra.mxu1 %v4522_v8 }
 0x5d5   :  { %v2686_v58 = vpop.permute.xlu0 %2685 }
 0x5d6   :  { %4396 = vmatprep.subr.bf16.mxu0 %v2686_v58 }
 0x5d7   :  { %4397 = vmatpush3.bf16.msra.mxu0 %v2686_v58 }
 0x5d8   :  { %v4817_v7 = vpop.eup %4816  ;;  %4398 = vmatprep.subr.bf16.mxu0 %v2688_v60 }
 0x5d9   :  { %v2022_v26 = vmul.f32 %v4817_v7, %v7253_v45 }
 0x5db   :  { %4399 = vmatpush3.bf16.msra.mxu0 %v2688_v60  ;;  %v2056_v28 = vpack.c.bf16 %v2023_v41, %v2022_v26  ;;  %v4523_v41 = vld [vmem:[%s7109_s3 + $0x8] sm:$0xff]   ;;  %s4925_s3 = smov 24  }
 0x5dc   :  { %v4819_v6 = vpop.eup %4818  ;;  %4410 = vmatprep.subr.bf16.mxu1 %v4523_v41 }
 0x5dd   :  { %v4821_v9 = vpop.eup %4820  ;;  %v2025_v18 = vmul.f32 %v4819_v6, %v7256_v29  ;;  %4411 = vmatpush3.bf16.msra.mxu1 %v4523_v41 }
 0x5de   :  { %4401 = vmatmul.mubr.msk.bf16.vlgmr.msra.gmra.mrb[80].mxu0 %vm1321_vm2, %v2055_v1  ;;  %v2024_v30 = vmul.f32 %v4821_v9, %v7257_v14 }
 0x5df   :  { %4404 = vmatprep.mubr.msk.bf16.mxu0 %vm1321_vm2, %v2056_v28 }
 0x5e0   :  { %v6449_v55 = vpop.f32.mrb[56].mxu0  ;;  %v2057_v4 = vpack.c.bf16 %v2025_v18, %v2024_v30 }
 0x5e1   :  { %v6452_v25 = vpop.f32.mrb[57].mxu0 }
 0x5e2   :  { %v6454_v22 = vpop.f32.mrb[58].mxu0 }
 0x5e3   :  { %v2775_v37 = vpack.c.bf16 %v6454_v22, %v6449_v55  ;;  %v6459_v43 = vpop.f32.mrb[59].mxu0 }
 0x5e4   :  { %v2774_v5 = vpack.c.bf16 %v6459_v43, %v6452_v25 }
 0x5e6   :  { %4405 = vmatmul.mubr.msk.bf16.gmra.mrb[84].mxu0 %vm1321_vm2, %v2057_v4 }
 0x5f3   :  { %v6464_v53 = vpop.f32.mrb[60].mxu0 }
 0x5f4   :  { %v6466_v52 = vpop.f32.mrb[61].mxu0 }
 0x5f5   :  { %v6468_v50 = vpop.f32.mrb[62].mxu0 }
 0x5f6   :  { %v2777_v35 = vpack.c.bf16 %v6468_v50, %v6464_v53  ;;  %v6472_v13 = vpop.f32.mrb[63].mxu0 }
 0x5f7   :  { %v2776_v33 = vpack.c.bf16 %v6472_v13, %v6466_v52  ;;  %v6568_v52 = vld [vmem:[%s7107_s6 + $0x4] ss:$0 sm:$0xff] }
 0x642   :  { %v4322_v23 = vpop.f32.mrb[32].mxu1 }
 0x643   :  { %v2294_v0 = vpop.f32.mrb[33].mxu1 }
 0x644   :  { %v4323_v62 = vpop.f32.mrb[34].mxu1 }
 0x645   :  { %v2779_v34 = vpack.c.bf16 %v4323_v62, %v4322_v23  ;;  %v2297_v31 = vpop.f32.mrb[35].mxu1 }
 0x646   :  { %v2778_v56 = vpack.c.bf16 %v2297_v31, %v2294_v0 }
 0x647   :  { %2812 = vrot.lane.b32.xlu1 %v2779_v34, %s4923_s14 }
 0x648   :  { %2810 = vrot.lane.b32.xlu0 %v2778_v56, %s4923_s14 }
 0x64a   :  { %v4326_v47 = vpop.f32.mrb[36].mxu1  ;;  %v4338_v59 = vpop.f32.mrb[64].mxu0 }
 0x64b   :  { %v2310_v36 = vpop.f32.mrb[37].mxu1  ;;  %v2383_v19 = vpop.f32.mrb[65].mxu0 }
 0x64c   :  { %v4327_v51 = vpop.f32.mrb[38].mxu1  ;;  %v4339_v54 = vpop.f32.mrb[66].mxu0 }
 0x64d   :  { %v2781_v24 = vpack.c.bf16 %v4327_v51, %v4326_v47  ;;  %v2783_v27 = vpack.c.bf16 %v4339_v54, %v4338_v59  ;;  %v2313_v10 = vpop.f32.mrb[39].mxu1  ;;  %v2386_v40 = vpop.f32.mrb[67].mxu0 }
 0x64e   :  { %v2780_v44 = vpack.c.bf16 %v2313_v10, %v2310_v36  ;;  %v2782_v48 = vpack.c.bf16 %v2386_v40, %v2383_v19 }
 0x64f   :  { %2816 = vrot.lane.b32.xlu1 %v2781_v24, %s4923_s14 }
 0x650   :  { %2814 = vrot.lane.b32.xlu0 %v2780_v44, %s4923_s14 }
 0x652   :  { %v6480_v58 = vpop.f32.mrb[68].mxu0 }
 0x653   :  { %2820 = vrot.lane.b32.xlu1 %v2783_v27, %s4923_s14  ;;  %v2399_v17 = vpop.f32.mrb[69].mxu0 }
 0x654   :  { %2818 = vrot.lane.b32.xlu0 %v2782_v48, %s4923_s14  ;;  %v4343_v57 = vpop.f32.mrb[70].mxu0 }
 0x655   :  { %v2785_v60 = vpack.c.bf16 %v4343_v57, %v6480_v58  ;;  %v2402_v7 = vpop.f32.mrb[71].mxu0 }
 0x656   :  { %v4354_v21 = vpop.f32.mrb[40].mxu1  ;;  %v2784_v2 = vpack.c.bf16 %v2402_v7, %v2399_v17 }
 0x657   :  { %v2472_v45 = vpop.f32.mrb[41].mxu1 }
 0x658   :  { %v4355_v26 = vpop.f32.mrb[42].mxu1 }
 0x659   :  { %v2787_v12 = vpack.c.bf16 %v4355_v26, %v4354_v21  ;;  %v2475_v49 = vpop.f32.mrb[43].mxu1 }
 0x65a   :  { %v2786_v1 = vpack.c.bf16 %v2475_v49, %v2472_v45 }
 0x65b   :  { %2836 = vrot.lane.b32.xlu1 %v2787_v12, %s4924_s2 }
 0x65c   :  { %2834 = vrot.lane.b32.xlu0 %v2786_v1, %s4924_s2 }
 0x65e   :  { %v4358_v6 = vpop.f32.mrb[44].mxu1 }
 0x65f   :  { %v2488_v28 = vpop.f32.mrb[45].mxu1 }
 0x660   :  { %v4359_v9 = vpop.f32.mrb[46].mxu1 }
 0x661   :  { %v2789_v29 = vpack.c.bf16 %v4359_v9, %v4358_v6  ;;  %v2491_v18 = vpop.f32.mrb[47].mxu1 }
 0x662   :  { %v2788_v14 = vpack.c.bf16 %v2491_v18, %v2488_v28 }
 0x663   :  { %2840 = vrot.lane.b32.xlu1 %v2789_v29, %s4924_s2  ;;  %v4370_v30 = vpop.f32.mrb[72].mxu0 }
 0x664   :  { %2838 = vrot.lane.b32.xlu0 %v2788_v14, %s4924_s2  ;;  %v2561_v4 = vpop.f32.mrb[73].mxu0 }
 0x665   :  { %v4371_v23 = vpop.f32.mrb[74].mxu0 }
 0x666   :  { %v2791_v0 = vpack.c.bf16 %v4371_v23, %v4370_v30  ;;  %v2564_v62 = vpop.f32.mrb[75].mxu0 }
 0x667   :  { %v2790_v34 = vpack.c.bf16 %v2564_v62, %v2561_v4 }
 0x66e   :  { %v4374_v31 = vpop.f32.mrb[76].mxu0 }
 0x66f   :  { %v2577_v56 = vpop.f32.mrb[77].mxu0 }
 0x670   :  { %v4375_v47 = vpop.f32.mrb[78].mxu0 }
 0x671   :  { %v2793_v59 = vpack.c.bf16 %v4375_v47, %v4374_v31  ;;  %v2580_v36 = vpop.f32.mrb[79].mxu0 }
 0x672   :  { %v2792_v19 = vpack.c.bf16 %v2580_v36, %v2577_v56 }
 0x689   :  { %v4386_v51 = vpop.f32.mrb[48].mxu1 }
 0x68a   :  { %v2650_v54 = vpop.f32.mrb[49].mxu1 }
 0x68b   :  { %v4387_v24 = vpop.f32.mrb[50].mxu1 }
 0x68c   :  { %v2795_v27 = vpack.c.bf16 %v4387_v24, %v4386_v51  ;;  %v2653_v10 = vpop.f32.mrb[51].mxu1 }
 0x68d   :  { %v2794_v40 = vpack.c.bf16 %v2653_v10, %v2650_v54 }
 0x68e   :  { %2860 = vrot.lane.b32.xlu1 %v2795_v27, %s4925_s3 }
 0x68f   :  { %2858 = vrot.lane.b32.xlu0 %v2794_v40, %s4925_s3 }
 0x692   :  { %2844 = vrot.lane.b32.xlu1 %v2791_v0, %s4924_s2 }
 0x693   :  { %2842 = vrot.lane.b32.xlu0 %v2790_v34, %s4924_s2 }
 0x69d   :  { %v4390_v44 = vpop.f32.mrb[52].mxu1 }
 0x69e   :  { %v2666_v48 = vpop.f32.mrb[53].mxu1 }
 0x69f   :  { %v4391_v58 = vpop.f32.mrb[54].mxu1 }
 0x6a0   :  { %v2797_v17 = vpack.c.bf16 %v4391_v58, %v4390_v44  ;;  %v2669_v57 = vpop.f32.mrb[55].mxu1 }
 0x6a1   :  { %v2796_v7 = vpack.c.bf16 %v2669_v57, %v2666_v48 }
 0x6a2   :  { %2864 = vrot.lane.b32.xlu1 %v2797_v17, %s4925_s3 }
 0x6a3   :  { %2862 = vrot.lane.b32.xlu0 %v2796_v7, %s4925_s3 }
 0x6a6   :  { %2824 = vrot.lane.b32.xlu1 %v2785_v60, %s4923_s14 }
 0x6a7   :  { %2822 = vrot.lane.b32.xlu0 %v2784_v2, %s4923_s14 }
 0x6b1   :  { %v4402_v21 = vpop.f32.mrb[80].mxu0 }
 0x6b2   :  { %v2739_v45 = vpop.f32.mrb[81].mxu0 }
 0x6b3   :  { %v4403_v26 = vpop.f32.mrb[82].mxu0 }
 0x6b4   :  { %v2799_v8 = vpack.c.bf16 %v4403_v26, %v4402_v21  ;;  %v2742_v12 = vpop.f32.mrb[83].mxu0 }
 0x6b5   :  { %v2798_v49 = vpack.c.bf16 %v2742_v12, %v2739_v45 }
 0x6b6   :  { %2868 = vrot.lane.b32.xlu1 %v2799_v8, %s4925_s3  ;;  %v4886_v8 = vld [vmem:[%s7105_s0] sm:$0xff] }
 0x6b7   :  { %2866 = vrot.lane.b32.xlu0 %v2798_v49, %s4925_s3 }
 0x6b9   :  { %v4406_v41 = vpop.f32.mrb[84].mxu0  ;;  %v2813_v9 = vpop.permute.xlu1 %2812 }
 0x6ba   :  { %2848 = vrot.lane.b32.xlu1 %v2793_v59, %s4924_s2  ;;  %v2755_v1 = vpop.f32.mrb[85].mxu0  ;;  %v2811_v29 = vpop.permute.xlu0 %2810  ;;  %v2879_v47 = vsel %vm552_vm1, %v2771_v15, %v2813_v9 }
 0x6bb   :  { %2846 = vrot.lane.b32.xlu0 %v2792_v19, %s4924_s2  ;;  %v4407_v6 = vpop.f32.mrb[86].mxu0  ;;  %v2876_v31 = vsel %vm552_vm1, %v2770_v16, %v2811_v29  ;;  %v4889_v29 = vld [vmem:[%s7105_s0 + $0x18] sm:$0xff] }
 0x6bc   :  { %v2801_v60 = vpack.c.bf16 %v4407_v6, %v4406_v41  ;;  %v2758_v28 = vpop.f32.mrb[87].mxu0  ;;  %v4887_v41 = vld [vmem:[%s7105_s0 + $0x10] sm:$0xff] }
 0x6bd   :  { %v2800_v2 = vpack.c.bf16 %v2758_v28, %v2755_v1 }
 0x6be   :  { %2872 = vrot.lane.b32.xlu1 %v2801_v60, %s4925_s3  ;;  %v4888_v60 = vld [vmem:[%s7105_s0 + $0x8] sm:$0xff] }
 0x6bf   :  { %2870 = vrot.lane.b32.xlu0 %v2800_v2, %s4925_s3 }
 0x6c1   :  { %v2817_v18 = vpop.permute.xlu1 %2816 }
 0x6c2   :  { %v2815_v14 = vpop.permute.xlu0 %2814  ;;  %v2885_v15 = vsel %vm552_vm1, %v2773_v61, %v2817_v18 }
 0x6c3   :  { %v2882_v42 = vsel %vm552_vm1, %v2772_v63, %v2815_v14 }
 0x6c5   :  { %v2821_v30 = vpop.permute.xlu1 %2820 }
 0x6c6   :  { %v2819_v4 = vpop.permute.xlu0 %2818  ;;  %v2891_v61 = vsel %vm552_vm1, %v2775_v37, %v2821_v30 }
 0x6c7   :  { %v2888_v32 = vsel %vm552_vm1, %v2774_v5, %v2819_v4 }
 0x6cd   :  { %v2837_v23 = vpop.permute.xlu1 %2836 }
 0x6ce   :  { %v2835_v0 = vpop.permute.xlu0 %2834  ;;  %v2902_v19 = vsel %vm2898_vm3, %v2879_v47, %v2837_v23 }
 0x6cf   :  { %v2900_v59 = vsel %vm2898_vm3, %v2876_v31, %v2835_v0 }
 0x6d5   :  { %v2841_v62 = vpop.permute.xlu1 %2840 }
 0x6d6   :  { %v2839_v34 = vpop.permute.xlu0 %2838  ;;  %v2906_v27 = vsel %vm2898_vm3, %v2885_v15, %v2841_v62 }
 0x6d7   :  { %v2904_v16 = vsel %vm2898_vm3, %v2882_v42, %v2839_v34  ;;  %v4893_v42 = vld [vmem:[%s7105_s0 + $0x38] sm:$0xff] }
 0x700   :  { %v2861_v56 = vpop.permute.xlu1 %2860 }
 0x701   :  { %v2859_v36 = vpop.permute.xlu0 %2858  ;;  %v2919_v54 = vsel %vm2915_vm4, %v2902_v19, %v2861_v56  ;;  %v4890_v56 = vld [vmem:[%s7105_s0 + $0x20] sm:$0xff]  ;;  %v4891_v19 = vld [vmem:[%s7105_s0 + $0x30] sm:$0xff] }
 0x702   :  { %v2917_v51 = vsel %vm2915_vm4, %v2900_v59, %v2859_v36 }
 0x703   :  { %4412 = vmatprep.mubr.msk.bf16.mxu1 %vm69_vm0, %v2917_v51 }
 0x704   :  { %4413 = vmatmul.mubr.msk.bf16.vlgmr.msra.gmra.mrb[56].mxu1 %vm69_vm0, %v2919_v54  ;;  %v2845_v46 = vpop.permute.xlu1 %2844  ;;  %v4892_v54 = vld [vmem:[%s7105_s0 + $0x28] sm:$0xff] }
 0x705   :  { %v2843_v11 = vpop.permute.xlu0 %2842  ;;  %v2910_v48 = vsel %vm2898_vm3, %v2891_v61, %v2845_v46 }
 0x706   :  { %v2908_v63 = vsel %vm2898_vm3, %v2888_v32, %v2843_v11 }
 0x714   :  { %v2865_v38 = vpop.permute.xlu1 %2864 }
 0x715   :  { %v2863_v24 = vpop.permute.xlu0 %2862  ;;  %v2923_v40 = vsel %vm2915_vm4, %v2906_v27, %v2865_v38 }
 0x716   :  { %v2921_v10 = vsel %vm2915_vm4, %v2904_v16, %v2863_v24 }
 0x717   :  { %4416 = vmatprep.mubr.msk.bf16.mxu1 %vm69_vm0, %v2921_v10 }
 0x718   :  { %4417 = vmatmul.mubr.msk.bf16.gmra.mrb[60].mxu1 %vm69_vm0, %v2923_v40  ;;  %v2825_v39 = vpop.permute.xlu1 %2824 }
 0x719   :  { %v2823_v3 = vpop.permute.xlu0 %2822  ;;  %v2897_v37 = vsel %vm552_vm1, %v2777_v35, %v2825_v39 }
 0x71a   :  { %v2894_v55 = vsel %vm552_vm1, %v2776_v33, %v2823_v3 }
 0x728   :  { %v2869_v20 = vpop.permute.xlu1 %2868 }
 0x729   :  { %v2867_v44 = vpop.permute.xlu0 %2866  ;;  %v2927_v17 = vsel %vm2915_vm4, %v2910_v48, %v2869_v20  ;;  %v4894_v20 = vld [vmem:[%s7105_s0 + $0x40] sm:$0xff]  ;;  %v4895_v48 = vld [vmem:[%s7105_s0 + $0x50] sm:$0xff] }
 0x72a   :  { %v2925_v58 = vsel %vm2915_vm4, %v2908_v63, %v2867_v44 }
 0x72b   :  { %4420 = vmatprep.mubr.msk.bf16.mxu1 %vm69_vm0, %v2925_v58 }
 0x72c   :  { %v2849_v25 = vpop.permute.xlu1 %2848  ;;  %4421 = vmatmul.mubr.msk.bf16.gmra.mrb[64].mxu1 %vm69_vm0, %v2927_v17  ;;  %v4896_v17 = vld [vmem:[%s7105_s0 + $0x48] sm:$0xff] }
 0x72d   :  { %v2847_v43 = vpop.permute.xlu0 %2846  ;;  %v2914_v7 = vsel %vm2898_vm3, %v2897_v37, %v2849_v25 }
 0x72e   :  { %v2912_v5 = vsel %vm2898_vm3, %v2894_v55, %v2847_v43  ;;  %v4897_v55 = vld [vmem:[%s7105_s0 + $0x58] sm:$0xff] }
 0x730   :  { %v2873_v22 = vpop.permute.xlu1 %2872 }
 0x731   :  { %v2871_v57 = vpop.permute.xlu0 %2870  ;;  %v2931_v45 = vsel %vm2915_vm4, %v2914_v7, %v2873_v22 }
 0x732   :  { %v2929_v21 = vsel %vm2915_vm4, %v2912_v5, %v2871_v57 }
 0x733   :  { %4424 = vmatprep.mubr.msk.bf16.mxu1 %vm69_vm0, %v2929_v21 }
 0x734   :  { %4425 = vmatmul.mubr.msk.bf16.gmra.mrb[68].mxu1 %vm69_vm0, %v2931_v45 }
 0x7d7   :  { %v4414_v53 = vpop.f32.mrb[56].mxu1 }
 0x7d8   :  { %v3002_v50 = vpop.f32.mrb[57].mxu1  ;;  %v3011_v35 = vadd.f32 %v4414_v53, %v6568_v52 }
 0x7d9   :  { %v3003_v13 = vadd.f32 %v6568_v52, %v3002_v50  ;;  %v4415_v33 = vpop.f32.mrb[58].mxu1 }
 0x7da   :  { %v3005_v26 = vpop.f32.mrb[59].mxu1  ;;  %v6581_v1 = vadd.f32 %v4887_v41, %v3011_v35  ;;  %v3014_v6 = vadd.f32 %v4415_v33, %v6568_v52  ;;  %v4898_v35 = vld [vmem:[%s7105_s0 + $0x60] sm:$0xff] }
 0x7db   :  { %v6575_v12 = vadd.f32 %v4886_v8, %v3003_v13  ;;  %v3006_v49 = vadd.f32 %v6568_v52, %v3005_v26 }
 0x7dc   :  { %v6596_v18 = vadd.f32 %v4889_v29, %v3014_v6  ;;  %v3087_v14 = vsel %vm69_vm0, %v6581_v1, 0.0  ;;  %v4900_v6 = vld [vmem:[%s7105_s0 + $0x68] sm:$0xff] }
 0x7dd   :  { %v6587_v28 = vadd.f32 %v4888_v60, %v3006_v49  ;;  %v3081_v2 = vsel %vm69_vm0, %v6575_v12, 0.0  ;;  %v4899_v49 = vld [vmem:[%s7105_s0 + $0x70] sm:$0xff] }
 0x7de   :  { %3082 = vadd.xlane.f32.xlu0 %v3081_v2  ;;  %v3090_v30 = vsel %vm69_vm0, %v6596_v18, 0.0 }
 0x7df   :  { %v3084_v9 = vsel %vm69_vm0, %v6587_v28, 0.0 }
 0x7e0   :  { %3085 = vadd.xlane.f32.xlu1 %v3084_v9 }
 0x7e2   :  { %3088 = vadd.xlane.f32.xlu0 %v3087_v14 }
 0x7e6   :  { %3091 = vadd.xlane.f32.xlu0 %v3090_v30 }
 0x7eb   :  { %v4418_v4 = vpop.f32.mrb[60].mxu1 }
 0x7ec   :  { %v3018_v23 = vpop.f32.mrb[61].mxu1  ;;  %v3027_v0 = vadd.f32 %v4418_v4, %v6568_v52 }
 0x7ed   :  { %v3019_v62 = vadd.f32 %v6568_v52, %v3018_v23  ;;  %v4419_v34 = vpop.f32.mrb[62].mxu1 }
 0x7ee   :  { %v3021_v31 = vpop.f32.mrb[63].mxu1  ;;  %v3030_v59 = vadd.f32 %v4419_v34, %v6568_v52  ;;  %v6614_v51 = vadd.f32 %v4891_v19, %v3027_v0 }
 0x7ef   :  { %v6607_v47 = vadd.f32 %v4890_v56, %v3019_v62  ;;  %v3022_v36 = vadd.f32 %v6568_v52, %v3021_v31 }
 0x7f0   :  { %v6626_v38 = vadd.f32 %v4893_v42, %v3030_v59  ;;  %v3099_v16 = vsel %vm69_vm0, %v6614_v51, 0.0 }
 0x7f1   :  { %v6619_v46 = vadd.f32 %v4892_v54, %v3022_v36  ;;  %v3093_v11 = vsel %vm69_vm0, %v6607_v47, 0.0 }
 0x7f2   :  { %3094 = vadd.xlane.f32.xlu0 %v3093_v11  ;;  %v3102_v24 = vsel %vm69_vm0, %v6626_v38, 0.0 }
 0x7f3   :  { %v3096_v15 = vsel %vm69_vm0, %v6619_v46, 0.0 }
 0x7f4   :  { %3097 = vadd.xlane.f32.xlu1 %v3096_v15 }
 0x7f6   :  { %3100 = vadd.xlane.f32.xlu0 %v3099_v16 }
 0x7f8   :  { %3103 = vadd.xlane.f32.xlu1 %v3102_v24 }
 0x7ff   :  { %v4422_v27 = vpop.f32.mrb[64].mxu1 }
 0x800   :  { %v3034_v10 = vpop.f32.mrb[65].mxu1  ;;  %v3043_v40 = vadd.f32 %v4422_v27, %v6568_v52 }
 0x801   :  { %v3035_v39 = vadd.f32 %v6568_v52, %v3034_v10  ;;  %v4423_v3 = vpop.f32.mrb[66].mxu1 }
 0x802   :  { %v3037_v32 = vpop.f32.mrb[67].mxu1  ;;  %v3046_v63 = vadd.f32 %v4423_v3, %v6568_v52  ;;  %v6646_v58 = vadd.f32 %v4895_v48, %v3043_v40 }
 0x803   :  { %v6639_v61 = vadd.f32 %v4894_v20, %v3035_v39  ;;  %v3038_v44 = vadd.f32 %v6568_v52, %v3037_v32 }
 0x804   :  { %v6658_v22 = vadd.f32 %v4897_v55, %v3046_v63  ;;  %v3111_v53 = vsel %vm69_vm0, %v6646_v58, 0.0 }
 0x805   :  { %v6651_v25 = vadd.f32 %v4896_v17, %v3038_v44  ;;  %v3105_v43 = vsel %vm69_vm0, %v6639_v61, 0.0 }
 0x806   :  { %3106 = vadd.xlane.f32.xlu0 %v3105_v43  ;;  %v3114_v8 = vsel %vm69_vm0, %v6658_v22, 0.0 }
 0x807   :  { %v4426_v37 = vpop.f32.mrb[68].mxu1  ;;  %v3108_v5 = vsel %vm69_vm0, %v6651_v25, 0.0 }
 0x808   :  { %3109 = vadd.xlane.f32.xlu1 %v3108_v5  ;;  %v3050_v57 = vpop.f32.mrb[69].mxu1  ;;  %v3059_v7 = vadd.f32 %v4426_v37, %v6568_v52 }
 0x809   :  { %v3051_v21 = vadd.f32 %v6568_v52, %v3050_v57  ;;  %v4427_v45 = vpop.f32.mrb[70].mxu1 }
 0x80a   :  { %3112 = vadd.xlane.f32.xlu0 %v3111_v53  ;;  %v3053_v50 = vpop.f32.mrb[71].mxu1  ;;  %v3062_v33 = vadd.f32 %v4427_v45, %v6568_v52  ;;  %v6678_v41 = vadd.f32 %v4899_v49, %v3059_v7 }
 0x80b   :  { %v6669_v13 = vadd.f32 %v4898_v35, %v3051_v21  ;;  %v3054_v26 = vadd.f32 %v6568_v52, %v3053_v50  ;;  %v4901_v52 = vld [vmem:[%s7105_s0 + $0x78] sm:$0xff] }
 0x80c   :  { %3115 = vadd.xlane.f32.xlu1 %v3114_v8  ;;  %v6690_v9 = vadd.f32 %v4901_v52, %v3062_v33  ;;  %v3123_v14 = vsel %vm69_vm0, %v6678_v41, 0.0 }
 0x80d   :  { %v6683_v60 = vadd.f32 %v4900_v6, %v3054_v26  ;;  %v3117_v2 = vsel %vm69_vm0, %v6669_v13, 0.0 }
 0x80e   :  { %3118 = vadd.xlane.f32.xlu0 %v3117_v2  ;;  %v3126_v30 = vsel %vm69_vm0, %v6690_v9, 0.0 }
 0x80f   :  { %v3120_v29 = vsel %vm69_vm0, %v6683_v60, 0.0 }
 0x810   :  { %3121 = vadd.xlane.f32.xlu1 %v3120_v29 }
 0x812   :  { %3124 = vadd.xlane.f32.xlu0 %v3123_v14 }
 0x814   :  { %3127 = vadd.xlane.f32.xlu1 %v3126_v30 }
 0x86b   :  { %v3083_v4 = vpop.xlane.xlu0 %3082 }
 0x86c   :  { %v3129_v23 = vmul.f32 0.03125, %v3083_v4 }
 0x86d   :  { %v3086_v0 = vpop.xlane.xlu1 %3085 }
 0x86e   :  { %v6699_v62 = vsub.f32 %v6575_v12, %v3129_v23  ;;  %v3130_v34 = vmul.f32 0.03125, %v3086_v0 }
 0x86f   :  { %v3089_v31 = vpop.xlane.xlu0 %3088 }
 0x870   :  { %v6702_v56 = vsub.f32 %v6587_v28, %v3130_v34  ;;  %v3131_v59 = vmul.f32 0.03125, %v3089_v31  ;;  %v3161_v36 = vmul.f32 %v6699_v62, %v6699_v62 }
 0x872   :  { %v6707_v19 = vsub.f32 %v6581_v1, %v3131_v59  ;;  %v3177_v54 = vsel %vm69_vm0, %v3161_v36, 0.0  ;;  %v3162_v11 = vmul.f32 %v6702_v56, %v6702_v56 }
 0x873   :  { %3178 = vadd.xlane.f32.xlu0 %v3177_v54  ;;  %v3092_v42 = vpop.xlane.xlu0 %3091  ;;  %v4524_v54 = vld [vmem:[%s7110_s4] sm:$0xff]  }
 0x874   :  { %v3132_v15 = vmul.f32 0.03125, %v3092_v42  ;;  %v3180_v16 = vsel %vm69_vm0, %v3162_v11, 0.0  ;;  %v3163_v24 = vmul.f32 %v6707_v19, %v6707_v19  ;;  %4428 = vmatprep.subr.bf16.mxu0 %v4524_v54 }
 0x875   :  { %3181 = vadd.xlane.f32.xlu1 %v3180_v16  ;;  %4429 = vmatpush3.bf16.msra.mxu0 %v4524_v54 }
 0x876   :  { %v6716_v27 = vsub.f32 %v6596_v18, %v3132_v15  ;;  %v3183_v10 = vsel %vm69_vm0, %v3163_v24, 0.0 }
 0x877   :  { %3184 = vadd.xlane.f32.xlu0 %v3183_v10 }
 0x878   :  { %v3164_v40 = vmul.f32 %v6716_v27, %v6716_v27 }
 0x87a   :  { %v3186_v39 = vsel %vm69_vm0, %v3164_v40, 0.0 }
 0x87b   :  { %3187 = vadd.xlane.f32.xlu1 %v3186_v39 }
 0x87f   :  { %v3095_v3 = vpop.xlane.xlu0 %3094 }
 0x880   :  { %v3133_v32 = vmul.f32 0.03125, %v3095_v3 }
 0x881   :  { %v3098_v20 = vpop.xlane.xlu1 %3097 }
 0x882   :  { %v6723_v63 = vsub.f32 %v6607_v47, %v3133_v32  ;;  %v3134_v44 = vmul.f32 0.03125, %v3098_v20  ;;  %v4525_v20 = vld [vmem:[%s7110_s4 + $0x8] sm:$0xff]  }
 0x883   :  { %v3101_v48 = vpop.xlane.xlu0 %3100  ;;  %4430 = vmatprep.subr.bf16.mxu0 %v4525_v20 }
 0x884   :  { %v6726_v17 = vsub.f32 %v6619_v46, %v3134_v44  ;;  %v3135_v43 = vmul.f32 0.03125, %v3101_v48  ;;  %v3165_v55 = vmul.f32 %v6723_v63, %v6723_v63  ;;  %4431 = vmatpush3.bf16.msra.mxu0 %v4525_v20 }
 0x885   :  { %v3104_v37 = vpop.xlane.xlu1 %3103 }
 0x886   :  { %v6731_v5 = vsub.f32 %v6614_v51, %v3135_v43  ;;  %v3136_v57 = vmul.f32 0.03125, %v3104_v37  ;;  %v3189_v7 = vsel %vm69_vm0, %v3165_v55, 0.0  ;;  %v3166_v21 = vmul.f32 %v6726_v17, %v6726_v17 }
 0x887   :  { %3190 = vadd.xlane.f32.xlu0 %v3189_v7 }
 0x888   :  { %v6737_v45 = vsub.f32 %v6626_v38, %v3136_v57  ;;  %v3192_v53 = vsel %vm69_vm0, %v3166_v21, 0.0  ;;  %v3167_v50 = vmul.f32 %v6731_v5, %v6731_v5 }
 0x889   :  { %3193 = vadd.xlane.f32.xlu1 %v3192_v53 }
 0x88a   :  { %v3195_v35 = vsel %vm69_vm0, %v3167_v50, 0.0  ;;  %v3168_v33 = vmul.f32 %v6737_v45, %v6737_v45 }
 0x88b   :  { %3196 = vadd.xlane.f32.xlu0 %v3195_v35 }
 0x88c   :  { %v3198_v26 = vsel %vm69_vm0, %v3168_v33, 0.0 }
 0x88d   :  { %3199 = vadd.xlane.f32.xlu1 %v3198_v26 }
 0x893   :  { %v3107_v8 = vpop.xlane.xlu0 %3106 }
 0x894   :  { %v3137_v49 = vmul.f32 0.03125, %v3107_v8 }
 0x895   :  { %v3110_v6 = vpop.xlane.xlu1 %3109 }
 0x896   :  { %v6747_v2 = vsub.f32 %v6639_v61, %v3137_v49  ;;  %v3138_v52 = vmul.f32 0.03125, %v3110_v6 }
 0x897   :  { %v3113_v29 = vpop.xlane.xlu0 %3112 }
 0x898   :  { %v6750_v14 = vsub.f32 %v6651_v25, %v3138_v52  ;;  %v3139_v30 = vmul.f32 0.03125, %v3113_v29  ;;  %v3169_v4 = vmul.f32 %v6747_v2, %v6747_v2 }
 0x899   :  { %v3116_v23 = vpop.xlane.xlu1 %3115 }
 0x89a   :  { %v6755_v0 = vsub.f32 %v6646_v58, %v3139_v30  ;;  %v3140_v34 = vmul.f32 0.03125, %v3116_v23  ;;  %v3201_v31 = vsel %vm69_vm0, %v3169_v4, 0.0  ;;  %v3170_v59 = vmul.f32 %v6750_v14, %v6750_v14 }
 0x89b   :  { %3202 = vadd.xlane.f32.xlu0 %v3201_v31  ;;  %v3119_v36 = vpop.xlane.xlu0 %3118 }
 0x89c   :  { %v6764_v11 = vsub.f32 %v6658_v22, %v3140_v34  ;;  %v3141_v42 = vmul.f32 0.03125, %v3119_v36  ;;  %v3204_v15 = vsel %vm69_vm0, %v3170_v59, 0.0  ;;  %v3171_v16 = vmul.f32 %v6755_v0, %v6755_v0 }
 0x89d   :  { %v3122_v24 = vpop.xlane.xlu1 %3121  ;;  %3205 = vadd.xlane.f32.xlu1 %v3204_v15 }
 0x89e   :  { %v6770_v10 = vsub.f32 %v6669_v13, %v3141_v42  ;;  %v3142_v40 = vmul.f32 0.03125, %v3122_v24  ;;  %v3207_v39 = vsel %vm69_vm0, %v3171_v16, 0.0  ;;  %v3172_v3 = vmul.f32 %v6764_v11, %v6764_v11  ;;  %v6803_v16 = vld [vmem:[%s7107_s6 + $0x2] ss:$0 sm:$0xff] }
 0x89f   :  { %3208 = vadd.xlane.f32.xlu0 %v3207_v39  ;;  %v3125_v32 = vpop.xlane.xlu0 %3124  ;;  %v6809_v39 = vld [vmem:[%s7107_s6 + $0x3] ss:$0 sm:$0xff] }
 0x8a0   :  { %v6779_v44 = vsub.f32 %v6683_v60, %v3142_v40  ;;  %v3143_v48 = vmul.f32 0.03125, %v3125_v32  ;;  %v3210_v43 = vsel %vm69_vm0, %v3172_v3, 0.0  ;;  %v3173_v55 = vmul.f32 %v6770_v10, %v6770_v10 }
 0x8a1   :  { %v3128_v37 = vpop.xlane.xlu1 %3127  ;;  %3211 = vadd.xlane.f32.xlu1 %v3210_v43 }
 0x8a2   :  { %v6785_v57 = vsub.f32 %v6678_v41, %v3143_v48  ;;  %v3144_v7 = vmul.f32 0.03125, %v3128_v37  ;;  %v3213_v21 = vsel %vm69_vm0, %v3173_v55, 0.0  ;;  %v3174_v53 = vmul.f32 %v6779_v44, %v6779_v44 }
 0x8a3   :  { %3214 = vadd.xlane.f32.xlu0 %v3213_v21 }
 0x8a4   :  { %v6791_v50 = vsub.f32 %v6690_v9, %v3144_v7  ;;  %v3216_v35 = vsel %vm69_vm0, %v3174_v53, 0.0  ;;  %v3175_v33 = vmul.f32 %v6785_v57, %v6785_v57 }
 0x8a5   :  { %3217 = vadd.xlane.f32.xlu1 %v3216_v35 }
 0x8a6   :  { %v3219_v26 = vsel %vm69_vm0, %v3175_v33, 0.0  ;;  %v3176_v8 = vmul.f32 %v6791_v50, %v6791_v50 }
 0x8a7   :  { %3220 = vadd.xlane.f32.xlu0 %v3219_v26 }
 0x8a8   :  { %v3222_v49 = vsel %vm69_vm0, %v3176_v8, 0.0 }
 0x8a9   :  { %3223 = vadd.xlane.f32.xlu1 %v3222_v49 }
 0x900   :  { %v3179_v6 = vpop.xlane.xlu0 %3178 }
 0x901   :  { %v3225_v52 = vmul.f32 0.03125, %v3179_v6  ;;  %v4903_v6 = vld [vmem:[%s7108_s1 + $0x8] sm:$0xff] }
 0x902   :  { %v3182_v29 = vpop.xlane.xlu1 %3181 }
 0x903   :  { %v3241_v30 = vadd.f32 1e-05, %v3225_v52  ;;  %v3226_v4 = vmul.f32 0.03125, %v3182_v29 }
 0x904   :  { %v3185_v23 = vpop.xlane.xlu0 %3184 }
 0x905   :  { %4822 = vrsqrt.f32 %v3241_v30  ;;  %v3242_v34 = vadd.f32 1e-05, %v3226_v4  ;;  %v3227_v31 = vmul.f32 0.03125, %v3185_v23 }
 0x907   :  { %4824 = vrsqrt.f32 %v3242_v34  ;;  %v3243_v59 = vadd.f32 1e-05, %v3227_v31 }
 0x908   :  { %v3188_v36 = vpop.xlane.xlu1 %3187 }
 0x909   :  { %4826 = vrsqrt.f32 %v3243_v59  ;;  %v3228_v54 = vmul.f32 0.03125, %v3188_v36 }
 0x90b   :  { %v3244_v42 = vadd.f32 1e-05, %v3228_v54 }
 0x90d   :  { %4828 = vrsqrt.f32 %v3244_v42  ;;  %v4904_v42 = vld [vmem:[%s7108_s1 + $0x10] sm:$0xff] }
 0x90f   :  { %v4823_v15 = vpop.eup %4822 }
 0x910   :  { %v3273_v24 = vmul.f32 %v4823_v15, %v6699_v62 }
 0x911   :  { %v4825_v40 = vpop.eup %4824 }
 0x912   :  { %v3274_v3 = vmul.f32 %v4825_v40, %v6702_v56  ;;  %v3293_v32 = vmul.f32 %v6803_v16, %v3273_v24  ;;  %v4905_v24 = vld [vmem:[%s7108_s1 + $0x18] sm:$0xff] }
 0x913   :  { %v4827_v20 = vpop.eup %4826 }
 0x914   :  { %v3275_v48 = vmul.f32 %v4827_v20, %v6707_v19  ;;  %v3191_v43 = vpop.xlane.xlu0 %3190  ;;  %v3294_v55 = vmul.f32 %v6803_v16, %v3274_v3  ;;  %v3313_v37 = vadd.f32 %v6809_v39, %v3293_v32  ;;  %v4902_v19 = vld [vmem:[%s7108_s1] sm:$0xff] }
 0x915   :  { %v3229_v7 = vmul.f32 0.03125, %v3191_v43 }
 0x916   :  { %v3295_v62 = vmul.f32 %v6803_v16, %v3275_v48  ;;  %v3194_v21 = vpop.xlane.xlu1 %3193  ;;  %v3314_v53 = vadd.f32 %v6809_v39, %v3294_v55  ;;  %v3329_v49 = vmul.f32 %v4902_v19, %v3313_v37 }
 0x917   :  { %v4829_v35 = vpop.eup %4828  ;;  %v3245_v33 = vadd.f32 1e-05, %v3229_v7  ;;  %v3230_v26 = vmul.f32 0.03125, %v3194_v21 }
 0x918   :  { %v3276_v56 = vmul.f32 %v4829_v35, %v6716_v27  ;;  %v3197_v8 = vpop.xlane.xlu0 %3196  ;;  %v3330_v52 = vmul.f32 %v4903_v6, %v3314_v53  ;;  %v3315_v4 = vadd.f32 %v6809_v39, %v3295_v62 }
 0x919   :  { %4830 = vrsqrt.f32 %v3245_v33  ;;  %v3246_v29 = vadd.f32 1e-05, %v3230_v26  ;;  %v3231_v30 = vmul.f32 0.03125, %v3197_v8 }
 0x91a   :  { %v3296_v23 = vmul.f32 %v6803_v16, %v3276_v56  ;;  %v3200_v34 = vpop.xlane.xlu1 %3199  ;;  %v3345_v27 = vpack.c.bf16 %v3330_v52, %v3329_v49  ;;  %v3331_v15 = vmul.f32 %v4904_v42, %v3315_v4  ;;  %v4907_v52 = vld [vmem:[%s7108_s1 + $0x28] sm:$0xff]  ;;  %v4908_v42 = vld [vmem:[%s7108_s1 + $0x30] sm:$0xff] }
 0x91b   :  { %4832 = vrsqrt.f32 %v3246_v29  ;;  %v3247_v31 = vadd.f32 1e-05, %v3231_v30  ;;  %v3232_v59 = vmul.f32 0.03125, %v3200_v34 }
 0x91c   :  { %v3316_v36 = vadd.f32 %v6809_v39, %v3296_v23  ;;  %4432 = vmatprep.mubr.msk.bf16.mxu0 %vm69_vm0, %v3345_v27 }
 0x91d   :  { %4834 = vrsqrt.f32 %v3247_v31  ;;  %v3248_v54 = vadd.f32 1e-05, %v3232_v59 }
 0x91e   :  { %v3332_v40 = vmul.f32 %v4905_v24, %v3316_v36  ;;  %v4909_v24 = vld [vmem:[%s7108_s1 + $0x38] sm:$0xff] }
 0x91f   :  { %4836 = vrsqrt.f32 %v3248_v54 }
 0x920   :  { %v3346_v3 = vpack.c.bf16 %v3332_v40, %v3331_v15 }
 0x922   :  { %4433 = vmatmul.mubr.msk.bf16.vlgmr.msra.gmra.mrb[88].mxu0 %vm69_vm0, %v3346_v3 }
 0x923   :  { %v4831_v32 = vpop.eup %4830 }
 0x924   :  { %v3277_v20 = vmul.f32 %v4831_v32, %v6723_v63 }
 0x925   :  { %v4833_v48 = vpop.eup %4832 }
 0x926   :  { %v3278_v43 = vmul.f32 %v4833_v48, %v6726_v17  ;;  %v3297_v55 = vmul.f32 %v6803_v16, %v3277_v20 }
 0x927   :  { %v4835_v37 = vpop.eup %4834 }
 0x928   :  { %v3279_v7 = vmul.f32 %v4835_v37, %v6731_v5  ;;  %v3203_v62 = vpop.xlane.xlu0 %3202  ;;  %v3298_v21 = vmul.f32 %v6803_v16, %v3278_v43  ;;  %v3317_v53 = vadd.f32 %v6809_v39, %v3297_v55  ;;  %v4906_v5 = vld [vmem:[%s7108_s1 + $0x20] sm:$0xff] }
 0x929   :  { %v4837_v35 = vpop.eup %4836  ;;  %v3233_v33 = vmul.f32 0.03125, %v3203_v62 }
 0x92a   :  { %v3280_v26 = vmul.f32 %v4837_v35, %v6737_v45  ;;  %v3206_v56 = vpop.xlane.xlu1 %3205  ;;  %v3318_v63 = vadd.f32 %v6809_v39, %v3298_v21  ;;  %v3299_v8 = vmul.f32 %v6803_v16, %v3279_v7  ;;  %v3333_v6 = vmul.f32 %v4906_v5, %v3317_v53 }
 0x92b   :  { %v3249_v17 = vadd.f32 1e-05, %v3233_v33  ;;  %v3234_v19 = vmul.f32 0.03125, %v3206_v56 }
 0x92c   :  { %v3209_v49 = vpop.xlane.xlu0 %3208  ;;  %v3334_v29 = vmul.f32 %v4907_v52, %v3318_v63  ;;  %v3300_v45 = vmul.f32 %v6803_v16, %v3280_v26  ;;  %v3319_v30 = vadd.f32 %v6809_v39, %v3299_v8 }
 0x92d   :  { %4838 = vrsqrt.f32 %v3249_v17  ;;  %v3250_v4 = vadd.f32 1e-05, %v3234_v19  ;;  %v3235_v23 = vmul.f32 0.03125, %v3209_v49 }
 0x92e   :  { %v3212_v34 = vpop.xlane.xlu1 %3211  ;;  %v3347_v27 = vpack.c.bf16 %v3334_v29, %v3333_v6  ;;  %v3320_v31 = vadd.f32 %v6809_v39, %v3300_v45  ;;  %v3335_v15 = vmul.f32 %v4908_v42, %v3319_v30 }
 0x92f   :  { %4840 = vrsqrt.f32 %v3250_v4  ;;  %v3251_v59 = vadd.f32 1e-05, %v3235_v23  ;;  %v3236_v36 = vmul.f32 0.03125, %v3212_v34 }
 0x930   :  { %4436 = vmatprep.mubr.msk.bf16.mxu0 %vm69_vm0, %v3347_v27  ;;  %v3215_v54 = vpop.xlane.xlu0 %3214  ;;  %v3336_v40 = vmul.f32 %v4909_v24, %v3320_v31  ;;  %v4912_v24 = vld [vmem:[%s7108_s1 + $0x50] sm:$0xff] }
 0x931   :  { %4842 = vrsqrt.f32 %v3251_v59  ;;  %v3252_v3 = vadd.f32 1e-05, %v3236_v36  ;;  %v3237_v32 = vmul.f32 0.03125, %v3215_v54 }
 0x932   :  { %v3218_v20 = vpop.xlane.xlu1 %3217  ;;  %v3348_v48 = vpack.c.bf16 %v3336_v40, %v3335_v15 }
 0x933   :  { %4844 = vrsqrt.f32 %v3252_v3  ;;  %v3253_v43 = vadd.f32 1e-05, %v3237_v32  ;;  %v3238_v55 = vmul.f32 0.03125, %v3218_v20  ;;  %v4913_v3 = vld [vmem:[%s7108_s1 + $0x58] sm:$0xff] }
 0x934   :  { %4437 = vmatmul.mubr.msk.bf16.gmra.mrb[92].mxu0 %vm69_vm0, %v3348_v48  ;;  %v3221_v37 = vpop.xlane.xlu0 %3220 }
 0x935   :  { %4846 = vrsqrt.f32 %v3253_v43  ;;  %v3254_v7 = vadd.f32 1e-05, %v3238_v55  ;;  %v3239_v62 = vmul.f32 0.03125, %v3221_v37 }
 0x936   :  { %v3224_v21 = vpop.xlane.xlu1 %3223 }
 0x937   :  { %v4839_v53 = vpop.eup %4838  ;;  %4848 = vrsqrt.f32 %v3254_v7  ;;  %v3255_v35 = vadd.f32 1e-05, %v3239_v62  ;;  %v3240_v33 = vmul.f32 0.03125, %v3224_v21  ;;  %v4914_v7 = vld [vmem:[%s7108_s1 + $0x60] sm:$0xff]  ;;  %v4915_v21 = vld [vmem:[%s7108_s1 + $0x68] sm:$0xff] }
 0x938   :  { %v3281_v26 = vmul.f32 %v4839_v53, %v6747_v2 }
 0x939   :  { %v4841_v56 = vpop.eup %4840  ;;  %4850 = vrsqrt.f32 %v3255_v35  ;;  %v3256_v63 = vadd.f32 1e-05, %v3240_v33 }
 0x93a   :  { %v3282_v8 = vmul.f32 %v4841_v56, %v6750_v14  ;;  %v3301_v17 = vmul.f32 %v6803_v16, %v3281_v26  ;;  %v4910_v14 = vld [vmem:[%s7108_s1 + $0x40] sm:$0xff]  ;;  %v4916_v56 = vld [vmem:[%s7108_s1 + $0x70] sm:$0xff] }
 0x93b   :  { %v4843_v19 = vpop.eup %4842  ;;  %4852 = vrsqrt.f32 %v3256_v63 }
 0x93c   :  { %v3283_v49 = vmul.f32 %v4843_v19, %v6755_v0  ;;  %v3302_v5 = vmul.f32 %v6803_v16, %v3282_v8  ;;  %v3321_v6 = vadd.f32 %v6809_v39, %v3301_v17  ;;  %v4911_v0 = vld [vmem:[%s7108_s1 + $0x48] sm:$0xff]  ;;  %v4917_v8 = vld [vmem:[%s7108_s1 + $0x78] sm:$0xff] }
 0x93d   :  { %v4845_v52 = vpop.eup %4844 }
 0x93e   :  { %v3284_v29 = vmul.f32 %v4845_v52, %v6764_v11  ;;  %v3322_v2 = vadd.f32 %v6809_v39, %v3302_v5  ;;  %v3303_v45 = vmul.f32 %v6803_v16, %v3283_v49  ;;  %v3337_v4 = vmul.f32 %v4910_v14, %v3321_v6  ;;  %v4528_v49 = vld [vmem:[%s7111_s5 + $0x10] sm:$0xff]   ;;  %v4529_v5 = vld [vmem:[%s7111_s5 + $0x18] sm:$0xff]   ;;  %v4530_v6 = vld [vmem:[%s7111_s5 + $0x20] sm:$0xff]  }
 0x93f   :  { %v4847_v30 = vpop.eup %4846  ;;  %v4531_v52 = vld [vmem:[%s7111_s5 + $0x28] sm:$0xff]  }
 0x940   :  { %v3285_v23 = vmul.f32 %v4847_v30, %v6770_v10  ;;  %v3338_v34 = vmul.f32 %v4911_v0, %v3322_v2  ;;  %v3304_v27 = vmul.f32 %v6803_v16, %v3284_v29  ;;  %v3323_v11 = vadd.f32 %v6809_v39, %v3303_v45  ;;  %v4532_v29 = vld [vmem:[%s7111_s5 + $0x30] sm:$0xff]   ;;  %v4533_v2 = vld [vmem:[%s7111_s5 + $0x38] sm:$0xff]   ;;  %v6941_v45 = vld [vmem:[%s7112_s7] ss:$0 sm:$0xff] }
 0x941   :  { %v4849_v31 = vpop.eup %4848 }
 0x942   :  { %v3286_v59 = vmul.f32 %v4849_v31, %v6779_v44  ;;  %v3349_v36 = vpack.c.bf16 %v3338_v34, %v3337_v4  ;;  %v3324_v54 = vadd.f32 %v6809_v39, %v3304_v27  ;;  %v3305_v15 = vmul.f32 %v6803_v16, %v3285_v23 }
 0x943   :  { %v4851_v42 = vpop.eup %4850  ;;  %v3339_v40 = vmul.f32 %v4912_v24, %v3323_v11 }
 0x944   :  { %v3287_v10 = vmul.f32 %v4851_v42, %v6785_v57  ;;  %4440 = vmatprep.mubr.msk.bf16.mxu0 %vm69_vm0, %v3349_v36  ;;  %v3340_v44 = vmul.f32 %v4913_v3, %v3324_v54  ;;  %v3306_v32 = vmul.f32 %v6803_v16, %v3286_v59  ;;  %v3325_v48 = vadd.f32 %v6809_v39, %v3305_v15 }
 0x945   :  { %v4853_v20 = vpop.eup %4852 }
 0x946   :  { %v3288_v43 = vmul.f32 %v4853_v20, %v6791_v50  ;;  %v3350_v57 = vpack.c.bf16 %v3340_v44, %v3339_v40  ;;  %v3326_v55 = vadd.f32 %v6809_v39, %v3306_v32  ;;  %v3307_v37 = vmul.f32 %v6803_v16, %v3287_v10 }
 0x947   :  { %v3341_v62 = vmul.f32 %v4914_v7, %v3325_v48 }
 0x948   :  { %4441 = vmatmul.mubr.msk.bf16.gmra.mrb[96].mxu0 %vm69_vm0, %v3350_v57  ;;  %v3342_v53 = vmul.f32 %v4915_v21, %v3326_v55  ;;  %v3308_v35 = vmul.f32 %v6803_v16, %v3288_v43  ;;  %v3327_v50 = vadd.f32 %v6809_v39, %v3307_v37  ;;  %v4526_v16 = vld [vmem:[%s7111_s5] sm:$0xff]  }
 0x949   :  { %4448 = vmatprep.subr.bf16.mxu1 %v4526_v16 }
 0x94a   :  { %v3351_v33 = vpack.c.bf16 %v3342_v53, %v3341_v62  ;;  %v3328_v26 = vadd.f32 %v6809_v39, %v3308_v35  ;;  %v3343_v63 = vmul.f32 %v4916_v56, %v3327_v50  ;;  %4449 = vmatpush3.bf16.msra.mxu1 %v4526_v16  ;;  %v4527_v39 = vld [vmem:[%s7111_s5 + $0x8] sm:$0xff]  }
 0x94b   :  { %4450 = vmatprep.subr.bf16.mxu1 %v4527_v39 }
 0x94c   :  { %4444 = vmatprep.mubr.msk.bf16.mxu0 %vm69_vm0, %v3351_v33  ;;  %v3344_v17 = vmul.f32 %v4917_v8, %v3328_v26 }
 0x94e   :  { %v3352_v19 = vpack.c.bf16 %v3344_v17, %v3343_v63  ;;  %4451 = vmatpush3.bf16.msra.mxu1 %v4527_v39 }
 0x94f   :  { %4452 = vmatprep.subr.bf16.mxu1 %v4528_v49 }
 0x950   :  { %4445 = vmatmul.mubr.msk.bf16.gmra.mrb[100].mxu0 %vm69_vm0, %v3352_v19 }
 0x952   :  { %4453 = vmatpush3.bf16.msra.mxu1 %v4528_v49 }
 0x953   :  { %4454 = vmatprep.subr.bf16.mxu1 %v4529_v5 }
 0x956   :  { %4455 = vmatpush3.bf16.msra.mxu1 %v4529_v5 }
 0x957   :  { %4456 = vmatprep.subr.bf16.mxu1 %v4530_v6 }
 0x95a   :  { %4457 = vmatpush3.bf16.msra.mxu1 %v4530_v6 }
 0x95b   :  { %4458 = vmatprep.subr.bf16.mxu1 %v4531_v52 }
 0x95e   :  { %4459 = vmatpush3.bf16.msra.mxu1 %v4531_v52 }
 0x95f   :  { %4460 = vmatprep.subr.bf16.mxu1 %v4532_v29 }
 0x962   :  { %4461 = vmatpush3.bf16.msra.mxu1 %v4532_v29 }
 0x963   :  { %4462 = vmatprep.subr.bf16.mxu1 %v4533_v2 }
 0x966   :  { %4463 = vmatpush3.bf16.msra.mxu1 %v4533_v2 }
 0x9f5   :  { %v4434_v30 = vpop.f32.mrb[88].mxu0 }
 0x9f6   :  { %v3442_v14 = vadd.f32 %v4434_v30, %v6941_v45  ;;  %v3433_v4 = vpop.f32.mrb[89].mxu0 }
 0x9f7   :  { %v3434_v23 = vadd.f32 %v6941_v45, %v3433_v4  ;;  %v4435_v0 = vpop.f32.mrb[90].mxu0 }
 0x9f8   :  { %v3514_v34 = vmul.f32 %v3442_v14, %v3442_v14  ;;  %v3445_v27 = vadd.f32 %v4435_v0, %v6941_v45  ;;  %v3436_v11 = vpop.f32.mrb[91].mxu0  ;;  %v3498_v5 = vmul.f32 0.5, %v3442_v14 }
 0x9f9   :  { %v3512_v31 = vmul.f32 %v3434_v23, %v3434_v23  ;;  %v3437_v59 = vadd.f32 %v6941_v45, %v3436_v11  ;;  %v3496_v0 = vmul.f32 0.5, %v3434_v23 }
 0x9fa   :  { %v3530_v36 = vmul.f32 %v3514_v34, %v3442_v14  ;;  %v3515_v54 = vmul.f32 %v3445_v27, %v3445_v27 }
 0x9fb   :  { %v3528_v42 = vmul.f32 %v3512_v31, %v3434_v23  ;;  %v3513_v15 = vmul.f32 %v3437_v59, %v3437_v59  ;;  %v3499_v31 = vmul.f32 0.5, %v3445_v27 }
 0x9fc   :  { %v3546_v10 = vmul.f32 0.044715, %v3530_v36  ;;  %v3531_v24 = vmul.f32 %v3515_v54, %v3445_v27 }
 0x9fd   :  { %v3544_v40 = vmul.f32 0.044715, %v3528_v42  ;;  %v3529_v3 = vmul.f32 %v3513_v15, %v3437_v59 }
 0x9fe   :  { %v3562_v44 = vadd.f32 %v3546_v10, %v3442_v14  ;;  %v3547_v32 = vmul.f32 0.044715, %v3531_v24  ;;  %v3497_v14 = vmul.f32 0.5, %v3437_v59 }
 0x9ff   :  { %v3560_v20 = vadd.f32 %v3544_v40, %v3434_v23  ;;  %v3545_v48 = vmul.f32 0.044715, %v3529_v3 }
 0xa00   :  { %v3578_v43 = vmul.f32 0.7978846, %v3562_v44  ;;  %v3563_v57 = vadd.f32 %v3547_v32, %v3445_v27 }
 0xa01   :  { %v3576_v55 = vmul.f32 0.7978846, %v3560_v20  ;;  %v3561_v37 = vadd.f32 %v3545_v48, %v3437_v59 }
 0xa02   :  { %4854 = vtanh.f32 %v3578_v43  ;;  %v3579_v7 = vmul.f32 0.7978846, %v3563_v57 }
 0xa03   :  { %4856 = vtanh.f32 %v3576_v55  ;;  %v3577_v62 = vmul.f32 0.7978846, %v3561_v37 }
 0xa04   :  { %4858 = vtanh.f32 %v3579_v7 }
 0xa05   :  { %4860 = vtanh.f32 %v3577_v62 }
 0xa07   :  { %v4438_v21 = vpop.f32.mrb[92].mxu0 }
 0xa08   :  { %v3458_v53 = vadd.f32 %v4438_v21, %v6941_v45  ;;  %v3449_v35 = vpop.f32.mrb[93].mxu0 }
 0xa09   :  { %v3450_v50 = vadd.f32 %v6941_v45, %v3449_v35  ;;  %v4439_v33 = vpop.f32.mrb[94].mxu0 }
 0xa0a   :  { %v3518_v26 = vmul.f32 %v3458_v53, %v3458_v53  ;;  %v6950_v56 = vadd.f32 %v4439_v33, %v6941_v45  ;;  %v3452_v63 = vpop.f32.mrb[95].mxu0 }
 0xa0b   :  { %v3516_v8 = vmul.f32 %v3450_v50, %v3450_v50  ;;  %v6953_v17 = vadd.f32 %v6941_v45, %v3452_v63 }
 0xa0c   :  { %v4855_v19 = vpop.eup %4854  ;;  %v3534_v16 = vmul.f32 %v3518_v26, %v3458_v53  ;;  %v3519_v39 = vmul.f32 %v6950_v56, %v6950_v56 }
 0xa0d   :  { %v4857_v49 = vpop.eup %4856  ;;  %v3610_v6 = vadd.f32 1.0, %v4855_v19  ;;  %v3532_v52 = vmul.f32 %v3516_v8, %v3450_v50  ;;  %v3517_v29 = vmul.f32 %v6953_v17, %v6953_v17 }
 0xa0e   :  { %v4859_v2 = vpop.eup %4858  ;;  %v3550_v30 = vmul.f32 0.044715, %v3534_v16  ;;  %v3535_v4 = vmul.f32 %v3519_v39, %v6950_v56  ;;  %v3608_v34 = vadd.f32 1.0, %v4857_v49  ;;  %v3502_v39 = vmul.f32 0.5, %v3458_v53 }
 0xa0f   :  { %v4861_v11 = vpop.eup %4860  ;;  %v3611_v36 = vadd.f32 1.0, %v4859_v2  ;;  %v3548_v54 = vmul.f32 0.044715, %v3532_v52  ;;  %v3533_v42 = vmul.f32 %v3517_v29, %v6953_v17  ;;  %v3626_v40 = vmul.f32 %v3610_v6, %v3498_v5 }
 0xa10   :  { %v3566_v15 = vadd.f32 %v3550_v30, %v3458_v53  ;;  %v3551_v10 = vmul.f32 0.044715, %v3535_v4  ;;  %v3609_v24 = vadd.f32 1.0, %v4861_v11  ;;  %v3624_v43 = vmul.f32 %v3608_v34, %v3496_v0 }
 0xa11   :  { %v3627_v3 = vmul.f32 %v3611_v36, %v3499_v31  ;;  %v3564_v44 = vadd.f32 %v3548_v54, %v3450_v50  ;;  %v3549_v32 = vmul.f32 0.044715, %v3533_v42  ;;  %v3500_v52 = vmul.f32 0.5, %v3450_v50 }
 0xa12   :  { %v3582_v20 = vmul.f32 0.7978846, %v3566_v15  ;;  %v3567_v48 = vadd.f32 %v3551_v10, %v6950_v56  ;;  %v3625_v23 = vmul.f32 %v3609_v24, %v3497_v14  ;;  %v3503_v34 = vmul.f32 0.5, %v6950_v56 }
 0xa13   :  { %v3580_v57 = vmul.f32 0.7978846, %v3564_v44  ;;  %v3565_v27 = vadd.f32 %v3549_v32, %v6953_v17  ;;  %v3641_v55 = vpack.c.bf16 %v3627_v3, %v3626_v40  ;;  %v3501_v36 = vmul.f32 0.5, %v6953_v17 }
 0xa14   :  { %4862 = vtanh.f32 %v3582_v20  ;;  %v3583_v37 = vmul.f32 0.7978846, %v3567_v48  ;;  %v3640_v7 = vpack.c.bf16 %v3625_v23, %v3624_v43 }
 0xa15   :  { %4864 = vtanh.f32 %v3580_v57  ;;  %v3581_v62 = vmul.f32 0.7978846, %v3565_v27 }
 0xa16   :  { %4866 = vtanh.f32 %v3583_v37  ;;  %4464 = vmatprep.mubr.bf16.mxu1 %v3640_v7 }
 0xa17   :  { %4868 = vtanh.f32 %v3581_v62  ;;  %4465 = vmatmul.mubr.bf16.vlgmr.msra.gmra.mrb[72].mxu1 %v3641_v55 }
 0xa1b   :  { %v4442_v59 = vpop.f32.mrb[96].mxu0 }
 0xa1c   :  { %v6964_v21 = vadd.f32 %v4442_v59, %v6941_v45  ;;  %v3465_v35 = vpop.f32.mrb[97].mxu0 }
 0xa1d   :  { %v6967_v33 = vadd.f32 %v6941_v45, %v3465_v35  ;;  %v4443_v26 = vpop.f32.mrb[98].mxu0 }
 0xa1e   :  { %v4863_v63 = vpop.eup %4862  ;;  %v3522_v8 = vmul.f32 %v6964_v21, %v6964_v21  ;;  %v6972_v19 = vadd.f32 %v4443_v26, %v6941_v45  ;;  %v3468_v16 = vpop.f32.mrb[99].mxu0 }
 0xa1f   :  { %v4865_v49 = vpop.eup %4864  ;;  %v3520_v5 = vmul.f32 %v6967_v33, %v6967_v33  ;;  %v6977_v6 = vadd.f32 %v6941_v45, %v3468_v16  ;;  %v3614_v29 = vadd.f32 1.0, %v4863_v63 }
 0xa20   :  { %v4867_v2 = vpop.eup %4866  ;;  %v3538_v30 = vmul.f32 %v3522_v8, %v6964_v21  ;;  %v3523_v4 = vmul.f32 %v6972_v19, %v6972_v19  ;;  %v3612_v0 = vadd.f32 1.0, %v4865_v49 }
 0xa21   :  { %v4869_v11 = vpop.eup %4868  ;;  %v3536_v53 = vmul.f32 %v3520_v5, %v6967_v33  ;;  %v3521_v31 = vmul.f32 %v6977_v6, %v6977_v6  ;;  %v3615_v54 = vadd.f32 1.0, %v4867_v2  ;;  %v3630_v10 = vmul.f32 %v3614_v29, %v3502_v39 }
 0xa22   :  { %v3554_v50 = vmul.f32 0.044715, %v3538_v30  ;;  %v3539_v42 = vmul.f32 %v3523_v4, %v6972_v19  ;;  %v3613_v15 = vadd.f32 1.0, %v4869_v11  ;;  %v3628_v3 = vmul.f32 %v3612_v0, %v3500_v52 }
 0xa23   :  { %v3552_v14 = vmul.f32 0.044715, %v3536_v53  ;;  %v3537_v24 = vmul.f32 %v3521_v31, %v6977_v6  ;;  %v4446_v40 = vpop.f32.mrb[100].mxu0  ;;  %v3631_v56 = vmul.f32 %v3615_v54, %v3503_v34 }
 0xa24   :  { %v3570_v44 = vadd.f32 %v3554_v50, %v6964_v21  ;;  %v3555_v32 = vmul.f32 0.044715, %v3539_v42  ;;  %v6991_v20 = vadd.f32 %v4446_v40, %v6941_v45  ;;  %v3481_v48 = vpop.f32.mrb[101].mxu0  ;;  %v3629_v17 = vmul.f32 %v3613_v15, %v3501_v36 }
 0xa25   :  { %v3568_v43 = vadd.f32 %v3552_v14, %v6967_v33  ;;  %v3553_v23 = vmul.f32 0.044715, %v3537_v24  ;;  %v6995_v57 = vadd.f32 %v6941_v45, %v3481_v48  ;;  %v4447_v27 = vpop.f32.mrb[102].mxu0  ;;  %v3643_v55 = vpack.c.bf16 %v3631_v56, %v3630_v10 }
 0xa26   :  { %v3586_v37 = vmul.f32 0.7978846, %v3570_v44  ;;  %v3571_v7 = vadd.f32 %v3555_v32, %v6972_v19  ;;  %v3526_v62 = vmul.f32 %v6991_v20, %v6991_v20  ;;  %v7001_v59 = vadd.f32 %v4447_v27, %v6941_v45  ;;  %v3484_v35 = vpop.f32.mrb[103].mxu0 }
 0xa27   :  { %v3584_v26 = vmul.f32 0.7978846, %v3568_v43  ;;  %v3569_v63 = vadd.f32 %v3553_v23, %v6977_v6  ;;  %v3524_v8 = vmul.f32 %v6995_v57, %v6995_v57  ;;  %v3485_v16 = vadd.f32 %v6941_v45, %v3484_v35 }
 0xa28   :  { %4870 = vtanh.f32 %v3586_v37  ;;  %v3587_v39 = vmul.f32 0.7978846, %v3571_v7  ;;  %v3542_v49 = vmul.f32 %v3526_v62, %v6991_v20  ;;  %v3527_v5 = vmul.f32 %v7001_v59, %v7001_v59 }
 0xa29   :  { %4872 = vtanh.f32 %v3584_v26  ;;  %v3585_v52 = vmul.f32 0.7978846, %v3569_v63  ;;  %v3540_v29 = vmul.f32 %v3524_v8, %v6995_v57  ;;  %v3525_v2 = vmul.f32 %v3485_v16, %v3485_v16 }
 0xa2a   :  { %4874 = vtanh.f32 %v3587_v39  ;;  %v3558_v30 = vmul.f32 0.044715, %v3542_v49  ;;  %v3543_v4 = vmul.f32 %v3527_v5, %v7001_v59  ;;  %v3642_v0 = vpack.c.bf16 %v3629_v17, %v3628_v3 }
 0xa2b   :  { %4876 = vtanh.f32 %v3585_v52  ;;  %v3556_v34 = vmul.f32 0.044715, %v3540_v29  ;;  %v3541_v45 = vmul.f32 %v3525_v2, %v3485_v16  ;;  %v3506_v48 = vmul.f32 0.5, %v6964_v21 }
 0xa2c   :  { %v3574_v11 = vadd.f32 %v3558_v30, %v6991_v20  ;;  %v3559_v53 = vmul.f32 0.044715, %v3543_v4  ;;  %4468 = vmatprep.mubr.bf16.mxu1 %v3642_v0  ;;  %v3507_v17 = vmul.f32 0.5, %v6972_v19  ;;  %v3504_v23 = vmul.f32 0.5, %v6967_v33 }
 0xa2d   :  { %v3572_v31 = vadd.f32 %v3556_v34, %v6995_v57  ;;  %v3557_v36 = vmul.f32 0.044715, %v3541_v45  ;;  %4469 = vmatmul.mubr.bf16.gmra.mrb[76].mxu1 %v3643_v55  ;;  %v3505_v27 = vmul.f32 0.5, %v6977_v6  ;;  %v3510_v19 = vmul.f32 0.5, %v6991_v20 }
 0xa2e   :  { %v3590_v54 = vmul.f32 0.7978846, %v3574_v11  ;;  %v3575_v50 = vadd.f32 %v3559_v53, %v7001_v59  ;;  %v3511_v33 = vmul.f32 0.5, %v7001_v59  ;;  %v3508_v29 = vmul.f32 0.5, %v6995_v57 }
 0xa2f   :  { %v3588_v42 = vmul.f32 0.7978846, %v3572_v31  ;;  %v3573_v15 = vadd.f32 %v3557_v36, %v3485_v16  ;;  %v3509_v2 = vmul.f32 0.5, %v3485_v16  ;;  %v3949_v31 = vld [vmem:[%s7107_s6 + $0x5] ss:$0 sm:$0xff] }
 0xa30   :  { %4878 = vtanh.f32 %v3590_v54  ;;  %v3591_v10 = vmul.f32 0.7978846, %v3575_v50 }
 0xa31   :  { %4880 = vtanh.f32 %v3588_v42  ;;  %v3589_v14 = vmul.f32 0.7978846, %v3573_v15 }
 0xa32   :  { %v4871_v24 = vpop.eup %4870  ;;  %4882 = vtanh.f32 %v3591_v10 }
 0xa33   :  { %v4873_v40 = vpop.eup %4872  ;;  %4884 = vtanh.f32 %v3589_v14  ;;  %v3618_v3 = vadd.f32 1.0, %v4871_v24 }
 0xa34   :  { %v4875_v56 = vpop.eup %4874  ;;  %v3616_v44 = vadd.f32 1.0, %v4873_v40 }
 0xa35   :  { %v4877_v32 = vpop.eup %4876  ;;  %v3619_v43 = vadd.f32 1.0, %v4875_v56  ;;  %v3634_v37 = vmul.f32 %v3618_v3, %v3506_v48 }
 0xa36   :  { %v3617_v55 = vadd.f32 1.0, %v4877_v32  ;;  %v3632_v62 = vmul.f32 %v3616_v44, %v3504_v23 }
 0xa37   :  { %v3635_v7 = vmul.f32 %v3619_v43, %v3507_v17 }
 0xa38   :  { %v3633_v35 = vmul.f32 %v3617_v55, %v3505_v27 }
 0xa39   :  { %v3645_v26 = vpack.c.bf16 %v3635_v7, %v3634_v37 }
 0xa3a   :  { %v4879_v63 = vpop.eup %4878  ;;  %v3644_v8 = vpack.c.bf16 %v3633_v35, %v3632_v62 }
 0xa3b   :  { %v4881_v39 = vpop.eup %4880  ;;  %v3622_v49 = vadd.f32 1.0, %v4879_v63 }
 0xa3c   :  { %v4883_v5 = vpop.eup %4882  ;;  %4472 = vmatprep.mubr.bf16.mxu1 %v3644_v8  ;;  %v3620_v21 = vadd.f32 1.0, %v4881_v39 }
 0xa3d   :  { %v4885_v52 = vpop.eup %4884  ;;  %4473 = vmatmul.mubr.bf16.gmra.mrb[80].mxu1 %v3645_v26  ;;  %v3623_v6 = vadd.f32 1.0, %v4883_v5  ;;  %v3638_v4 = vmul.f32 %v3622_v49, %v3510_v19 }
 0xa3e   :  { %v3621_v30 = vadd.f32 1.0, %v4885_v52  ;;  %v3636_v34 = vmul.f32 %v3620_v21, %v3508_v29 }
 0xa3f   :  { %v3639_v0 = vmul.f32 %v3623_v6, %v3511_v33 }
 0xa40   :  { %v3637_v45 = vmul.f32 %v3621_v30, %v3509_v2 }
 0xa41   :  { %v3647_v11 = vpack.c.bf16 %v3639_v0, %v3638_v4 }
 0xa42   :  { %v3646_v53 = vpack.c.bf16 %v3637_v45, %v3636_v34 }
 0xa44   :  { %4476 = vmatprep.mubr.bf16.mxu1 %v3646_v53 }
 0xa45   :  { %4477 = vmatmul.mubr.bf16.gmra.mrb[84].mxu1 %v3647_v11 }
 0xaea   :  { %v4466_v20 = vpop.f32.mrb[72].mxu1 }
 0xaeb   :  { %v3759_v36 = vadd.f32 %v4466_v20, %v3949_v31  ;;  %v3750_v59 = vpop.f32.mrb[73].mxu1 }
 0xaec   :  { %v3751_v54 = vadd.f32 %v3949_v31, %v3750_v59  ;;  %v4467_v50 = vpop.f32.mrb[74].mxu1 }
 0xaed   :  { %v3815_v57 = vadd.f32 %v3759_v36, %v6581_v1  ;;  %v3762_v16 = vadd.f32 %v4467_v50, %v3949_v31  ;;  %v3753_v42 = vpop.f32.mrb[75].mxu1 }
 0xaee   :  { %v3813_v15 = vadd.f32 %v3751_v54, %v6575_v12  ;;  %v3754_v10 = vadd.f32 %v3949_v31, %v3753_v42 }
 0xaef   :  { %3831 = vst.msk [vmem:[%s7113_s8 + $0x10] sm:$0xff] %vm69_vm0, %v3815_v57  ;;  %v3816_v14 = vadd.f32 %v3762_v16, %v6596_v18 }
 0xaf0   :  { %3829 = vst.msk [vmem:[%s7113_s8] sm:$0xff] %vm69_vm0, %v3813_v15  ;;  %v3814_v24 = vadd.f32 %v3754_v10, %v6587_v28 }
 0xaf1   :  { %3832 = vst.msk [vmem:[%s7113_s8 + $0x18] sm:$0xff] %vm69_vm0, %v3816_v14 }
 0xaf2   :  { %3830 = vst.msk [vmem:[%s7113_s8 + $0x8] sm:$0xff] %vm69_vm0, %v3814_v24 }
 0xb00   :  { %v4470_v12 = vpop.f32.mrb[76].mxu1 }
 0xb01   :  { %v3775_v1 = vadd.f32 %v4470_v12, %v3949_v31  ;;  %v3766_v18 = vpop.f32.mrb[77].mxu1 }
 0xb02   :  { %v3767_v40 = vadd.f32 %v3949_v31, %v3766_v18  ;;  %v4471_v3 = vpop.f32.mrb[78].mxu1 }
 0xb03   :  { %v3819_v56 = vadd.f32 %v3775_v1, %v6614_v51  ;;  %v3778_v44 = vadd.f32 %v4471_v3, %v3949_v31  ;;  %v3769_v32 = vpop.f32.mrb[79].mxu1 }
 0xb04   :  { %v3817_v28 = vadd.f32 %v3767_v40, %v6607_v47  ;;  %v3770_v48 = vadd.f32 %v3949_v31, %v3769_v32 }
 0xb05   :  { %3835 = vst.msk [vmem:[%s7113_s8 + $0x30] sm:$0xff] %vm69_vm0, %v3819_v56  ;;  %v3820_v17 = vadd.f32 %v3778_v44, %v6626_v38 }
 0xb06   :  { %3833 = vst.msk [vmem:[%s7113_s8 + $0x20] sm:$0xff] %vm69_vm0, %v3817_v28  ;;  %v3818_v43 = vadd.f32 %v3770_v48, %v6619_v46 }
 0xb07   :  { %3836 = vst.msk [vmem:[%s7113_s8 + $0x38] sm:$0xff] %vm69_vm0, %v3820_v17 }
 0xb08   :  { %3834 = vst.msk [vmem:[%s7113_s8 + $0x28] sm:$0xff] %vm69_vm0, %v3818_v43 }
 0xb10   :  { %v4474_v47 = vpop.f32.mrb[80].mxu1 }
 0xb11   :  { %v3791_v51 = vadd.f32 %v4474_v47, %v3949_v31  ;;  %v3782_v38 = vpop.f32.mrb[81].mxu1 }
 0xb12   :  { %v3783_v23 = vadd.f32 %v3949_v31, %v3782_v38  ;;  %v4475_v27 = vpop.f32.mrb[82].mxu1 }
 0xb13   :  { %v3823_v55 = vadd.f32 %v3791_v51, %v6646_v58  ;;  %v3794_v37 = vadd.f32 %v4475_v27, %v3949_v31  ;;  %v3785_v7 = vpop.f32.mrb[83].mxu1 }
 0xb14   :  { %v3821_v46 = vadd.f32 %v3783_v23, %v6639_v61  ;;  %v3786_v62 = vadd.f32 %v3949_v31, %v3785_v7 }
 0xb15   :  { %3839 = vst.msk [vmem:[%s7113_s8 + $0x50] sm:$0xff] %vm69_vm0, %v3823_v55  ;;  %v3824_v35 = vadd.f32 %v3794_v37, %v6658_v22 }
 0xb16   :  { %3837 = vst.msk [vmem:[%s7113_s8 + $0x40] sm:$0xff] %vm69_vm0, %v3821_v46  ;;  %v3822_v26 = vadd.f32 %v3786_v62, %v6651_v25 }
 0xb17   :  { %3840 = vst.msk [vmem:[%s7113_s8 + $0x58] sm:$0xff] %vm69_vm0, %v3824_v35 }
 0xb18   :  { %3838 = vst.msk [vmem:[%s7113_s8 + $0x48] sm:$0xff] %vm69_vm0, %v3822_v26  ;;  %v4478_v61 = vpop.f32.mrb[84].mxu1 }
 0xb19   :  { %v3807_v58 = vadd.f32 %v4478_v61, %v3949_v31  ;;  %v3798_v22 = vpop.f32.mrb[85].mxu1 }
 0xb1a   :  { %v3799_v63 = vadd.f32 %v3949_v31, %v3798_v22  ;;  %v4479_v8 = vpop.f32.mrb[86].mxu1 }
 0xb1b   :  { %v3827_v39 = vadd.f32 %v3807_v58, %v6678_v41  ;;  %v3810_v49 = vadd.f32 %v4479_v8, %v3949_v31  ;;  %v3801_v5 = vpop.f32.mrb[87].mxu1 }
 0xb1c   :  { %v3825_v25 = vadd.f32 %v3799_v63, %v6669_v13  ;;  %v3802_v21 = vadd.f32 %v3949_v31, %v3801_v5 }
 0xb1d   :  { %3843 = vst.msk [vmem:[%s7113_s8 + $0x70] sm:$0xff] %vm69_vm0, %v3827_v39  ;;  %v3828_v52 = vadd.f32 %v3810_v49, %v6690_v9 }
 0xb1e   :  { %3841 = vst.msk [vmem:[%s7113_s8 + $0x60] sm:$0xff] %vm69_vm0, %v3825_v25  ;;  %v3826_v19 = vadd.f32 %v3802_v21, %v6683_v60 }
 0xb1f   :  { %3844 = vst.msk [vmem:[%s7113_s8 + $0x78] sm:$0xff] %vm69_vm0, %v3828_v52 }
 0xb20   :  { %3842 = vst.msk [vmem:[%s7113_s8 + $0x68] sm:$0xff] %vm69_vm0, %v3826_v19 }

</bundles_post_ra>
